<compile_context>
chip_gen: v7x
topology: tpu7x:2x2x1
jax: 0.10.0
libtpu: 0.0.40
codegen_flags: <defaults>
</compile_context>

<pallas_src>
import math
from functools import partial

import jax
import jax.numpy as jnp
from jax.experimental import pallas as pl
from jax.experimental.pallas import tpu as pltpu


# ------------------------------ fused Pallas kernel ------------------------------

def _set_transformer_kernel(x_ref, i0_ref, i1_ref, s_ref, w_ref, b_ref, wf_ref, bf_ref,
                            o_ref, *, num_heads, dim_V):
    """Whole SetTransformer forward for one batch element, entirely in VMEM.

    x_ref  : (1, N, D)            input set, feature-padded to D = dim_hidden
    i0_ref : (1, num_inds, D)     inducing points of encoder ISAB 0
    i1_ref : (1, num_inds, D)     inducing points of encoder ISAB 1
    s_ref  : (1, num_outputs, D)  PMA seed vectors
    w_ref  : (7*4, D, D)          stacked [wq, wk, wv, wo] per MAB (zero-padded rows)
    b_ref  : (7*4, 1, D)          stacked biases
    wf_ref : (D, dim_output)      final linear weight
    bf_ref : (1, dim_output)      final linear bias
    o_ref  : (1, num_outputs, dim_output)
    """
    dh = dim_V // num_heads
    scale = 1.0 / math.sqrt(dim_V)      # NB: PyTorch scales by sqrt(dim_V), not sqrt(d_head)

    def dense(x, i):
        return jnp.dot(x, w_ref[i], preferred_element_type=jnp.float32) + b_ref[i]

    def split_heads(m):                 # (n, dim_V) -> (H, n, dh) head-major
        return jnp.stack([m[:, h * dh:(h + 1) * dh] for h in range(num_heads)], axis=0)

    def mab(qx, kx, idx):
        base = 4 * idx
        q = dense(qx, base + 0)         # (nq, dim_V)
        k = dense(kx, base + 1)         # (nk, dim_V)
        v = dense(kx, base + 2)         # (nk, dim_V)
        qh, kh, vh = split_heads(q), split_heads(k), split_heads(v)
        s = jnp.einsum("hqd,hkd->hqk", qh, kh,
                       preferred_element_type=jnp.float32) * scale
        s = s - jnp.max(s, axis=-1, keepdims=True)
        p = jnp.exp(s)
        denom = jnp.sum(p, axis=-1, keepdims=True)                       # (H, nq, 1)
        pv = jnp.einsum("hqk,hkd->hqd", p, vh, preferred_element_type=jnp.float32)
        oh = qh + pv * pl.reciprocal(denom, approx=True)                 # EUP reciprocal
        o = jnp.concatenate([oh[h] for h in range(num_heads)], axis=-1)  # (nq, dim_V)
        h_fc = dense(o, base + 3)
        return o + jnp.maximum(h_fc, 0.0)

    x = x_ref[0]
    # encoder: two ISAB layers
    h0 = mab(i0_ref[0], x, 0)
    x = mab(x, h0, 1)
    h1 = mab(i1_ref[0], x, 2)
    x = mab(x, h1, 3)
    # decoder: PMA, SAB, SAB
    x = mab(s_ref[0], x, 4)
    x = mab(x, x, 5)
    x = mab(x, x, 6)
    # final linear
    o_ref[0] = (jnp.dot(x, wf_ref[...], preferred_element_type=jnp.float32)
                + bf_ref[...]).astype(o_ref.dtype)


# ------------------------------ wrapper / packing ------------------------------

def _pack_mabs(mab_params, dim_hidden):
    """Stack 7 MABs' [wq, wk, wv, wo] into (28, D, D) and biases into (28, 1, D).
    Weight matrices with in_features < dim_hidden are zero-padded along rows."""
    ws, bs = [], []
    for p in mab_params:
        for wname, bname in (("wq", "bq"), ("wk", "bk"), ("wv", "bv"), ("wo", "bo")):
            w = p[wname]
            din = w.shape[0]
            if din < dim_hidden:
                w = jnp.pad(w, ((0, dim_hidden - din), (0, 0)))
            ws.append(w)
            bs.append(p[bname])                     # (1, dim_hidden)
    return jnp.stack(ws, axis=0), jnp.stack(bs, axis=0)


def set_transformer_forward(X, params, num_heads):
    B, N, dim_input = X.shape
    dim_hidden = params["enc0"]["I"].shape[-1]
    num_inds = params["enc0"]["I"].shape[1]
    num_outputs = params["dec0"]["S"].shape[1]
    wf, bf = params["final"]
    dim_output = wf.shape[1]
    assert dim_input <= dim_hidden, "feature-padding scheme assumes dim_input <= dim_hidden"

    mabs = [params["enc0"]["mab0"], params["enc0"]["mab1"],
            params["enc1"]["mab0"], params["enc1"]["mab1"],
            params["dec0"]["mab"], params["dec1"]["mab"], params["dec2"]["mab"]]
    W, Bias = _pack_mabs(mabs, dim_hidden)

    # zero-pad input features to dim_hidden (matching zero-padded weight rows)
    Xp = X if dim_input == dim_hidden else jnp.pad(
        X, ((0, 0), (0, 0), (0, dim_hidden - dim_input)))

    kernel = partial(_set_transformer_kernel, num_heads=num_heads, dim_V=dim_hidden)

    def const3(shape):
        return pl.BlockSpec(shape, lambda b: (0, 0, 0))

    def const2(shape):
        return pl.BlockSpec(shape, lambda b: (0, 0))

    return pl.pallas_call(
        kernel,
        out_shape=jax.ShapeDtypeStruct((B, num_outputs, dim_output), jnp.float32),
        grid=(B,),
        in_specs=[
            pl.BlockSpec((1, N, dim_hidden), lambda b: (b, 0, 0)),   # X: streams over batch
            const3((1, num_inds, dim_hidden)),                       # I0: resident
            const3((1, num_inds, dim_hidden)),                       # I1: resident
            const3((1, num_outputs, dim_hidden)),                    # S : resident
            const3(W.shape),                                         # stacked weights: resident
            const3(Bias.shape),                                      # stacked biases : resident
            const2(wf.shape),
            const2(bf.shape),
        ],
        out_specs=pl.BlockSpec((1, num_outputs, dim_output), lambda b: (b, 0, 0)),
        compiler_params=pltpu.CompilerParams(dimension_semantics=("parallel",)),
    )(Xp, params["enc0"]["I"], params["enc1"]["I"], params["dec0"]["S"], W, Bias, wf, bf)


# -------------------------- parameter initialization ------------------------

def _init_linear(key, din, dout):
    kw, kb = jax.random.split(key)
    bound = 1.0 / math.sqrt(din)
    w = jax.random.uniform(kw, (din, dout), jnp.float32, -bound, bound)
    b = jax.random.uniform(kb, (1, dout), jnp.float32, -bound, bound)
    return w, b


def _init_mab(key, dim_Q, dim_K, dim_V):
    ks = jax.random.split(key, 4)
    wq, bq = _init_linear(ks[0], dim_Q, dim_V)
    wk, bk = _init_linear(ks[1], dim_K, dim_V)
    wv, bv = _init_linear(ks[2], dim_K, dim_V)
    wo, bo = _init_linear(ks[3], dim_V, dim_V)
    return dict(wq=wq, bq=bq, wk=wk, bk=bk, wv=wv, bv=bv, wo=wo, bo=bo)


def _xavier(key, shape, fan_in, fan_out):
    bound = math.sqrt(6.0 / (fan_in + fan_out))
    return jax.random.uniform(key, shape, jnp.float32, -bound, bound)


def init_set_transformer(key, dim_input, num_outputs, dim_output,
                         num_inds, dim_hidden, num_heads):
    ks = jax.random.split(key, 12)
    params = {
        "enc0": {
            "I": _xavier(ks[0], (1, num_inds, dim_hidden), num_inds, dim_hidden),
            "mab0": _init_mab(ks[1], dim_hidden, dim_input, dim_hidden),
            "mab1": _init_mab(ks[2], dim_input, dim_hidden, dim_hidden),
        },
        "enc1": {
            "I": _xavier(ks[3], (1, num_inds, dim_hidden), num_inds, dim_hidden),
            "mab0": _init_mab(ks[4], dim_hidden, dim_hidden, dim_hidden),
            "mab1": _init_mab(ks[5], dim_hidden, dim_hidden, dim_hidden),
        },
        "dec0": {
            "S": _xavier(ks[6], (1, num_outputs, dim_hidden), num_outputs, dim_hidden),
            "mab": _init_mab(ks[7], dim_hidden, dim_hidden, dim_hidden),
        },
        "dec1": {"mab": _init_mab(ks[8], dim_hidden, dim_hidden, dim_hidden)},
        "dec2": {"mab": _init_mab(ks[9], dim_hidden, dim_hidden, dim_hidden)},
        "final": _init_linear(ks[10], dim_hidden, dim_output),
    }
    return params


# ------------------------- pure-JAX reference (check) ------------------------

def _mab_ref(Qx, Kx, p, num_heads):
    hp = jax.lax.Precision.HIGHEST
    dim_V = p["wq"].shape[1]
    dh = dim_V // num_heads
    Q = jnp.einsum("bnd,dh->bnh", Qx, p["wq"], precision=hp) + p["bq"][0]
    K = jnp.einsum("bnd,dh->bnh", Kx, p["wk"], precision=hp) + p["bk"][0]
    V = jnp.einsum("bnd,dh->bnh", Kx, p["wv"], precision=hp) + p["bv"][0]
    B, Nq, _ = Q.shape
    Nk = K.shape[1]
    Qh = Q.reshape(B, Nq, num_heads, dh)
    Kh = K.reshape(B, Nk, num_heads, dh)
    Vh = V.reshape(B, Nk, num_heads, dh)
    S = jnp.einsum("bqhd,bkhd->bhqk", Qh, Kh, precision=hp) / math.sqrt(dim_V)
    A = jax.nn.softmax(S, axis=-1)
    O = Qh + jnp.einsum("bhqk,bkhd->bqhd", A, Vh, precision=hp)
    O = O.reshape(B, Nq, dim_V)
    H = jnp.einsum("bnd,dh->bnh", O, p["wo"], precision=hp) + p["bo"][0]
    return O + jnp.maximum(H, 0.0)


def _forward_ref(X, params, num_heads):
    B = X.shape[0]
    for name in ("enc0", "enc1"):
        p = params[name]
        I = jnp.broadcast_to(p["I"], (B,) + p["I"].shape[1:])
        H = _mab_ref(I, X, p["mab0"], num_heads)
        X = _mab_ref(X, H, p["mab1"], num_heads)
    p = params["dec0"]
    S = jnp.broadcast_to(p["S"], (B,) + p["S"].shape[1:])
    X = _mab_ref(S, X, p["mab"], num_heads)
    X = _mab_ref(X, X, params["dec1"]["mab"], num_heads)
    X = _mab_ref(X, X, params["dec2"]["mab"], num_heads)
    w, b = params["final"]
    return jnp.einsum("bnd,dh->bnh", X, w, precision=jax.lax.Precision.HIGHEST) + b[0]


# ----------------------------------- main ------------------------------------

if __name__ == "__main__":
    # Small config consistent with the module (ln=False path).
    dim_input, num_outputs, dim_output = 4, 4, 8
    num_inds, dim_hidden, num_heads = 16, 32, 2
    B, N = 2, 8                                 # batch of 2 sets, 8 elements each

    key = jax.random.PRNGKey(0)
    kx, kp = jax.random.split(key)
    X = jax.random.normal(kx, (B, N, dim_input), dtype=jnp.float32)
    params = init_set_transformer(kp, dim_input, num_outputs, dim_output,
                                  num_inds, dim_hidden, num_heads)

    out = set_transformer_forward(X, params, num_heads)
    out = jax.block_until_ready(out)

    assert out.shape == (B, num_outputs, dim_output), out.shape
    ref = jax.block_until_ready(_forward_ref(X, params, num_heads))
    # Tolerance accounts for the EUP approx reciprocal in the softmax across 7 stacked MABs.
    err = float(jnp.max(jnp.abs(out - ref)))
    assert jnp.allclose(out, ref, atol=2e-2, rtol=2e-2), err

    print("KERNEL_OK")
</pallas_src>

<mosaic_0001>
module attributes {stable_mosaic.version = 11 : i64} {
  func.func @_set_transformer_kernel(%arg0: i32, %arg1: memref<1x8x32xf32, #tpu.memory_space<vmem>>, %arg2: memref<1x16x32xf32, #tpu.memory_space<vmem>>, %arg3: memref<1x16x32xf32, #tpu.memory_space<vmem>>, %arg4: memref<1x4x32xf32, #tpu.memory_space<vmem>>, %arg5: memref<28x32x32xf32, #tpu.memory_space<vmem>>, %arg6: memref<28x1x32xf32, #tpu.memory_space<vmem>>, %arg7: memref<32x8xf32, #tpu.memory_space<vmem>>, %arg8: memref<1x8xf32, #tpu.memory_space<vmem>>, %arg9: memref<1x4x8xf32, #tpu.memory_space<vmem>>) attributes {dimension_semantics = [#tpu.dimension_semantics<parallel>], iteration_bounds = array<i64: 2>, scalar_prefetch = 0 : i64, scratch_operands = 0 : i64, tpu.core_type = #tpu.core_type<tc>, window_params = [{transform_indices = @transform_0, window_bounds = array<i64: 1, 8, 32>}, {pipeline_mode = #tpu.pipeline_mode<synchronous>, transform_indices = @transform_1, window_bounds = array<i64: 1, 16, 32>}, {pipeline_mode = #tpu.pipeline_mode<synchronous>, transform_indices = @transform_2, window_bounds = array<i64: 1, 16, 32>}, {pipeline_mode = #tpu.pipeline_mode<synchronous>, transform_indices = @transform_3, window_bounds = array<i64: 1, 4, 32>}, {pipeline_mode = #tpu.pipeline_mode<synchronous>, transform_indices = @transform_4, window_bounds = array<i64: 28, 32, 32>}, {pipeline_mode = #tpu.pipeline_mode<synchronous>, transform_indices = @transform_5, window_bounds = array<i64: 28, 1, 32>}, {pipeline_mode = #tpu.pipeline_mode<synchronous>, transform_indices = @transform_6, window_bounds = array<i64: 32, 8>}, {pipeline_mode = #tpu.pipeline_mode<synchronous>, transform_indices = @transform_7, window_bounds = array<i64: 1, 8>}, {transform_indices = @transform_8, window_bounds = array<i64: 1, 4, 8>}]} {
    %c0 = arith.constant 0 : index
    %c0_0 = arith.constant 0 : index
    %c0_1 = arith.constant 0 : index
    %0 = vector.load %arg1[%c0, %c0_0, %c0_1] : memref<1x8x32xf32, #tpu.memory_space<vmem>>, vector<1x8x32xf32>
    %1 = vector.shape_cast %0 : vector<1x8x32xf32> to vector<8x32xf32>
    %c0_2 = arith.constant 0 : index
    %c0_3 = arith.constant 0 : index
    %c0_4 = arith.constant 0 : index
    %2 = vector.load %arg2[%c0_2, %c0_3, %c0_4] : memref<1x16x32xf32, #tpu.memory_space<vmem>>, vector<1x16x32xf32>
    %3 = vector.shape_cast %2 : vector<1x16x32xf32> to vector<16x32xf32>
    %c0_5 = arith.constant 0 : index
    %c0_6 = arith.constant 0 : index
    %c0_7 = arith.constant 0 : index
    %4 = vector.load %arg5[%c0_5, %c0_6, %c0_7] : memref<28x32x32xf32, #tpu.memory_space<vmem>>, vector<1x32x32xf32>
    %5 = vector.shape_cast %4 : vector<1x32x32xf32> to vector<32x32xf32>
    %cst = arith.constant dense<0.000000e+00> : vector<16x32xf32>
    %6 = tpu.matmul %3, %5, %cst {dimension_numbers = #tpu.dot_dimension_numbers<[1], [0], [0], [1], [0, 0, 1, 1], [], []>} : vector<16x32xf32>, vector<32x32xf32>, vector<16x32xf32> -> vector<16x32xf32>
    %c0_8 = arith.constant 0 : index
    %c0_9 = arith.constant 0 : index
    %c0_10 = arith.constant 0 : index
    %7 = vector.load %arg6[%c0_8, %c0_9, %c0_10] : memref<28x1x32xf32, #tpu.memory_space<vmem>>, vector<1x1x32xf32>
    %8 = vector.shape_cast %7 : vector<1x1x32xf32> to vector<1x32xf32>
    %9 = vector.broadcast %8 : vector<1x32xf32> to vector<16x32xf32>
    %10 = arith.addf %6, %9 : vector<16x32xf32>
    %c1 = arith.constant 1 : index
    %c0_11 = arith.constant 0 : index
    %c0_12 = arith.constant 0 : index
    %11 = vector.load %arg5[%c1, %c0_11, %c0_12] : memref<28x32x32xf32, #tpu.memory_space<vmem>>, vector<1x32x32xf32>
    %12 = vector.shape_cast %11 : vector<1x32x32xf32> to vector<32x32xf32>
    %cst_13 = arith.constant dense<0.000000e+00> : vector<8x32xf32>
    %13 = tpu.matmul %1, %12, %cst_13 {dimension_numbers = #tpu.dot_dimension_numbers<[1], [0], [0], [1], [0, 0, 1, 1], [], []>} : vector<8x32xf32>, vector<32x32xf32>, vector<8x32xf32> -> vector<8x32xf32>
    %c1_14 = arith.constant 1 : index
    %c0_15 = arith.constant 0 : index
    %c0_16 = arith.constant 0 : index
    %14 = vector.load %arg6[%c1_14, %c0_15, %c0_16] : memref<28x1x32xf32, #tpu.memory_space<vmem>>, vector<1x1x32xf32>
    %15 = vector.shape_cast %14 : vector<1x1x32xf32> to vector<1x32xf32>
    %16 = vector.broadcast %15 : vector<1x32xf32> to vector<8x32xf32>
    %17 = arith.addf %13, %16 : vector<8x32xf32>
    %c2 = arith.constant 2 : index
    %c0_17 = arith.constant 0 : index
    %c0_18 = arith.constant 0 : index
    %18 = vector.load %arg5[%c2, %c0_17, %c0_18] : memref<28x32x32xf32, #tpu.memory_space<vmem>>, vector<1x32x32xf32>
    %19 = vector.shape_cast %18 : vector<1x32x32xf32> to vector<32x32xf32>
    %cst_19 = arith.constant dense<0.000000e+00> : vector<8x32xf32>
    %20 = tpu.matmul %1, %19, %cst_19 {dimension_numbers = #tpu.dot_dimension_numbers<[1], [0], [0], [1], [0, 0, 1, 1], [], []>} : vector<8x32xf32>, vector<32x32xf32>, vector<8x32xf32> -> vector<8x32xf32>
    %c2_20 = arith.constant 2 : index
    %c0_21 = arith.constant 0 : index
    %c0_22 = arith.constant 0 : index
    %21 = vector.load %arg6[%c2_20, %c0_21, %c0_22] : memref<28x1x32xf32, #tpu.memory_space<vmem>>, vector<1x1x32xf32>
    %22 = vector.shape_cast %21 : vector<1x1x32xf32> to vector<1x32xf32>
    %23 = vector.broadcast %22 : vector<1x32xf32> to vector<8x32xf32>
    %24 = arith.addf %20, %23 : vector<8x32xf32>
    %25 = vector.extract_strided_slice %10 {offsets = [0, 0], sizes = [16, 16], strides = [1, 1]} : vector<16x32xf32> to vector<16x16xf32>
    %26 = vector.extract_strided_slice %10 {offsets = [0, 16], sizes = [16, 16], strides = [1, 1]} : vector<16x32xf32> to vector<16x16xf32>
    %27 = vector.shape_cast %25 : vector<16x16xf32> to vector<1x16x16xf32>
    %28 = vector.shape_cast %26 : vector<16x16xf32> to vector<1x16x16xf32>
    %29 = tpu.concatenate %27, %28 in 0 : vector<1x16x16xf32>, vector<1x16x16xf32> -> vector<2x16x16xf32>
    %30 = vector.extract_strided_slice %17 {offsets = [0, 0], sizes = [8, 16], strides = [1, 1]} : vector<8x32xf32> to vector<8x16xf32>
    %31 = vector.extract_strided_slice %17 {offsets = [0, 16], sizes = [8, 16], strides = [1, 1]} : vector<8x32xf32> to vector<8x16xf32>
    %32 = vector.shape_cast %30 : vector<8x16xf32> to vector<1x8x16xf32>
    %33 = vector.shape_cast %31 : vector<8x16xf32> to vector<1x8x16xf32>
    %34 = tpu.concatenate %32, %33 in 0 : vector<1x8x16xf32>, vector<1x8x16xf32> -> vector<2x8x16xf32>
    %35 = vector.extract_strided_slice %24 {offsets = [0, 0], sizes = [8, 16], strides = [1, 1]} : vector<8x32xf32> to vector<8x16xf32>
    %36 = vector.extract_strided_slice %24 {offsets = [0, 16], sizes = [8, 16], strides = [1, 1]} : vector<8x32xf32> to vector<8x16xf32>
    %37 = vector.shape_cast %35 : vector<8x16xf32> to vector<1x8x16xf32>
    %38 = vector.shape_cast %36 : vector<8x16xf32> to vector<1x8x16xf32>
    %39 = tpu.concatenate %37, %38 in 0 : vector<1x8x16xf32>, vector<1x8x16xf32> -> vector<2x8x16xf32>
    "tpu.trace_start"() <{level = 10 : i32, message = "hqd,hkd->hqk"}> : () -> ()
    %cst_23 = arith.constant dense<0.000000e+00> : vector<2x16x8xf32>
    %40 = tpu.matmul %29, %34, %cst_23 {dimension_numbers = #tpu.dot_dimension_numbers<[2], [2], [1], [1], [0, 0, 0, 1, 1, 1], [0], [0]>} : vector<2x16x16xf32>, vector<2x8x16xf32>, vector<2x16x8xf32> -> vector<2x16x8xf32>
    "tpu.trace_stop"() : () -> ()
    %cst_24 = arith.constant 0.176776692 : f32
    %41 = vector.broadcast %cst_24 : f32 to vector<2x16x8xf32>
    %42 = arith.mulf %40, %41 : vector<2x16x8xf32>
    %cst_25 = arith.constant dense<0xFF800000> : vector<2x16xf32>
    %43 = vector.multi_reduction <maximumf>, %42, %cst_25 [2] : vector<2x16x8xf32> to vector<2x16xf32>
    %44 = vector.shape_cast %43 : vector<2x16xf32> to vector<2x16x1xf32>
    %45 = vector.broadcast %44 : vector<2x16x1xf32> to vector<2x16x8xf32>
    %46 = arith.subf %42, %45 : vector<2x16x8xf32>
    %47 = math.exp %46 : vector<2x16x8xf32>
    %cst_26 = arith.constant dense<0.000000e+00> : vector<2x16xf32>
    %48 = vector.multi_reduction <add>, %47, %cst_26 [2] : vector<2x16x8xf32> to vector<2x16xf32>
    %49 = vector.shape_cast %48 : vector<2x16xf32> to vector<2x16x1xf32>
    "tpu.trace_start"() <{level = 10 : i32, message = "hqk,hkd->hqd"}> : () -> ()
    %cst_27 = arith.constant dense<0.000000e+00> : vector<2x16x16xf32>
    %50 = tpu.matmul %47, %39, %cst_27 {dimension_numbers = #tpu.dot_dimension_numbers<[2], [1], [1], [2], [0, 0, 0, 1, 1, 2], [0], [0]>} : vector<2x16x8xf32>, vector<2x8x16xf32>, vector<2x16x16xf32> -> vector<2x16x16xf32>
    "tpu.trace_stop"() : () -> ()
    %51 = tpu.reciprocal %49 {approx = true} : vector<2x16x1xf32> -> vector<2x16x1xf32>
    %52 = vector.broadcast %51 : vector<2x16x1xf32> to vector<2x16x16xf32>
    %53 = arith.mulf %50, %52 : vector<2x16x16xf32>
    %54 = arith.addf %29, %53 : vector<2x16x16xf32>
    %55 = vector.extract_strided_slice %54 {offsets = [0, 0, 0], sizes = [1, 16, 16], strides = [1, 1, 1]} : vector<2x16x16xf32> to vector<1x16x16xf32>
    %56 = vector.shape_cast %55 : vector<1x16x16xf32> to vector<16x16xf32>
    %57 = vector.extract_strided_slice %54 {offsets = [1, 0, 0], sizes = [1, 16, 16], strides = [1, 1, 1]} : vector<2x16x16xf32> to vector<1x16x16xf32>
    %58 = vector.shape_cast %57 : vector<1x16x16xf32> to vector<16x16xf32>
    %59 = tpu.concatenate %56, %58 in 1 : vector<16x16xf32>, vector<16x16xf32> -> vector<16x32xf32>
    %c3 = arith.constant 3 : index
    %c0_28 = arith.constant 0 : index
    %c0_29 = arith.constant 0 : index
    %60 = vector.load %arg5[%c3, %c0_28, %c0_29] : memref<28x32x32xf32, #tpu.memory_space<vmem>>, vector<1x32x32xf32>
    %61 = vector.shape_cast %60 : vector<1x32x32xf32> to vector<32x32xf32>
    %cst_30 = arith.constant dense<0.000000e+00> : vector<16x32xf32>
    %62 = tpu.matmul %59, %61, %cst_30 {dimension_numbers = #tpu.dot_dimension_numbers<[1], [0], [0], [1], [0, 0, 1, 1], [], []>} : vector<16x32xf32>, vector<32x32xf32>, vector<16x32xf32> -> vector<16x32xf32>
    %c3_31 = arith.constant 3 : index
    %c0_32 = arith.constant 0 : index
    %c0_33 = arith.constant 0 : index
    %63 = vector.load %arg6[%c3_31, %c0_32, %c0_33] : memref<28x1x32xf32, #tpu.memory_space<vmem>>, vector<1x1x32xf32>
    %64 = vector.shape_cast %63 : vector<1x1x32xf32> to vector<1x32xf32>
    %65 = vector.broadcast %64 : vector<1x32xf32> to vector<16x32xf32>
    %66 = arith.addf %62, %65 : vector<16x32xf32>
    %cst_34 = arith.constant 0.000000e+00 : f32
    %67 = vector.broadcast %cst_34 : f32 to vector<16x32xf32>
    %68 = arith.maximumf %66, %67 : vector<16x32xf32>
    %69 = arith.addf %59, %68 : vector<16x32xf32>
    %c4 = arith.constant 4 : index
    %c0_35 = arith.constant 0 : index
    %c0_36 = arith.constant 0 : index
    %70 = vector.load %arg5[%c4, %c0_35, %c0_36] : memref<28x32x32xf32, #tpu.memory_space<vmem>>, vector<1x32x32xf32>
    %71 = vector.shape_cast %70 : vector<1x32x32xf32> to vector<32x32xf32>
    %cst_37 = arith.constant dense<0.000000e+00> : vector<8x32xf32>
    %72 = tpu.matmul %1, %71, %cst_37 {dimension_numbers = #tpu.dot_dimension_numbers<[1], [0], [0], [1], [0, 0, 1, 1], [], []>} : vector<8x32xf32>, vector<32x32xf32>, vector<8x32xf32> -> vector<8x32xf32>
    %c4_38 = arith.constant 4 : index
    %c0_39 = arith.constant 0 : index
    %c0_40 = arith.constant 0 : index
    %73 = vector.load %arg6[%c4_38, %c0_39, %c0_40] : memref<28x1x32xf32, #tpu.memory_space<vmem>>, vector<1x1x32xf32>
    %74 = vector.shape_cast %73 : vector<1x1x32xf32> to vector<1x32xf32>
    %75 = vector.broadcast %74 : vector<1x32xf32> to vector<8x32xf32>
    %76 = arith.addf %72, %75 : vector<8x32xf32>
    %c5 = arith.constant 5 : index
    %c0_41 = arith.constant 0 : index
    %c0_42 = arith.constant 0 : index
    %77 = vector.load %arg5[%c5, %c0_41, %c0_42] : memref<28x32x32xf32, #tpu.memory_space<vmem>>, vector<1x32x32xf32>
    %78 = vector.shape_cast %77 : vector<1x32x32xf32> to vector<32x32xf32>
    %cst_43 = arith.constant dense<0.000000e+00> : vector<16x32xf32>
    %79 = tpu.matmul %69, %78, %cst_43 {dimension_numbers = #tpu.dot_dimension_numbers<[1], [0], [0], [1], [0, 0, 1, 1], [], []>} : vector<16x32xf32>, vector<32x32xf32>, vector<16x32xf32> -> vector<16x32xf32>
    %c5_44 = arith.constant 5 : index
    %c0_45 = arith.constant 0 : index
    %c0_46 = arith.constant 0 : index
    %80 = vector.load %arg6[%c5_44, %c0_45, %c0_46] : memref<28x1x32xf32, #tpu.memory_space<vmem>>, vector<1x1x32xf32>
    %81 = vector.shape_cast %80 : vector<1x1x32xf32> to vector<1x32xf32>
    %82 = vector.broadcast %81 : vector<1x32xf32> to vector<16x32xf32>
    %83 = arith.addf %79, %82 : vector<16x32xf32>
    %c6 = arith.constant 6 : index
    %c0_47 = arith.constant 0 : index
    %c0_48 = arith.constant 0 : index
    %84 = vector.load %arg5[%c6, %c0_47, %c0_48] : memref<28x32x32xf32, #tpu.memory_space<vmem>>, vector<1x32x32xf32>
    %85 = vector.shape_cast %84 : vector<1x32x32xf32> to vector<32x32xf32>
    %cst_49 = arith.constant dense<0.000000e+00> : vector<16x32xf32>
    %86 = tpu.matmul %69, %85, %cst_49 {dimension_numbers = #tpu.dot_dimension_numbers<[1], [0], [0], [1], [0, 0, 1, 1], [], []>} : vector<16x32xf32>, vector<32x32xf32>, vector<16x32xf32> -> vector<16x32xf32>
    %c6_50 = arith.constant 6 : index
    %c0_51 = arith.constant 0 : index
    %c0_52 = arith.constant 0 : index
    %87 = vector.load %arg6[%c6_50, %c0_51, %c0_52] : memref<28x1x32xf32, #tpu.memory_space<vmem>>, vector<1x1x32xf32>
    %88 = vector.shape_cast %87 : vector<1x1x32xf32> to vector<1x32xf32>
    %89 = vector.broadcast %88 : vector<1x32xf32> to vector<16x32xf32>
    %90 = arith.addf %86, %89 : vector<16x32xf32>
    %91 = vector.extract_strided_slice %76 {offsets = [0, 0], sizes = [8, 16], strides = [1, 1]} : vector<8x32xf32> to vector<8x16xf32>
    %92 = vector.extract_strided_slice %76 {offsets = [0, 16], sizes = [8, 16], strides = [1, 1]} : vector<8x32xf32> to vector<8x16xf32>
    %93 = vector.shape_cast %91 : vector<8x16xf32> to vector<1x8x16xf32>
    %94 = vector.shape_cast %92 : vector<8x16xf32> to vector<1x8x16xf32>
    %95 = tpu.concatenate %93, %94 in 0 : vector<1x8x16xf32>, vector<1x8x16xf32> -> vector<2x8x16xf32>
    %96 = vector.extract_strided_slice %83 {offsets = [0, 0], sizes = [16, 16], strides = [1, 1]} : vector<16x32xf32> to vector<16x16xf32>
    %97 = vector.extract_strided_slice %83 {offsets = [0, 16], sizes = [16, 16], strides = [1, 1]} : vector<16x32xf32> to vector<16x16xf32>
    %98 = vector.shape_cast %96 : vector<16x16xf32> to vector<1x16x16xf32>
    %99 = vector.shape_cast %97 : vector<16x16xf32> to vector<1x16x16xf32>
    %100 = tpu.concatenate %98, %99 in 0 : vector<1x16x16xf32>, vector<1x16x16xf32> -> vector<2x16x16xf32>
    %101 = vector.extract_strided_slice %90 {offsets = [0, 0], sizes = [16, 16], strides = [1, 1]} : vector<16x32xf32> to vector<16x16xf32>
    %102 = vector.extract_strided_slice %90 {offsets = [0, 16], sizes = [16, 16], strides = [1, 1]} : vector<16x32xf32> to vector<16x16xf32>
    %103 = vector.shape_cast %101 : vector<16x16xf32> to vector<1x16x16xf32>
    %104 = vector.shape_cast %102 : vector<16x16xf32> to vector<1x16x16xf32>
    %105 = tpu.concatenate %103, %104 in 0 : vector<1x16x16xf32>, vector<1x16x16xf32> -> vector<2x16x16xf32>
    "tpu.trace_start"() <{level = 10 : i32, message = "hqd,hkd->hqk"}> : () -> ()
    %cst_53 = arith.constant dense<0.000000e+00> : vector<2x8x16xf32>
    %106 = tpu.matmul %95, %100, %cst_53 {dimension_numbers = #tpu.dot_dimension_numbers<[2], [2], [1], [1], [0, 0, 0, 1, 1, 1], [0], [0]>} : vector<2x8x16xf32>, vector<2x16x16xf32>, vector<2x8x16xf32> -> vector<2x8x16xf32>
    "tpu.trace_stop"() : () -> ()
    %cst_54 = arith.constant 0.176776692 : f32
    %107 = vector.broadcast %cst_54 : f32 to vector<2x8x16xf32>
    %108 = arith.mulf %106, %107 : vector<2x8x16xf32>
    %cst_55 = arith.constant dense<0xFF800000> : vector<2x8xf32>
    %109 = vector.multi_reduction <maximumf>, %108, %cst_55 [2] : vector<2x8x16xf32> to vector<2x8xf32>
    %110 = vector.shape_cast %109 : vector<2x8xf32> to vector<2x8x1xf32>
    %111 = vector.broadcast %110 : vector<2x8x1xf32> to vector<2x8x16xf32>
    %112 = arith.subf %108, %111 : vector<2x8x16xf32>
    %113 = math.exp %112 : vector<2x8x16xf32>
    %cst_56 = arith.constant dense<0.000000e+00> : vector<2x8xf32>
    %114 = vector.multi_reduction <add>, %113, %cst_56 [2] : vector<2x8x16xf32> to vector<2x8xf32>
    %115 = vector.shape_cast %114 : vector<2x8xf32> to vector<2x8x1xf32>
    "tpu.trace_start"() <{level = 10 : i32, message = "hqk,hkd->hqd"}> : () -> ()
    %cst_57 = arith.constant dense<0.000000e+00> : vector<2x8x16xf32>
    %116 = tpu.matmul %113, %105, %cst_57 {dimension_numbers = #tpu.dot_dimension_numbers<[2], [1], [1], [2], [0, 0, 0, 1, 1, 2], [0], [0]>} : vector<2x8x16xf32>, vector<2x16x16xf32>, vector<2x8x16xf32> -> vector<2x8x16xf32>
    "tpu.trace_stop"() : () -> ()
    %117 = tpu.reciprocal %115 {approx = true} : vector<2x8x1xf32> -> vector<2x8x1xf32>
    %118 = vector.broadcast %117 : vector<2x8x1xf32> to vector<2x8x16xf32>
    %119 = arith.mulf %116, %118 : vector<2x8x16xf32>
    %120 = arith.addf %95, %119 : vector<2x8x16xf32>
    %121 = vector.extract_strided_slice %120 {offsets = [0, 0, 0], sizes = [1, 8, 16], strides = [1, 1, 1]} : vector<2x8x16xf32> to vector<1x8x16xf32>
    %122 = vector.shape_cast %121 : vector<1x8x16xf32> to vector<8x16xf32>
    %123 = vector.extract_strided_slice %120 {offsets = [1, 0, 0], sizes = [1, 8, 16], strides = [1, 1, 1]} : vector<2x8x16xf32> to vector<1x8x16xf32>
    %124 = vector.shape_cast %123 : vector<1x8x16xf32> to vector<8x16xf32>
    %125 = tpu.concatenate %122, %124 in 1 : vector<8x16xf32>, vector<8x16xf32> -> vector<8x32xf32>
    %c7 = arith.constant 7 : index
    %c0_58 = arith.constant 0 : index
    %c0_59 = arith.constant 0 : index
    %126 = vector.load %arg5[%c7, %c0_58, %c0_59] : memref<28x32x32xf32, #tpu.memory_space<vmem>>, vector<1x32x32xf32>
    %127 = vector.shape_cast %126 : vector<1x32x32xf32> to vector<32x32xf32>
    %cst_60 = arith.constant dense<0.000000e+00> : vector<8x32xf32>
    %128 = tpu.matmul %125, %127, %cst_60 {dimension_numbers = #tpu.dot_dimension_numbers<[1], [0], [0], [1], [0, 0, 1, 1], [], []>} : vector<8x32xf32>, vector<32x32xf32>, vector<8x32xf32> -> vector<8x32xf32>
    %c7_61 = arith.constant 7 : index
    %c0_62 = arith.constant 0 : index
    %c0_63 = arith.constant 0 : index
    %129 = vector.load %arg6[%c7_61, %c0_62, %c0_63] : memref<28x1x32xf32, #tpu.memory_space<vmem>>, vector<1x1x32xf32>
    %130 = vector.shape_cast %129 : vector<1x1x32xf32> to vector<1x32xf32>
    %131 = vector.broadcast %130 : vector<1x32xf32> to vector<8x32xf32>
    %132 = arith.addf %128, %131 : vector<8x32xf32>
    %cst_64 = arith.constant 0.000000e+00 : f32
    %133 = vector.broadcast %cst_64 : f32 to vector<8x32xf32>
    %134 = arith.maximumf %132, %133 : vector<8x32xf32>
    %135 = arith.addf %125, %134 : vector<8x32xf32>
    %c0_65 = arith.constant 0 : index
    %c0_66 = arith.constant 0 : index
    %c0_67 = arith.constant 0 : index
    %136 = vector.load %arg3[%c0_65, %c0_66, %c0_67] : memref<1x16x32xf32, #tpu.memory_space<vmem>>, vector<1x16x32xf32>
    %137 = vector.shape_cast %136 : vector<1x16x32xf32> to vector<16x32xf32>
    %c8 = arith.constant 8 : index
    %c0_68 = arith.constant 0 : index
    %c0_69 = arith.constant 0 : index
    %138 = vector.load %arg5[%c8, %c0_68, %c0_69] : memref<28x32x32xf32, #tpu.memory_space<vmem>>, vector<1x32x32xf32>
    %139 = vector.shape_cast %138 : vector<1x32x32xf32> to vector<32x32xf32>
    %cst_70 = arith.constant dense<0.000000e+00> : vector<16x32xf32>
    %140 = tpu.matmul %137, %139, %cst_70 {dimension_numbers = #tpu.dot_dimension_numbers<[1], [0], [0], [1], [0, 0, 1, 1], [], []>} : vector<16x32xf32>, vector<32x32xf32>, vector<16x32xf32> -> vector<16x32xf32>
    %c8_71 = arith.constant 8 : index
    %c0_72 = arith.constant 0 : index
    %c0_73 = arith.constant 0 : index
    %141 = vector.load %arg6[%c8_71, %c0_72, %c0_73] : memref<28x1x32xf32, #tpu.memory_space<vmem>>, vector<1x1x32xf32>
    %142 = vector.shape_cast %141 : vector<1x1x32xf32> to vector<1x32xf32>
    %143 = vector.broadcast %142 : vector<1x32xf32> to vector<16x32xf32>
    %144 = arith.addf %140, %143 : vector<16x32xf32>
    %c9 = arith.constant 9 : index
    %c0_74 = arith.constant 0 : index
    %c0_75 = arith.constant 0 : index
    %145 = vector.load %arg5[%c9, %c0_74, %c0_75] : memref<28x32x32xf32, #tpu.memory_space<vmem>>, vector<1x32x32xf32>
    %146 = vector.shape_cast %145 : vector<1x32x32xf32> to vector<32x32xf32>
    %cst_76 = arith.constant dense<0.000000e+00> : vector<8x32xf32>
    %147 = tpu.matmul %135, %146, %cst_76 {dimension_numbers = #tpu.dot_dimension_numbers<[1], [0], [0], [1], [0, 0, 1, 1], [], []>} : vector<8x32xf32>, vector<32x32xf32>, vector<8x32xf32> -> vector<8x32xf32>
    %c9_77 = arith.constant 9 : index
    %c0_78 = arith.constant 0 : index
    %c0_79 = arith.constant 0 : index
    %148 = vector.load %arg6[%c9_77, %c0_78, %c0_79] : memref<28x1x32xf32, #tpu.memory_space<vmem>>, vector<1x1x32xf32>
    %149 = vector.shape_cast %148 : vector<1x1x32xf32> to vector<1x32xf32>
    %150 = vector.broadcast %149 : vector<1x32xf32> to vector<8x32xf32>
    %151 = arith.addf %147, %150 : vector<8x32xf32>
    %c10 = arith.constant 10 : index
    %c0_80 = arith.constant 0 : index
    %c0_81 = arith.constant 0 : index
    %152 = vector.load %arg5[%c10, %c0_80, %c0_81] : memref<28x32x32xf32, #tpu.memory_space<vmem>>, vector<1x32x32xf32>
    %153 = vector.shape_cast %152 : vector<1x32x32xf32> to vector<32x32xf32>
    %cst_82 = arith.constant dense<0.000000e+00> : vector<8x32xf32>
    %154 = tpu.matmul %135, %153, %cst_82 {dimension_numbers = #tpu.dot_dimension_numbers<[1], [0], [0], [1], [0, 0, 1, 1], [], []>} : vector<8x32xf32>, vector<32x32xf32>, vector<8x32xf32> -> vector<8x32xf32>
    %c10_83 = arith.constant 10 : index
    %c0_84 = arith.constant 0 : index
    %c0_85 = arith.constant 0 : index
    %155 = vector.load %arg6[%c10_83, %c0_84, %c0_85] : memref<28x1x32xf32, #tpu.memory_space<vmem>>, vector<1x1x32xf32>
    %156 = vector.shape_cast %155 : vector<1x1x32xf32> to vector<1x32xf32>
    %157 = vector.broadcast %156 : vector<1x32xf32> to vector<8x32xf32>
    %158 = arith.addf %154, %157 : vector<8x32xf32>
    %159 = vector.extract_strided_slice %144 {offsets = [0, 0], sizes = [16, 16], strides = [1, 1]} : vector<16x32xf32> to vector<16x16xf32>
    %160 = vector.extract_strided_slice %144 {offsets = [0, 16], sizes = [16, 16], strides = [1, 1]} : vector<16x32xf32> to vector<16x16xf32>
    %161 = vector.shape_cast %159 : vector<16x16xf32> to vector<1x16x16xf32>
    %162 = vector.shape_cast %160 : vector<16x16xf32> to vector<1x16x16xf32>
    %163 = tpu.concatenate %161, %162 in 0 : vector<1x16x16xf32>, vector<1x16x16xf32> -> vector<2x16x16xf32>
    %164 = vector.extract_strided_slice %151 {offsets = [0, 0], sizes = [8, 16], strides = [1, 1]} : vector<8x32xf32> to vector<8x16xf32>
    %165 = vector.extract_strided_slice %151 {offsets = [0, 16], sizes = [8, 16], strides = [1, 1]} : vector<8x32xf32> to vector<8x16xf32>
    %166 = vector.shape_cast %164 : vector<8x16xf32> to vector<1x8x16xf32>
    %167 = vector.shape_cast %165 : vector<8x16xf32> to vector<1x8x16xf32>
    %168 = tpu.concatenate %166, %167 in 0 : vector<1x8x16xf32>, vector<1x8x16xf32> -> vector<2x8x16xf32>
    %169 = vector.extract_strided_slice %158 {offsets = [0, 0], sizes = [8, 16], strides = [1, 1]} : vector<8x32xf32> to vector<8x16xf32>
    %170 = vector.extract_strided_slice %158 {offsets = [0, 16], sizes = [8, 16], strides = [1, 1]} : vector<8x32xf32> to vector<8x16xf32>
    %171 = vector.shape_cast %169 : vector<8x16xf32> to vector<1x8x16xf32>
    %172 = vector.shape_cast %170 : vector<8x16xf32> to vector<1x8x16xf32>
    %173 = tpu.concatenate %171, %172 in 0 : vector<1x8x16xf32>, vector<1x8x16xf32> -> vector<2x8x16xf32>
    "tpu.trace_start"() <{level = 10 : i32, message = "hqd,hkd->hqk"}> : () -> ()
    %cst_86 = arith.constant dense<0.000000e+00> : vector<2x16x8xf32>
    %174 = tpu.matmul %163, %168, %cst_86 {dimension_numbers = #tpu.dot_dimension_numbers<[2], [2], [1], [1], [0, 0, 0, 1, 1, 1], [0], [0]>} : vector<2x16x16xf32>, vector<2x8x16xf32>, vector<2x16x8xf32> -> vector<2x16x8xf32>
    "tpu.trace_stop"() : () -> ()
    %cst_87 = arith.constant 0.176776692 : f32
    %175 = vector.broadcast %cst_87 : f32 to vector<2x16x8xf32>
    %176 = arith.mulf %174, %175 : vector<2x16x8xf32>
    %cst_88 = arith.constant dense<0xFF800000> : vector<2x16xf32>
    %177 = vector.multi_reduction <maximumf>, %176, %cst_88 [2] : vector<2x16x8xf32> to vector<2x16xf32>
    %178 = vector.shape_cast %177 : vector<2x16xf32> to vector<2x16x1xf32>
    %179 = vector.broadcast %178 : vector<2x16x1xf32> to vector<2x16x8xf32>
    %180 = arith.subf %176, %179 : vector<2x16x8xf32>
    %181 = math.exp %180 : vector<2x16x8xf32>
    %cst_89 = arith.constant dense<0.000000e+00> : vector<2x16xf32>
    %182 = vector.multi_reduction <add>, %181, %cst_89 [2] : vector<2x16x8xf32> to vector<2x16xf32>
    %183 = vector.shape_cast %182 : vector<2x16xf32> to vector<2x16x1xf32>
    "tpu.trace_start"() <{level = 10 : i32, message = "hqk,hkd->hqd"}> : () -> ()
    %cst_90 = arith.constant dense<0.000000e+00> : vector<2x16x16xf32>
    %184 = tpu.matmul %181, %173, %cst_90 {dimension_numbers = #tpu.dot_dimension_numbers<[2], [1], [1], [2], [0, 0, 0, 1, 1, 2], [0], [0]>} : vector<2x16x8xf32>, vector<2x8x16xf32>, vector<2x16x16xf32> -> vector<2x16x16xf32>
    "tpu.trace_stop"() : () -> ()
    %185 = tpu.reciprocal %183 {approx = true} : vector<2x16x1xf32> -> vector<2x16x1xf32>
    %186 = vector.broadcast %185 : vector<2x16x1xf32> to vector<2x16x16xf32>
    %187 = arith.mulf %184, %186 : vector<2x16x16xf32>
    %188 = arith.addf %163, %187 : vector<2x16x16xf32>
    %189 = vector.extract_strided_slice %188 {offsets = [0, 0, 0], sizes = [1, 16, 16], strides = [1, 1, 1]} : vector<2x16x16xf32> to vector<1x16x16xf32>
    %190 = vector.shape_cast %189 : vector<1x16x16xf32> to vector<16x16xf32>
    %191 = vector.extract_strided_slice %188 {offsets = [1, 0, 0], sizes = [1, 16, 16], strides = [1, 1, 1]} : vector<2x16x16xf32> to vector<1x16x16xf32>
    %192 = vector.shape_cast %191 : vector<1x16x16xf32> to vector<16x16xf32>
    %193 = tpu.concatenate %190, %192 in 1 : vector<16x16xf32>, vector<16x16xf32> -> vector<16x32xf32>
    %c11 = arith.constant 11 : index
    %c0_91 = arith.constant 0 : index
    %c0_92 = arith.constant 0 : index
    %194 = vector.load %arg5[%c11, %c0_91, %c0_92] : memref<28x32x32xf32, #tpu.memory_space<vmem>>, vector<1x32x32xf32>
    %195 = vector.shape_cast %194 : vector<1x32x32xf32> to vector<32x32xf32>
    %cst_93 = arith.constant dense<0.000000e+00> : vector<16x32xf32>
    %196 = tpu.matmul %193, %195, %cst_93 {dimension_numbers = #tpu.dot_dimension_numbers<[1], [0], [0], [1], [0, 0, 1, 1], [], []>} : vector<16x32xf32>, vector<32x32xf32>, vector<16x32xf32> -> vector<16x32xf32>
    %c11_94 = arith.constant 11 : index
    %c0_95 = arith.constant 0 : index
    %c0_96 = arith.constant 0 : index
    %197 = vector.load %arg6[%c11_94, %c0_95, %c0_96] : memref<28x1x32xf32, #tpu.memory_space<vmem>>, vector<1x1x32xf32>
    %198 = vector.shape_cast %197 : vector<1x1x32xf32> to vector<1x32xf32>
    %199 = vector.broadcast %198 : vector<1x32xf32> to vector<16x32xf32>
    %200 = arith.addf %196, %199 : vector<16x32xf32>
    %cst_97 = arith.constant 0.000000e+00 : f32
    %201 = vector.broadcast %cst_97 : f32 to vector<16x32xf32>
    %202 = arith.maximumf %200, %201 : vector<16x32xf32>
    %203 = arith.addf %193, %202 : vector<16x32xf32>
    %c12 = arith.constant 12 : index
    %c0_98 = arith.constant 0 : index
    %c0_99 = arith.constant 0 : index
    %204 = vector.load %arg5[%c12, %c0_98, %c0_99] : memref<28x32x32xf32, #tpu.memory_space<vmem>>, vector<1x32x32xf32>
    %205 = vector.shape_cast %204 : vector<1x32x32xf32> to vector<32x32xf32>
    %cst_100 = arith.constant dense<0.000000e+00> : vector<8x32xf32>
    %206 = tpu.matmul %135, %205, %cst_100 {dimension_numbers = #tpu.dot_dimension_numbers<[1], [0], [0], [1], [0, 0, 1, 1], [], []>} : vector<8x32xf32>, vector<32x32xf32>, vector<8x32xf32> -> vector<8x32xf32>
    %c12_101 = arith.constant 12 : index
    %c0_102 = arith.constant 0 : index
    %c0_103 = arith.constant 0 : index
    %207 = vector.load %arg6[%c12_101, %c0_102, %c0_103] : memref<28x1x32xf32, #tpu.memory_space<vmem>>, vector<1x1x32xf32>
    %208 = vector.shape_cast %207 : vector<1x1x32xf32> to vector<1x32xf32>
    %209 = vector.broadcast %208 : vector<1x32xf32> to vector<8x32xf32>
    %210 = arith.addf %206, %209 : vector<8x32xf32>
    %c13 = arith.constant 13 : index
    %c0_104 = arith.constant 0 : index
    %c0_105 = arith.constant 0 : index
    %211 = vector.load %arg5[%c13, %c0_104, %c0_105] : memref<28x32x32xf32, #tpu.memory_space<vmem>>, vector<1x32x32xf32>
    %212 = vector.shape_cast %211 : vector<1x32x32xf32> to vector<32x32xf32>
    %cst_106 = arith.constant dense<0.000000e+00> : vector<16x32xf32>
    %213 = tpu.matmul %203, %212, %cst_106 {dimension_numbers = #tpu.dot_dimension_numbers<[1], [0], [0], [1], [0, 0, 1, 1], [], []>} : vector<16x32xf32>, vector<32x32xf32>, vector<16x32xf32> -> vector<16x32xf32>
    %c13_107 = arith.constant 13 : index
    %c0_108 = arith.constant 0 : index
    %c0_109 = arith.constant 0 : index
    %214 = vector.load %arg6[%c13_107, %c0_108, %c0_109] : memref<28x1x32xf32, #tpu.memory_space<vmem>>, vector<1x1x32xf32>
    %215 = vector.shape_cast %214 : vector<1x1x32xf32> to vector<1x32xf32>
    %216 = vector.broadcast %215 : vector<1x32xf32> to vector<16x32xf32>
    %217 = arith.addf %213, %216 : vector<16x32xf32>
    %c14 = arith.constant 14 : index
    %c0_110 = arith.constant 0 : index
    %c0_111 = arith.constant 0 : index
    %218 = vector.load %arg5[%c14, %c0_110, %c0_111] : memref<28x32x32xf32, #tpu.memory_space<vmem>>, vector<1x32x32xf32>
    %219 = vector.shape_cast %218 : vector<1x32x32xf32> to vector<32x32xf32>
    %cst_112 = arith.constant dense<0.000000e+00> : vector<16x32xf32>
    %220 = tpu.matmul %203, %219, %cst_112 {dimension_numbers = #tpu.dot_dimension_numbers<[1], [0], [0], [1], [0, 0, 1, 1], [], []>} : vector<16x32xf32>, vector<32x32xf32>, vector<16x32xf32> -> vector<16x32xf32>
    %c14_113 = arith.constant 14 : index
    %c0_114 = arith.constant 0 : index
    %c0_115 = arith.constant 0 : index
    %221 = vector.load %arg6[%c14_113, %c0_114, %c0_115] : memref<28x1x32xf32, #tpu.memory_space<vmem>>, vector<1x1x32xf32>
    %222 = vector.shape_cast %221 : vector<1x1x32xf32> to vector<1x32xf32>
    %223 = vector.broadcast %222 : vector<1x32xf32> to vector<16x32xf32>
    %224 = arith.addf %220, %223 : vector<16x32xf32>
    %225 = vector.extract_strided_slice %210 {offsets = [0, 0], sizes = [8, 16], strides = [1, 1]} : vector<8x32xf32> to vector<8x16xf32>
    %226 = vector.extract_strided_slice %210 {offsets = [0, 16], sizes = [8, 16], strides = [1, 1]} : vector<8x32xf32> to vector<8x16xf32>
    %227 = vector.shape_cast %225 : vector<8x16xf32> to vector<1x8x16xf32>
    %228 = vector.shape_cast %226 : vector<8x16xf32> to vector<1x8x16xf32>
    %229 = tpu.concatenate %227, %228 in 0 : vector<1x8x16xf32>, vector<1x8x16xf32> -> vector<2x8x16xf32>
    %230 = vector.extract_strided_slice %217 {offsets = [0, 0], sizes = [16, 16], strides = [1, 1]} : vector<16x32xf32> to vector<16x16xf32>
    %231 = vector.extract_strided_slice %217 {offsets = [0, 16], sizes = [16, 16], strides = [1, 1]} : vector<16x32xf32> to vector<16x16xf32>
    %232 = vector.shape_cast %230 : vector<16x16xf32> to vector<1x16x16xf32>
    %233 = vector.shape_cast %231 : vector<16x16xf32> to vector<1x16x16xf32>
    %234 = tpu.concatenate %232, %233 in 0 : vector<1x16x16xf32>, vector<1x16x16xf32> -> vector<2x16x16xf32>
    %235 = vector.extract_strided_slice %224 {offsets = [0, 0], sizes = [16, 16], strides = [1, 1]} : vector<16x32xf32> to vector<16x16xf32>
    %236 = vector.extract_strided_slice %224 {offsets = [0, 16], sizes = [16, 16], strides = [1, 1]} : vector<16x32xf32> to vector<16x16xf32>
    %237 = vector.shape_cast %235 : vector<16x16xf32> to vector<1x16x16xf32>
    %238 = vector.shape_cast %236 : vector<16x16xf32> to vector<1x16x16xf32>
    %239 = tpu.concatenate %237, %238 in 0 : vector<1x16x16xf32>, vector<1x16x16xf32> -> vector<2x16x16xf32>
    "tpu.trace_start"() <{level = 10 : i32, message = "hqd,hkd->hqk"}> : () -> ()
    %cst_116 = arith.constant dense<0.000000e+00> : vector<2x8x16xf32>
    %240 = tpu.matmul %229, %234, %cst_116 {dimension_numbers = #tpu.dot_dimension_numbers<[2], [2], [1], [1], [0, 0, 0, 1, 1, 1], [0], [0]>} : vector<2x8x16xf32>, vector<2x16x16xf32>, vector<2x8x16xf32> -> vector<2x8x16xf32>
    "tpu.trace_stop"() : () -> ()
    %cst_117 = arith.constant 0.176776692 : f32
    %241 = vector.broadcast %cst_117 : f32 to vector<2x8x16xf32>
    %242 = arith.mulf %240, %241 : vector<2x8x16xf32>
    %cst_118 = arith.constant dense<0xFF800000> : vector<2x8xf32>
    %243 = vector.multi_reduction <maximumf>, %242, %cst_118 [2] : vector<2x8x16xf32> to vector<2x8xf32>
    %244 = vector.shape_cast %243 : vector<2x8xf32> to vector<2x8x1xf32>
    %245 = vector.broadcast %244 : vector<2x8x1xf32> to vector<2x8x16xf32>
    %246 = arith.subf %242, %245 : vector<2x8x16xf32>
    %247 = math.exp %246 : vector<2x8x16xf32>
    %cst_119 = arith.constant dense<0.000000e+00> : vector<2x8xf32>
    %248 = vector.multi_reduction <add>, %247, %cst_119 [2] : vector<2x8x16xf32> to vector<2x8xf32>
    %249 = vector.shape_cast %248 : vector<2x8xf32> to vector<2x8x1xf32>
    "tpu.trace_start"() <{level = 10 : i32, message = "hqk,hkd->hqd"}> : () -> ()
    %cst_120 = arith.constant dense<0.000000e+00> : vector<2x8x16xf32>
    %250 = tpu.matmul %247, %239, %cst_120 {dimension_numbers = #tpu.dot_dimension_numbers<[2], [1], [1], [2], [0, 0, 0, 1, 1, 2], [0], [0]>} : vector<2x8x16xf32>, vector<2x16x16xf32>, vector<2x8x16xf32> -> vector<2x8x16xf32>
    "tpu.trace_stop"() : () -> ()
    %251 = tpu.reciprocal %249 {approx = true} : vector<2x8x1xf32> -> vector<2x8x1xf32>
    %252 = vector.broadcast %251 : vector<2x8x1xf32> to vector<2x8x16xf32>
    %253 = arith.mulf %250, %252 : vector<2x8x16xf32>
    %254 = arith.addf %229, %253 : vector<2x8x16xf32>
    %255 = vector.extract_strided_slice %254 {offsets = [0, 0, 0], sizes = [1, 8, 16], strides = [1, 1, 1]} : vector<2x8x16xf32> to vector<1x8x16xf32>
    %256 = vector.shape_cast %255 : vector<1x8x16xf32> to vector<8x16xf32>
    %257 = vector.extract_strided_slice %254 {offsets = [1, 0, 0], sizes = [1, 8, 16], strides = [1, 1, 1]} : vector<2x8x16xf32> to vector<1x8x16xf32>
    %258 = vector.shape_cast %257 : vector<1x8x16xf32> to vector<8x16xf32>
    %259 = tpu.concatenate %256, %258 in 1 : vector<8x16xf32>, vector<8x16xf32> -> vector<8x32xf32>
    %c15 = arith.constant 15 : index
    %c0_121 = arith.constant 0 : index
    %c0_122 = arith.constant 0 : index
    %260 = vector.load %arg5[%c15, %c0_121, %c0_122] : memref<28x32x32xf32, #tpu.memory_space<vmem>>, vector<1x32x32xf32>
    %261 = vector.shape_cast %260 : vector<1x32x32xf32> to vector<32x32xf32>
    %cst_123 = arith.constant dense<0.000000e+00> : vector<8x32xf32>
    %262 = tpu.matmul %259, %261, %cst_123 {dimension_numbers = #tpu.dot_dimension_numbers<[1], [0], [0], [1], [0, 0, 1, 1], [], []>} : vector<8x32xf32>, vector<32x32xf32>, vector<8x32xf32> -> vector<8x32xf32>
    %c15_124 = arith.constant 15 : index
    %c0_125 = arith.constant 0 : index
    %c0_126 = arith.constant 0 : index
    %263 = vector.load %arg6[%c15_124, %c0_125, %c0_126] : memref<28x1x32xf32, #tpu.memory_space<vmem>>, vector<1x1x32xf32>
    %264 = vector.shape_cast %263 : vector<1x1x32xf32> to vector<1x32xf32>
    %265 = vector.broadcast %264 : vector<1x32xf32> to vector<8x32xf32>
    %266 = arith.addf %262, %265 : vector<8x32xf32>
    %cst_127 = arith.constant 0.000000e+00 : f32
    %267 = vector.broadcast %cst_127 : f32 to vector<8x32xf32>
    %268 = arith.maximumf %266, %267 : vector<8x32xf32>
    %269 = arith.addf %259, %268 : vector<8x32xf32>
    %c0_128 = arith.constant 0 : index
    %c0_129 = arith.constant 0 : index
    %c0_130 = arith.constant 0 : index
    %270 = vector.load %arg4[%c0_128, %c0_129, %c0_130] : memref<1x4x32xf32, #tpu.memory_space<vmem>>, vector<1x4x32xf32>
    %271 = vector.shape_cast %270 : vector<1x4x32xf32> to vector<4x32xf32>
    %c16 = arith.constant 16 : index
    %c0_131 = arith.constant 0 : index
    %c0_132 = arith.constant 0 : index
    %272 = vector.load %arg5[%c16, %c0_131, %c0_132] : memref<28x32x32xf32, #tpu.memory_space<vmem>>, vector<1x32x32xf32>
    %273 = vector.shape_cast %272 : vector<1x32x32xf32> to vector<32x32xf32>
    %cst_133 = arith.constant dense<0.000000e+00> : vector<4x32xf32>
    %274 = tpu.matmul %271, %273, %cst_133 {dimension_numbers = #tpu.dot_dimension_numbers<[1], [0], [0], [1], [0, 0, 1, 1], [], []>} : vector<4x32xf32>, vector<32x32xf32>, vector<4x32xf32> -> vector<4x32xf32>
    %c16_134 = arith.constant 16 : index
    %c0_135 = arith.constant 0 : index
    %c0_136 = arith.constant 0 : index
    %275 = vector.load %arg6[%c16_134, %c0_135, %c0_136] : memref<28x1x32xf32, #tpu.memory_space<vmem>>, vector<1x1x32xf32>
    %276 = vector.shape_cast %275 : vector<1x1x32xf32> to vector<1x32xf32>
    %277 = vector.broadcast %276 : vector<1x32xf32> to vector<4x32xf32>
    %278 = arith.addf %274, %277 : vector<4x32xf32>
    %c17 = arith.constant 17 : index
    %c0_137 = arith.constant 0 : index
    %c0_138 = arith.constant 0 : index
    %279 = vector.load %arg5[%c17, %c0_137, %c0_138] : memref<28x32x32xf32, #tpu.memory_space<vmem>>, vector<1x32x32xf32>
    %280 = vector.shape_cast %279 : vector<1x32x32xf32> to vector<32x32xf32>
    %cst_139 = arith.constant dense<0.000000e+00> : vector<8x32xf32>
    %281 = tpu.matmul %269, %280, %cst_139 {dimension_numbers = #tpu.dot_dimension_numbers<[1], [0], [0], [1], [0, 0, 1, 1], [], []>} : vector<8x32xf32>, vector<32x32xf32>, vector<8x32xf32> -> vector<8x32xf32>
    %c17_140 = arith.constant 17 : index
    %c0_141 = arith.constant 0 : index
    %c0_142 = arith.constant 0 : index
    %282 = vector.load %arg6[%c17_140, %c0_141, %c0_142] : memref<28x1x32xf32, #tpu.memory_space<vmem>>, vector<1x1x32xf32>
    %283 = vector.shape_cast %282 : vector<1x1x32xf32> to vector<1x32xf32>
    %284 = vector.broadcast %283 : vector<1x32xf32> to vector<8x32xf32>
    %285 = arith.addf %281, %284 : vector<8x32xf32>
    %c18 = arith.constant 18 : index
    %c0_143 = arith.constant 0 : index
    %c0_144 = arith.constant 0 : index
    %286 = vector.load %arg5[%c18, %c0_143, %c0_144] : memref<28x32x32xf32, #tpu.memory_space<vmem>>, vector<1x32x32xf32>
    %287 = vector.shape_cast %286 : vector<1x32x32xf32> to vector<32x32xf32>
    %cst_145 = arith.constant dense<0.000000e+00> : vector<8x32xf32>
    %288 = tpu.matmul %269, %287, %cst_145 {dimension_numbers = #tpu.dot_dimension_numbers<[1], [0], [0], [1], [0, 0, 1, 1], [], []>} : vector<8x32xf32>, vector<32x32xf32>, vector<8x32xf32> -> vector<8x32xf32>
    %c18_146 = arith.constant 18 : index
    %c0_147 = arith.constant 0 : index
    %c0_148 = arith.constant 0 : index
    %289 = vector.load %arg6[%c18_146, %c0_147, %c0_148] : memref<28x1x32xf32, #tpu.memory_space<vmem>>, vector<1x1x32xf32>
    %290 = vector.shape_cast %289 : vector<1x1x32xf32> to vector<1x32xf32>
    %291 = vector.broadcast %290 : vector<1x32xf32> to vector<8x32xf32>
    %292 = arith.addf %288, %291 : vector<8x32xf32>
    %293 = vector.extract_strided_slice %278 {offsets = [0, 0], sizes = [4, 16], strides = [1, 1]} : vector<4x32xf32> to vector<4x16xf32>
    %294 = vector.extract_strided_slice %278 {offsets = [0, 16], sizes = [4, 16], strides = [1, 1]} : vector<4x32xf32> to vector<4x16xf32>
    %295 = vector.shape_cast %293 : vector<4x16xf32> to vector<1x4x16xf32>
    %296 = vector.shape_cast %294 : vector<4x16xf32> to vector<1x4x16xf32>
    %297 = tpu.concatenate %295, %296 in 0 : vector<1x4x16xf32>, vector<1x4x16xf32> -> vector<2x4x16xf32>
    %298 = vector.extract_strided_slice %285 {offsets = [0, 0], sizes = [8, 16], strides = [1, 1]} : vector<8x32xf32> to vector<8x16xf32>
    %299 = vector.extract_strided_slice %285 {offsets = [0, 16], sizes = [8, 16], strides = [1, 1]} : vector<8x32xf32> to vector<8x16xf32>
    %300 = vector.shape_cast %298 : vector<8x16xf32> to vector<1x8x16xf32>
    %301 = vector.shape_cast %299 : vector<8x16xf32> to vector<1x8x16xf32>
    %302 = tpu.concatenate %300, %301 in 0 : vector<1x8x16xf32>, vector<1x8x16xf32> -> vector<2x8x16xf32>
    %303 = vector.extract_strided_slice %292 {offsets = [0, 0], sizes = [8, 16], strides = [1, 1]} : vector<8x32xf32> to vector<8x16xf32>
    %304 = vector.extract_strided_slice %292 {offsets = [0, 16], sizes = [8, 16], strides = [1, 1]} : vector<8x32xf32> to vector<8x16xf32>
    %305 = vector.shape_cast %303 : vector<8x16xf32> to vector<1x8x16xf32>
    %306 = vector.shape_cast %304 : vector<8x16xf32> to vector<1x8x16xf32>
    %307 = tpu.concatenate %305, %306 in 0 : vector<1x8x16xf32>, vector<1x8x16xf32> -> vector<2x8x16xf32>
    "tpu.trace_start"() <{level = 10 : i32, message = "hqd,hkd->hqk"}> : () -> ()
    %cst_149 = arith.constant dense<0.000000e+00> : vector<2x4x8xf32>
    %308 = tpu.matmul %297, %302, %cst_149 {dimension_numbers = #tpu.dot_dimension_numbers<[2], [2], [1], [1], [0, 0, 0, 1, 1, 1], [0], [0]>} : vector<2x4x16xf32>, vector<2x8x16xf32>, vector<2x4x8xf32> -> vector<2x4x8xf32>
    "tpu.trace_stop"() : () -> ()
    %cst_150 = arith.constant 0.176776692 : f32
    %309 = vector.broadcast %cst_150 : f32 to vector<2x4x8xf32>
    %310 = arith.mulf %308, %309 : vector<2x4x8xf32>
    %cst_151 = arith.constant dense<0xFF800000> : vector<2x4xf32>
    %311 = vector.multi_reduction <maximumf>, %310, %cst_151 [2] : vector<2x4x8xf32> to vector<2x4xf32>
    %312 = vector.shape_cast %311 : vector<2x4xf32> to vector<2x4x1xf32>
    %313 = vector.broadcast %312 : vector<2x4x1xf32> to vector<2x4x8xf32>
    %314 = arith.subf %310, %313 : vector<2x4x8xf32>
    %315 = math.exp %314 : vector<2x4x8xf32>
    %cst_152 = arith.constant dense<0.000000e+00> : vector<2x4xf32>
    %316 = vector.multi_reduction <add>, %315, %cst_152 [2] : vector<2x4x8xf32> to vector<2x4xf32>
    %317 = vector.shape_cast %316 : vector<2x4xf32> to vector<2x4x1xf32>
    "tpu.trace_start"() <{level = 10 : i32, message = "hqk,hkd->hqd"}> : () -> ()
    %cst_153 = arith.constant dense<0.000000e+00> : vector<2x4x16xf32>
    %318 = tpu.matmul %315, %307, %cst_153 {dimension_numbers = #tpu.dot_dimension_numbers<[2], [1], [1], [2], [0, 0, 0, 1, 1, 2], [0], [0]>} : vector<2x4x8xf32>, vector<2x8x16xf32>, vector<2x4x16xf32> -> vector<2x4x16xf32>
    "tpu.trace_stop"() : () -> ()
    %319 = tpu.reciprocal %317 {approx = true} : vector<2x4x1xf32> -> vector<2x4x1xf32>
    %320 = vector.broadcast %319 : vector<2x4x1xf32> to vector<2x4x16xf32>
    %321 = arith.mulf %318, %320 : vector<2x4x16xf32>
    %322 = arith.addf %297, %321 : vector<2x4x16xf32>
    %323 = vector.extract_strided_slice %322 {offsets = [0, 0, 0], sizes = [1, 4, 16], strides = [1, 1, 1]} : vector<2x4x16xf32> to vector<1x4x16xf32>
    %324 = vector.shape_cast %323 : vector<1x4x16xf32> to vector<4x16xf32>
    %325 = vector.extract_strided_slice %322 {offsets = [1, 0, 0], sizes = [1, 4, 16], strides = [1, 1, 1]} : vector<2x4x16xf32> to vector<1x4x16xf32>
    %326 = vector.shape_cast %325 : vector<1x4x16xf32> to vector<4x16xf32>
    %327 = tpu.concatenate %324, %326 in 1 : vector<4x16xf32>, vector<4x16xf32> -> vector<4x32xf32>
    %c19 = arith.constant 19 : index
    %c0_154 = arith.constant 0 : index
    %c0_155 = arith.constant 0 : index
    %328 = vector.load %arg5[%c19, %c0_154, %c0_155] : memref<28x32x32xf32, #tpu.memory_space<vmem>>, vector<1x32x32xf32>
    %329 = vector.shape_cast %328 : vector<1x32x32xf32> to vector<32x32xf32>
    %cst_156 = arith.constant dense<0.000000e+00> : vector<4x32xf32>
    %330 = tpu.matmul %327, %329, %cst_156 {dimension_numbers = #tpu.dot_dimension_numbers<[1], [0], [0], [1], [0, 0, 1, 1], [], []>} : vector<4x32xf32>, vector<32x32xf32>, vector<4x32xf32> -> vector<4x32xf32>
    %c19_157 = arith.constant 19 : index
    %c0_158 = arith.constant 0 : index
    %c0_159 = arith.constant 0 : index
    %331 = vector.load %arg6[%c19_157, %c0_158, %c0_159] : memref<28x1x32xf32, #tpu.memory_space<vmem>>, vector<1x1x32xf32>
    %332 = vector.shape_cast %331 : vector<1x1x32xf32> to vector<1x32xf32>
    %333 = vector.broadcast %332 : vector<1x32xf32> to vector<4x32xf32>
    %334 = arith.addf %330, %333 : vector<4x32xf32>
    %cst_160 = arith.constant 0.000000e+00 : f32
    %335 = vector.broadcast %cst_160 : f32 to vector<4x32xf32>
    %336 = arith.maximumf %334, %335 : vector<4x32xf32>
    %337 = arith.addf %327, %336 : vector<4x32xf32>
    %c20 = arith.constant 20 : index
    %c0_161 = arith.constant 0 : index
    %c0_162 = arith.constant 0 : index
    %338 = vector.load %arg5[%c20, %c0_161, %c0_162] : memref<28x32x32xf32, #tpu.memory_space<vmem>>, vector<1x32x32xf32>
    %339 = vector.shape_cast %338 : vector<1x32x32xf32> to vector<32x32xf32>
    %cst_163 = arith.constant dense<0.000000e+00> : vector<4x32xf32>
    %340 = tpu.matmul %337, %339, %cst_163 {dimension_numbers = #tpu.dot_dimension_numbers<[1], [0], [0], [1], [0, 0, 1, 1], [], []>} : vector<4x32xf32>, vector<32x32xf32>, vector<4x32xf32> -> vector<4x32xf32>
    %c20_164 = arith.constant 20 : index
    %c0_165 = arith.constant 0 : index
    %c0_166 = arith.constant 0 : index
    %341 = vector.load %arg6[%c20_164, %c0_165, %c0_166] : memref<28x1x32xf32, #tpu.memory_space<vmem>>, vector<1x1x32xf32>
    %342 = vector.shape_cast %341 : vector<1x1x32xf32> to vector<1x32xf32>
    %343 = vector.broadcast %342 : vector<1x32xf32> to vector<4x32xf32>
    %344 = arith.addf %340, %343 : vector<4x32xf32>
    %c21 = arith.constant 21 : index
    %c0_167 = arith.constant 0 : index
    %c0_168 = arith.constant 0 : index
    %345 = vector.load %arg5[%c21, %c0_167, %c0_168] : memref<28x32x32xf32, #tpu.memory_space<vmem>>, vector<1x32x32xf32>
    %346 = vector.shape_cast %345 : vector<1x32x32xf32> to vector<32x32xf32>
    %cst_169 = arith.constant dense<0.000000e+00> : vector<4x32xf32>
    %347 = tpu.matmul %337, %346, %cst_169 {dimension_numbers = #tpu.dot_dimension_numbers<[1], [0], [0], [1], [0, 0, 1, 1], [], []>} : vector<4x32xf32>, vector<32x32xf32>, vector<4x32xf32> -> vector<4x32xf32>
    %c21_170 = arith.constant 21 : index
    %c0_171 = arith.constant 0 : index
    %c0_172 = arith.constant 0 : index
    %348 = vector.load %arg6[%c21_170, %c0_171, %c0_172] : memref<28x1x32xf32, #tpu.memory_space<vmem>>, vector<1x1x32xf32>
    %349 = vector.shape_cast %348 : vector<1x1x32xf32> to vector<1x32xf32>
    %350 = vector.broadcast %349 : vector<1x32xf32> to vector<4x32xf32>
    %351 = arith.addf %347, %350 : vector<4x32xf32>
    %c22 = arith.constant 22 : index
    %c0_173 = arith.constant 0 : index
    %c0_174 = arith.constant 0 : index
    %352 = vector.load %arg5[%c22, %c0_173, %c0_174] : memref<28x32x32xf32, #tpu.memory_space<vmem>>, vector<1x32x32xf32>
    %353 = vector.shape_cast %352 : vector<1x32x32xf32> to vector<32x32xf32>
    %cst_175 = arith.constant dense<0.000000e+00> : vector<4x32xf32>
    %354 = tpu.matmul %337, %353, %cst_175 {dimension_numbers = #tpu.dot_dimension_numbers<[1], [0], [0], [1], [0, 0, 1, 1], [], []>} : vector<4x32xf32>, vector<32x32xf32>, vector<4x32xf32> -> vector<4x32xf32>
    %c22_176 = arith.constant 22 : index
    %c0_177 = arith.constant 0 : index
    %c0_178 = arith.constant 0 : index
    %355 = vector.load %arg6[%c22_176, %c0_177, %c0_178] : memref<28x1x32xf32, #tpu.memory_space<vmem>>, vector<1x1x32xf32>
    %356 = vector.shape_cast %355 : vector<1x1x32xf32> to vector<1x32xf32>
    %357 = vector.broadcast %356 : vector<1x32xf32> to vector<4x32xf32>
    %358 = arith.addf %354, %357 : vector<4x32xf32>
    %359 = vector.extract_strided_slice %344 {offsets = [0, 0], sizes = [4, 16], strides = [1, 1]} : vector<4x32xf32> to vector<4x16xf32>
    %360 = vector.extract_strided_slice %344 {offsets = [0, 16], sizes = [4, 16], strides = [1, 1]} : vector<4x32xf32> to vector<4x16xf32>
    %361 = vector.shape_cast %359 : vector<4x16xf32> to vector<1x4x16xf32>
    %362 = vector.shape_cast %360 : vector<4x16xf32> to vector<1x4x16xf32>
    %363 = tpu.concatenate %361, %362 in 0 : vector<1x4x16xf32>, vector<1x4x16xf32> -> vector<2x4x16xf32>
    %364 = vector.extract_strided_slice %351 {offsets = [0, 0], sizes = [4, 16], strides = [1, 1]} : vector<4x32xf32> to vector<4x16xf32>
    %365 = vector.extract_strided_slice %351 {offsets = [0, 16], sizes = [4, 16], strides = [1, 1]} : vector<4x32xf32> to vector<4x16xf32>
    %366 = vector.shape_cast %364 : vector<4x16xf32> to vector<1x4x16xf32>
    %367 = vector.shape_cast %365 : vector<4x16xf32> to vector<1x4x16xf32>
    %368 = tpu.concatenate %366, %367 in 0 : vector<1x4x16xf32>, vector<1x4x16xf32> -> vector<2x4x16xf32>
    %369 = vector.extract_strided_slice %358 {offsets = [0, 0], sizes = [4, 16], strides = [1, 1]} : vector<4x32xf32> to vector<4x16xf32>
    %370 = vector.extract_strided_slice %358 {offsets = [0, 16], sizes = [4, 16], strides = [1, 1]} : vector<4x32xf32> to vector<4x16xf32>
    %371 = vector.shape_cast %369 : vector<4x16xf32> to vector<1x4x16xf32>
    %372 = vector.shape_cast %370 : vector<4x16xf32> to vector<1x4x16xf32>
    %373 = tpu.concatenate %371, %372 in 0 : vector<1x4x16xf32>, vector<1x4x16xf32> -> vector<2x4x16xf32>
    "tpu.trace_start"() <{level = 10 : i32, message = "hqd,hkd->hqk"}> : () -> ()
    %cst_179 = arith.constant dense<0.000000e+00> : vector<2x4x4xf32>
    %374 = tpu.matmul %363, %368, %cst_179 {dimension_numbers = #tpu.dot_dimension_numbers<[2], [2], [1], [1], [0, 0, 0, 1, 1, 1], [0], [0]>} : vector<2x4x16xf32>, vector<2x4x16xf32>, vector<2x4x4xf32> -> vector<2x4x4xf32>
    "tpu.trace_stop"() : () -> ()
    %cst_180 = arith.constant 0.176776692 : f32
    %375 = vector.broadcast %cst_180 : f32 to vector<2x4x4xf32>
    %376 = arith.mulf %374, %375 : vector<2x4x4xf32>
    %cst_181 = arith.constant dense<0xFF800000> : vector<2x4xf32>
    %377 = vector.multi_reduction <maximumf>, %376, %cst_181 [2] : vector<2x4x4xf32> to vector<2x4xf32>
    %378 = vector.shape_cast %377 : vector<2x4xf32> to vector<2x4x1xf32>
    %379 = vector.broadcast %378 : vector<2x4x1xf32> to vector<2x4x4xf32>
    %380 = arith.subf %376, %379 : vector<2x4x4xf32>
    %381 = math.exp %380 : vector<2x4x4xf32>
    %cst_182 = arith.constant dense<0.000000e+00> : vector<2x4xf32>
    %382 = vector.multi_reduction <add>, %381, %cst_182 [2] : vector<2x4x4xf32> to vector<2x4xf32>
    %383 = vector.shape_cast %382 : vector<2x4xf32> to vector<2x4x1xf32>
    "tpu.trace_start"() <{level = 10 : i32, message = "hqk,hkd->hqd"}> : () -> ()
    %cst_183 = arith.constant dense<0.000000e+00> : vector<2x4x16xf32>
    %384 = tpu.matmul %381, %373, %cst_183 {dimension_numbers = #tpu.dot_dimension_numbers<[2], [1], [1], [2], [0, 0, 0, 1, 1, 2], [0], [0]>} : vector<2x4x4xf32>, vector<2x4x16xf32>, vector<2x4x16xf32> -> vector<2x4x16xf32>
    "tpu.trace_stop"() : () -> ()
    %385 = tpu.reciprocal %383 {approx = true} : vector<2x4x1xf32> -> vector<2x4x1xf32>
    %386 = vector.broadcast %385 : vector<2x4x1xf32> to vector<2x4x16xf32>
    %387 = arith.mulf %384, %386 : vector<2x4x16xf32>
    %388 = arith.addf %363, %387 : vector<2x4x16xf32>
    %389 = vector.extract_strided_slice %388 {offsets = [0, 0, 0], sizes = [1, 4, 16], strides = [1, 1, 1]} : vector<2x4x16xf32> to vector<1x4x16xf32>
    %390 = vector.shape_cast %389 : vector<1x4x16xf32> to vector<4x16xf32>
    %391 = vector.extract_strided_slice %388 {offsets = [1, 0, 0], sizes = [1, 4, 16], strides = [1, 1, 1]} : vector<2x4x16xf32> to vector<1x4x16xf32>
    %392 = vector.shape_cast %391 : vector<1x4x16xf32> to vector<4x16xf32>
    %393 = tpu.concatenate %390, %392 in 1 : vector<4x16xf32>, vector<4x16xf32> -> vector<4x32xf32>
    %c23 = arith.constant 23 : index
    %c0_184 = arith.constant 0 : index
    %c0_185 = arith.constant 0 : index
    %394 = vector.load %arg5[%c23, %c0_184, %c0_185] : memref<28x32x32xf32, #tpu.memory_space<vmem>>, vector<1x32x32xf32>
    %395 = vector.shape_cast %394 : vector<1x32x32xf32> to vector<32x32xf32>
    %cst_186 = arith.constant dense<0.000000e+00> : vector<4x32xf32>
    %396 = tpu.matmul %393, %395, %cst_186 {dimension_numbers = #tpu.dot_dimension_numbers<[1], [0], [0], [1], [0, 0, 1, 1], [], []>} : vector<4x32xf32>, vector<32x32xf32>, vector<4x32xf32> -> vector<4x32xf32>
    %c23_187 = arith.constant 23 : index
    %c0_188 = arith.constant 0 : index
    %c0_189 = arith.constant 0 : index
    %397 = vector.load %arg6[%c23_187, %c0_188, %c0_189] : memref<28x1x32xf32, #tpu.memory_space<vmem>>, vector<1x1x32xf32>
    %398 = vector.shape_cast %397 : vector<1x1x32xf32> to vector<1x32xf32>
    %399 = vector.broadcast %398 : vector<1x32xf32> to vector<4x32xf32>
    %400 = arith.addf %396, %399 : vector<4x32xf32>
    %cst_190 = arith.constant 0.000000e+00 : f32
    %401 = vector.broadcast %cst_190 : f32 to vector<4x32xf32>
    %402 = arith.maximumf %400, %401 : vector<4x32xf32>
    %403 = arith.addf %393, %402 : vector<4x32xf32>
    %c24 = arith.constant 24 : index
    %c0_191 = arith.constant 0 : index
    %c0_192 = arith.constant 0 : index
    %404 = vector.load %arg5[%c24, %c0_191, %c0_192] : memref<28x32x32xf32, #tpu.memory_space<vmem>>, vector<1x32x32xf32>
    %405 = vector.shape_cast %404 : vector<1x32x32xf32> to vector<32x32xf32>
    %cst_193 = arith.constant dense<0.000000e+00> : vector<4x32xf32>
    %406 = tpu.matmul %403, %405, %cst_193 {dimension_numbers = #tpu.dot_dimension_numbers<[1], [0], [0], [1], [0, 0, 1, 1], [], []>} : vector<4x32xf32>, vector<32x32xf32>, vector<4x32xf32> -> vector<4x32xf32>
    %c24_194 = arith.constant 24 : index
    %c0_195 = arith.constant 0 : index
    %c0_196 = arith.constant 0 : index
    %407 = vector.load %arg6[%c24_194, %c0_195, %c0_196] : memref<28x1x32xf32, #tpu.memory_space<vmem>>, vector<1x1x32xf32>
    %408 = vector.shape_cast %407 : vector<1x1x32xf32> to vector<1x32xf32>
    %409 = vector.broadcast %408 : vector<1x32xf32> to vector<4x32xf32>
    %410 = arith.addf %406, %409 : vector<4x32xf32>
    %c25 = arith.constant 25 : index
    %c0_197 = arith.constant 0 : index
    %c0_198 = arith.constant 0 : index
    %411 = vector.load %arg5[%c25, %c0_197, %c0_198] : memref<28x32x32xf32, #tpu.memory_space<vmem>>, vector<1x32x32xf32>
    %412 = vector.shape_cast %411 : vector<1x32x32xf32> to vector<32x32xf32>
    %cst_199 = arith.constant dense<0.000000e+00> : vector<4x32xf32>
    %413 = tpu.matmul %403, %412, %cst_199 {dimension_numbers = #tpu.dot_dimension_numbers<[1], [0], [0], [1], [0, 0, 1, 1], [], []>} : vector<4x32xf32>, vector<32x32xf32>, vector<4x32xf32> -> vector<4x32xf32>
    %c25_200 = arith.constant 25 : index
    %c0_201 = arith.constant 0 : index
    %c0_202 = arith.constant 0 : index
    %414 = vector.load %arg6[%c25_200, %c0_201, %c0_202] : memref<28x1x32xf32, #tpu.memory_space<vmem>>, vector<1x1x32xf32>
    %415 = vector.shape_cast %414 : vector<1x1x32xf32> to vector<1x32xf32>
    %416 = vector.broadcast %415 : vector<1x32xf32> to vector<4x32xf32>
    %417 = arith.addf %413, %416 : vector<4x32xf32>
    %c26 = arith.constant 26 : index
    %c0_203 = arith.constant 0 : index
    %c0_204 = arith.constant 0 : index
    %418 = vector.load %arg5[%c26, %c0_203, %c0_204] : memref<28x32x32xf32, #tpu.memory_space<vmem>>, vector<1x32x32xf32>
    %419 = vector.shape_cast %418 : vector<1x32x32xf32> to vector<32x32xf32>
    %cst_205 = arith.constant dense<0.000000e+00> : vector<4x32xf32>
    %420 = tpu.matmul %403, %419, %cst_205 {dimension_numbers = #tpu.dot_dimension_numbers<[1], [0], [0], [1], [0, 0, 1, 1], [], []>} : vector<4x32xf32>, vector<32x32xf32>, vector<4x32xf32> -> vector<4x32xf32>
    %c26_206 = arith.constant 26 : index
    %c0_207 = arith.constant 0 : index
    %c0_208 = arith.constant 0 : index
    %421 = vector.load %arg6[%c26_206, %c0_207, %c0_208] : memref<28x1x32xf32, #tpu.memory_space<vmem>>, vector<1x1x32xf32>
    %422 = vector.shape_cast %421 : vector<1x1x32xf32> to vector<1x32xf32>
    %423 = vector.broadcast %422 : vector<1x32xf32> to vector<4x32xf32>
    %424 = arith.addf %420, %423 : vector<4x32xf32>
    %425 = vector.extract_strided_slice %410 {offsets = [0, 0], sizes = [4, 16], strides = [1, 1]} : vector<4x32xf32> to vector<4x16xf32>
    %426 = vector.extract_strided_slice %410 {offsets = [0, 16], sizes = [4, 16], strides = [1, 1]} : vector<4x32xf32> to vector<4x16xf32>
    %427 = vector.shape_cast %425 : vector<4x16xf32> to vector<1x4x16xf32>
    %428 = vector.shape_cast %426 : vector<4x16xf32> to vector<1x4x16xf32>
    %429 = tpu.concatenate %427, %428 in 0 : vector<1x4x16xf32>, vector<1x4x16xf32> -> vector<2x4x16xf32>
    %430 = vector.extract_strided_slice %417 {offsets = [0, 0], sizes = [4, 16], strides = [1, 1]} : vector<4x32xf32> to vector<4x16xf32>
    %431 = vector.extract_strided_slice %417 {offsets = [0, 16], sizes = [4, 16], strides = [1, 1]} : vector<4x32xf32> to vector<4x16xf32>
    %432 = vector.shape_cast %430 : vector<4x16xf32> to vector<1x4x16xf32>
    %433 = vector.shape_cast %431 : vector<4x16xf32> to vector<1x4x16xf32>
    %434 = tpu.concatenate %432, %433 in 0 : vector<1x4x16xf32>, vector<1x4x16xf32> -> vector<2x4x16xf32>
    %435 = vector.extract_strided_slice %424 {offsets = [0, 0], sizes = [4, 16], strides = [1, 1]} : vector<4x32xf32> to vector<4x16xf32>
    %436 = vector.extract_strided_slice %424 {offsets = [0, 16], sizes = [4, 16], strides = [1, 1]} : vector<4x32xf32> to vector<4x16xf32>
    %437 = vector.shape_cast %435 : vector<4x16xf32> to vector<1x4x16xf32>
    %438 = vector.shape_cast %436 : vector<4x16xf32> to vector<1x4x16xf32>
    %439 = tpu.concatenate %437, %438 in 0 : vector<1x4x16xf32>, vector<1x4x16xf32> -> vector<2x4x16xf32>
    "tpu.trace_start"() <{level = 10 : i32, message = "hqd,hkd->hqk"}> : () -> ()
    %cst_209 = arith.constant dense<0.000000e+00> : vector<2x4x4xf32>
    %440 = tpu.matmul %429, %434, %cst_209 {dimension_numbers = #tpu.dot_dimension_numbers<[2], [2], [1], [1], [0, 0, 0, 1, 1, 1], [0], [0]>} : vector<2x4x16xf32>, vector<2x4x16xf32>, vector<2x4x4xf32> -> vector<2x4x4xf32>
    "tpu.trace_stop"() : () -> ()
    %cst_210 = arith.constant 0.176776692 : f32
    %441 = vector.broadcast %cst_210 : f32 to vector<2x4x4xf32>
    %442 = arith.mulf %440, %441 : vector<2x4x4xf32>
    %cst_211 = arith.constant dense<0xFF800000> : vector<2x4xf32>
    %443 = vector.multi_reduction <maximumf>, %442, %cst_211 [2] : vector<2x4x4xf32> to vector<2x4xf32>
    %444 = vector.shape_cast %443 : vector<2x4xf32> to vector<2x4x1xf32>
    %445 = vector.broadcast %444 : vector<2x4x1xf32> to vector<2x4x4xf32>
    %446 = arith.subf %442, %445 : vector<2x4x4xf32>
    %447 = math.exp %446 : vector<2x4x4xf32>
    %cst_212 = arith.constant dense<0.000000e+00> : vector<2x4xf32>
    %448 = vector.multi_reduction <add>, %447, %cst_212 [2] : vector<2x4x4xf32> to vector<2x4xf32>
    %449 = vector.shape_cast %448 : vector<2x4xf32> to vector<2x4x1xf32>
    "tpu.trace_start"() <{level = 10 : i32, message = "hqk,hkd->hqd"}> : () -> ()
    %cst_213 = arith.constant dense<0.000000e+00> : vector<2x4x16xf32>
    %450 = tpu.matmul %447, %439, %cst_213 {dimension_numbers = #tpu.dot_dimension_numbers<[2], [1], [1], [2], [0, 0, 0, 1, 1, 2], [0], [0]>} : vector<2x4x4xf32>, vector<2x4x16xf32>, vector<2x4x16xf32> -> vector<2x4x16xf32>
    "tpu.trace_stop"() : () -> ()
    %451 = tpu.reciprocal %449 {approx = true} : vector<2x4x1xf32> -> vector<2x4x1xf32>
    %452 = vector.broadcast %451 : vector<2x4x1xf32> to vector<2x4x16xf32>
    %453 = arith.mulf %450, %452 : vector<2x4x16xf32>
    %454 = arith.addf %429, %453 : vector<2x4x16xf32>
    %455 = vector.extract_strided_slice %454 {offsets = [0, 0, 0], sizes = [1, 4, 16], strides = [1, 1, 1]} : vector<2x4x16xf32> to vector<1x4x16xf32>
    %456 = vector.shape_cast %455 : vector<1x4x16xf32> to vector<4x16xf32>
    %457 = vector.extract_strided_slice %454 {offsets = [1, 0, 0], sizes = [1, 4, 16], strides = [1, 1, 1]} : vector<2x4x16xf32> to vector<1x4x16xf32>
    %458 = vector.shape_cast %457 : vector<1x4x16xf32> to vector<4x16xf32>
    %459 = tpu.concatenate %456, %458 in 1 : vector<4x16xf32>, vector<4x16xf32> -> vector<4x32xf32>
    %c27 = arith.constant 27 : index
    %c0_214 = arith.constant 0 : index
    %c0_215 = arith.constant 0 : index
    %460 = vector.load %arg5[%c27, %c0_214, %c0_215] : memref<28x32x32xf32, #tpu.memory_space<vmem>>, vector<1x32x32xf32>
    %461 = vector.shape_cast %460 : vector<1x32x32xf32> to vector<32x32xf32>
    %cst_216 = arith.constant dense<0.000000e+00> : vector<4x32xf32>
    %462 = tpu.matmul %459, %461, %cst_216 {dimension_numbers = #tpu.dot_dimension_numbers<[1], [0], [0], [1], [0, 0, 1, 1], [], []>} : vector<4x32xf32>, vector<32x32xf32>, vector<4x32xf32> -> vector<4x32xf32>
    %c27_217 = arith.constant 27 : index
    %c0_218 = arith.constant 0 : index
    %c0_219 = arith.constant 0 : index
    %463 = vector.load %arg6[%c27_217, %c0_218, %c0_219] : memref<28x1x32xf32, #tpu.memory_space<vmem>>, vector<1x1x32xf32>
    %464 = vector.shape_cast %463 : vector<1x1x32xf32> to vector<1x32xf32>
    %465 = vector.broadcast %464 : vector<1x32xf32> to vector<4x32xf32>
    %466 = arith.addf %462, %465 : vector<4x32xf32>
    %cst_220 = arith.constant 0.000000e+00 : f32
    %467 = vector.broadcast %cst_220 : f32 to vector<4x32xf32>
    %468 = arith.maximumf %466, %467 : vector<4x32xf32>
    %469 = arith.addf %459, %468 : vector<4x32xf32>
    %c0_221 = arith.constant 0 : index
    %c0_222 = arith.constant 0 : index
    %470 = vector.load %arg7[%c0_221, %c0_222] : memref<32x8xf32, #tpu.memory_space<vmem>>, vector<32x8xf32>
    %cst_223 = arith.constant dense<0.000000e+00> : vector<4x8xf32>
    %471 = tpu.matmul %469, %470, %cst_223 {dimension_numbers = #tpu.dot_dimension_numbers<[1], [0], [0], [1], [0, 0, 1, 1], [], []>} : vector<4x32xf32>, vector<32x8xf32>, vector<4x8xf32> -> vector<4x8xf32>
    %c0_224 = arith.constant 0 : index
    %c0_225 = arith.constant 0 : index
    %472 = vector.load %arg8[%c0_224, %c0_225] : memref<1x8xf32, #tpu.memory_space<vmem>>, vector<1x8xf32>
    %473 = vector.broadcast %472 : vector<1x8xf32> to vector<4x8xf32>
    %474 = arith.addf %471, %473 : vector<4x8xf32>
    %c0_226 = arith.constant 0 : index
    %c0_227 = arith.constant 0 : index
    %c0_228 = arith.constant 0 : index
    %475 = vector.load %arg9[%c0_226, %c0_227, %c0_228] : memref<1x4x8xf32, #tpu.memory_space<vmem>>, vector<1x4x8xf32>
    %476 = vector.shape_cast %475 : vector<1x4x8xf32> to vector<4x8xf32>
    %477 = vector.shape_cast %474 : vector<4x8xf32> to vector<1x4x8xf32>
    tpu.vector_store %arg9[%c0_226, %c0_227, %c0_228], %477 {strides = array<i32>} : memref<1x4x8xf32, #tpu.memory_space<vmem>>, vector<1x4x8xf32>,
    return
  }
  func.func @transform_0(%arg0: i32) -> (i32, i32, i32) {
    %c0_i32 = arith.constant 0 : i32
    %c0_i32_0 = arith.constant 0 : i32
    %c0_i32_1 = arith.constant 0 : i32
    return %arg0, %c0_i32, %c0_i32_0 : i32, i32, i32
  }
  func.func @transform_1(%arg0: i32) -> (i32, i32, i32) {
    %c0_i32 = arith.constant 0 : i32
    %c0_i32_0 = arith.constant 0 : i32
    %c0_i32_1 = arith.constant 0 : i32
    %c0_i32_2 = arith.constant 0 : i32
    return %c0_i32, %c0_i32_0, %c0_i32_1 : i32, i32, i32
  }
  func.func @transform_2(%arg0: i32) -> (i32, i32, i32) {
    %c0_i32 = arith.constant 0 : i32
    %c0_i32_0 = arith.constant 0 : i32
    %c0_i32_1 = arith.constant 0 : i32
    %c0_i32_2 = arith.constant 0 : i32
    return %c0_i32, %c0_i32_0, %c0_i32_1 : i32, i32, i32
  }
  func.func @transform_3(%arg0: i32) -> (i32, i32, i32) {
    %c0_i32 = arith.constant 0 : i32
    %c0_i32_0 = arith.constant 0 : i32
    %c0_i32_1 = arith.constant 0 : i32
    %c0_i32_2 = arith.constant 0 : i32
    return %c0_i32, %c0_i32_0, %c0_i32_1 : i32, i32, i32
  }
  func.func @transform_4(%arg0: i32) -> (i32, i32, i32) {
    %c0_i32 = arith.constant 0 : i32
    %c0_i32_0 = arith.constant 0 : i32
    %c0_i32_1 = arith.constant 0 : i32
    %c0_i32_2 = arith.constant 0 : i32
    return %c0_i32, %c0_i32_0, %c0_i32_1 : i32, i32, i32
  }
  func.func @transform_5(%arg0: i32) -> (i32, i32, i32) {
    %c0_i32 = arith.constant 0 : i32
    %c0_i32_0 = arith.constant 0 : i32
    %c0_i32_1 = arith.constant 0 : i32
    %c0_i32_2 = arith.constant 0 : i32
    return %c0_i32, %c0_i32_0, %c0_i32_1 : i32, i32, i32
  }
  func.func @transform_6(%arg0: i32) -> (i32, i32) {
    %c0_i32 = arith.constant 0 : i32
    %c0_i32_0 = arith.constant 0 : i32
    %c0_i32_1 = arith.constant 0 : i32
    return %c0_i32, %c0_i32_0 : i32, i32
  }
  func.func @transform_7(%arg0: i32) -> (i32, i32) {
    %c0_i32 = arith.constant 0 : i32
    %c0_i32_0 = arith.constant 0 : i32
    %c0_i32_1 = arith.constant 0 : i32
    return %c0_i32, %c0_i32_0 : i32, i32
  }
  func.func @transform_8(%arg0: i32) -> (i32, i32, i32) {
    %c0_i32 = arith.constant 0 : i32
    %c0_i32_0 = arith.constant 0 : i32
    %c0_i32_1 = arith.constant 0 : i32
    return %arg0, %c0_i32, %c0_i32_0 : i32, i32, i32
  }
}

</mosaic_0001>

<bundles_post_ra>
// kernel: tpu_custom_call.1
= control target key start
LH: loop header
LB: loop body
LE: loop exit
PB: predicated region body
PF: predicated region fallthrough
CT: control target
= control target key end

     0   :  { %13 = vsyncpa [#allocation3], 0  ;;  %s7688_s0 = inlined_call_operand.vmem [shape: f32[2,8,32], index: 0, kind: input, shape index: {}]   ;;  %s7689_s1 = inlined_call_operand.hbm [shape: f32[1,16,32], index: 1, kind: input, shape index: {}]   ;;  %s7690_s2 = inlined_call_operand.hbm [shape: f32[1,16,32], index: 2, kind: input, shape index: {}]   ;;  %s7691_s3 = inlined_call_operand.vmem [shape: f32[1,4,32], index: 3, kind: input, shape index: {}]   ;;  %s7692_s4 = inlined_call_operand.hbm [shape: f32[28,32,32], index: 4, kind: input, shape index: {}]   ;;  %s7693_s5 = inlined_call_operand.vmem [shape: f32[28,1,32], index: 5, kind: input, shape index: {}]   ;;  %s7694_s6 = inlined_call_operand.vmem [shape: f32[32,8], index: 6, kind: input, shape index: {}]   ;;  %s7695_s7 = inlined_call_operand.vmem [shape: f32[1,8], index: 7, kind: input, shape index: {}]   ;;  %s7696_s8 = inlined_call_operand.hbm [shape: f32[2,4,8], index: 8, kind: output, shape index: {}]  }
   0x1   :  { %14 = vsyncpa [#allocation6], 0 }
   0x2   :  { %15 = vsyncpa [#allocation4], 0 }
   0x3   :  { %17 = vsyncpa [#allocation4 + $0x1], 0  ;;  %s6972_s27 = smov 0   ;;  %s6974_s28 = smov 0  }
   0x4   :  { %s6976_s29 = smov 0   ;;  %s6978_s30 = smov 0  }
   0x5 LB: > { %7704 = sst [smem:[#allocation12_spill]] %s6910_s29  ;;  %s6993_s9 = sadd.s32 4294967295, %s6914_s30   ;;  %s6914_s30 = sphi %s6978_s30, %s7723_s30   ;;  %s6910_s29 = sphi %s6976_s29, %s7725_s29   ;;  %s6906_s28 = sphi %s6974_s28, %s7727_s28   ;;  %s6902_s27 = sphi %s6972_s27, %s7726_s27  }
   0x6   : > { %s5506_s10 = sadd.s32 4294967294, %s6914_s30   ;;  %s6997_s11 = sadd.s32 1, %s6914_s30  }
   0x7   : > { %7705 = sst [smem:[#allocation13_spill]] %s6997_s11  ;;  %s203_s12 = sadd.s32 1, %s6910_s29 }
   0x8   : > { %s200_s13 = ssub.s32 %s6914_s30, %s6997_s11  ;;  %p213_p0 = scmp.ne.s32.totalorder %s6910_s29, %s6906_s28 }
   0x9   : > { %p201_p1 = scmp.eq.s32.totalorder %s200_s13, 0  ;;  %p214_p2 = scmp.eq.s32.totalorder %s6993_s9, 1 }
   0xa   : > { %p219_p3 = scmp.ne.s32.totalorder %s6906_s28, %s6902_s27  ;;  %p220_p4 = scmp.eq.s32.totalorder %s5506_s10, 1 }
   0xb   : > { %s7008_s14 = scalar_select %p201_p1, %s6910_s29, %s203_s12  }
   0xc   : > { %p7010_p5 = por %p214_p2, %p213_p0  ;;  %p7014_p6 = por %p220_p4, %p219_p3 }
   0xd   : > { %7706 = sst [smem:[#allocation14_spill]] %s7008_s14  ;;  %p5507_p7 = scmp.ge.s32.totalorder %s6914_s30, 1 }
   0xe   : > { %s7707_s15 = scalar_select %p7010_p5, 1, 0 }
   0xf   : > { %s7708_s16 = scalar_select %p7014_p6, 1, 0 }
  0x10   : > { %p227_p8 = scmp.lt.s32.totalorder %s6914_s30, 3  ;;  %p7697_p9 = scmp.eq.s32.totalorder %s6993_s9, 0 }
  0x11   : > { %7709 = sst [smem:[#allocation15_spill]] %s7708_s16  ;;  %s6916_s18 = smov [#allocation5]  }
  0x12   : > { %p7021_p10 = pnand %p5507_p7, %p227_p8  ;;  %s252_s19 = sshll.u32 %s6916_s18, 4  ;;  %s7027_s19 = int_to_ptr.vmem [resolvable:$true] %s252_s19 }
  0x13   : > { %s6917_s21 = smov [#allocation2]   ;;  %s6918_s23 = smov [#allocation7]  }
  0x14   : > { %s7710_s17 = scalar_select %p7021_p10, 1, 0 }
  0x15   : > { %p6605_p11 = pneg %p7021_p10  ;;  %s239_s22 = sshll.u32 %s6917_s21, 4  ;;  %s7035_s22 = int_to_ptr.vmem [resolvable:$true] %s239_s22 }
  0x16   : > { %s7037_s24 = sshll.u32 %s6918_s23, 4  ;;  %s6760_s10 = scalar_lea.hbm %s7690_s2, 256  ;;  %s269_s24 = int_to_ptr.vmem [resolvable:$true] %s7037_s24 }
  0x17   : > { %p7031_p12 = pnand %p7697_p9, %p6605_p11  ;;  %p6761_p13 = scmp.ne.s32.totalorder %s7690_s2, %s6760_s10 }
  0x18   : > { %p6767_p3 = scmp.lt.u32.totalorder %s6760_s10, %s7690_s2 }
  0x19   : > { %p7047_p0 = pneg %p7031_p12 }
  0x1b   : > { %p6763_p1 = pnand %p7047_p0, %p6761_p13 }
  0x1d   : > { %p6764_p2 = pneg %p6763_p1 }
  0x1f   : > { %p6769_p4 = pnand %p6767_p3, %p6764_p2 }
  0x21   : > { %6772 = shalt.err (!%p6769_p4)
}
  0x22   : > { %s6773_s25 = scalar_lea.vmem %s7027_s19, 256  ;;  %p6781_p9 = scmp.lt.s32.totalorder %s7027_s19, %s7027_s19 }
  0x23   : > { %p6774_p7 = scmp.ne.s32.totalorder %s7027_s19, %s6773_s25  ;;  %p6782_p6 = scmp.lt.s32.totalorder %s6773_s25, %s6773_s25 }
  0x25   : > { %p6776_p8 = pnand %p6774_p7, %p7047_p0  ;;  %p6783_p13 = por %p6782_p6, %p6781_p9 }
  0x27   : > { %p6777_p11 = pneg %p6776_p8 }
  0x29   : > { %p6784_p1 = pnand %p6783_p13, %p6777_p11 }
  0x2b   : > { %6787 = shalt.err (!%p6784_p1)
}
  0x2c   : > { %s6919_s26 = smov 128   ;;  %s6920_s10 = smov 8  }
  0x2d   : > { %6611 = dma.hbm_to_vmem [thread:$0]  (!%p7031_p12), %s7690_s2, 256, %s7027_s19, [#allocation6], %s6919_s26, %s6919_s26, %s6920_s10  }
  0x2e   : > { %s6788_s25 = scalar_lea.hbm %s7689_s1, 256 }
  0x2f   : > { %p6789_p6 = scmp.ne.s32.totalorder %s7689_s1, %s6788_s25  ;;  %p6795_p3 = scmp.lt.u32.totalorder %s6788_s25, %s7689_s1 }
  0x31   : > { %p6791_p9 = pnand %p6789_p6, %p7047_p0 }
  0x33   : > { %p6792_p2 = pneg %p6791_p9 }
  0x35   : > { %p6797_p4 = pnand %p6795_p3, %p6792_p2 }
  0x37   : > { %6800 = shalt.err (!%p6797_p4)
}
  0x38   : > { %s6801_s19 = scalar_lea.vmem %s7035_s22, 256  ;;  %p6809_p13 = scmp.lt.s32.totalorder %s7035_s22, %s7035_s22 }
  0x39   : > { %p6802_p7 = scmp.ne.s32.totalorder %s7035_s22, %s6801_s19  ;;  %p6810_p1 = scmp.lt.s32.totalorder %s6801_s19, %s6801_s19 }
  0x3b   : > { %p6804_p8 = pnand %p6802_p7, %p7047_p0  ;;  %p6811_p6 = por %p6810_p1, %p6809_p13 }
  0x3d   : > { %p6805_p11 = pneg %p6804_p8 }
  0x3f   : > { %p6812_p9 = pnand %p6811_p6, %p6805_p11 }
  0x41   : > { %6815 = shalt.err (!%p6812_p9)
}
  0x42   : > { %6608 = dma.hbm_to_vmem [thread:$0]  (!%p7031_p12), %s7689_s1, 256, %s7035_s22, [#allocation3], %s6919_s26, %s6919_s26, %s6920_s10  }
  0x43   : > { %s6816_s12 = scalar_lea.hbm %s7692_s4, 14336 }
  0x44   : > { %p6817_p2 = scmp.ne.s32.totalorder %s7692_s4, %s6816_s12  ;;  %p6823_p7 = scmp.lt.u32.totalorder %s6816_s12, %s7692_s4 }
  0x46   : > { %p6819_p3 = pnand %p6817_p2, %p7047_p0 }
  0x48   : > { %p6820_p4 = pneg %p6819_p3 }
  0x4a   : > { %p6825_p8 = pnand %p6823_p7, %p6820_p4 }
  0x4c   : > { %6828 = shalt.err (!%p6825_p8)
}
  0x4d   : > { %s6829_s19 = scalar_lea.vmem %s269_s24, 14336  ;;  %p6837_p6 = scmp.lt.s32.totalorder %s269_s24, %s269_s24 }
  0x4e   : > { %p6830_p11 = scmp.ne.s32.totalorder %s269_s24, %s6829_s19  ;;  %p6838_p9 = scmp.lt.s32.totalorder %s6829_s19, %s6829_s19 }
  0x50   : > { %p6832_p13 = pnand %p6830_p11, %p7047_p0  ;;  %p6839_p5 = por %p6838_p9, %p6837_p6 }
  0x52   : > { %p6833_p1 = pneg %p6832_p13 }
  0x54   : > { %p6840_p10 = pnand %p6839_p5, %p6833_p1 }
  0x56   : > { %6843 = shalt.err (!%p6840_p10)
}
  0x57   : > { %6614 = dma.hbm_to_vmem [thread:$0]  (!%p7031_p12), %s7692_s4, 14336, %s269_s24, [#allocation6], %s6919_s26, %s6919_s26, %s6920_s10  }
  0x58   : > { %p7713_p2 = scmp.ne.s32.totalorder %s7710_s17, 0 }
  0x59   : > { %p7714_p0 = scmp.eq.s32.totalorder (!%p7713_p2), %s6993_s9, 0 }
  0x5a   : > { %300 = sbr.rel (%p7713_p2) target bundleno = 9156 (0x23c4), region = 52 }
  0x61   : > { %6889 = dma.done.wait (%p7714_p0), [#allocation3], 256   ;;  %p7715_p3 = pmov %p7714_p0 }
  0x62   : > { %p7716_p5 = pmov %p7714_p0 }
  0x63   : > { %6891 = vsyncadd (%p7715_p3), [#allocation3], 4294967040 }
  0x64   : > { %6893 = dma.done.wait (%p7716_p5), [#allocation6], 14592   ;;  %p7717_p10 = pmov %p7714_p0 }
  0x65   : > { %p341_p4 = scmp.lt.s32.totalorder %s6993_s9, 1  ;;  %v6921_v0 = vmov 0.0|0.0   ;;  %vm6922_vm0 = vmmov 0   ;;  %v6923_v1 = vmov 0.0   ;;  %v442_v2 = vld [vmem:[#allocation7 + $0x20] sm:$0xff]  ;;  %v443_v3 = vld [vmem:[#allocation7 + $0x28] sm:$0xff] }
  0x66   : > { %6895 = vsyncadd (%p7717_p10), [#allocation6], 4294952704  ;;  %6381 = vmatprep.subr.bf16.mxu1 %v6921_v0  ;;  %5917 = vmatprep.mubr.msk.f32.mxu1 %vm6922_vm0, %v6923_v1  ;;  %v348_v4 = vld [vmem:[#allocation7] sm:$0xff]  ;;  %v6382_v5 = vpack.c.bf16 %v443_v3, %v442_v2  ;;  %v349_v6 = vld [vmem:[#allocation7 + $0x8] sm:$0xff]  ;;  %vm359_vm1 = vcmask 261120   ;;  %vm625_vm2 = vcmask 130048  }
  0x67   : > { %s342_s17 = scalar_select %p341_p4, %s6993_s9, 1  ;;  %v444_v7 = vld [vmem:[#allocation7 + $0x30] sm:$0xff]  ;;  %v445_v8 = vld [vmem:[#allocation7 + $0x38] sm:$0xff]  ;;  %v6373_v9 = vpack.c.bf16 %v349_v6, %v348_v4  ;;  %v346_v14 = vld [vmem:[#allocation2] sm:$0xff]  ;;  %vm792_vm3 = vcmask 64512   ;;  %vm3692_vm5 = vcmask 60416  }
  0x68   : > { %v350_v10 = vld [vmem:[#allocation7 + $0x10] sm:$0xff]  ;;  %v351_v11 = vld [vmem:[#allocation7 + $0x18] sm:$0xff]  ;;  %6383 = vmatpush3.bf16.msra.mxu1 %v6382_v5  ;;  %v6385_v12 = vpack.c.bf16 %v445_v8, %v444_v7  ;;  %5906 = vmatprep.mubr.msk.f32.mxu0 %vm359_vm1, %v346_v14  ;;  %v347_v16 = vld [vmem:[#allocation2 + $0x8] sm:$0xff]  ;;  %s6924_s12 = smov 112   ;;  %s6925_s23 = smov 16   ;;  %vm4391_vm6 = vcmask 1043456  }
  0x69   : > { %s5517_s20 = sshll.u32 %s342_s17, 3  ;;  %v6377_v13 = vpack.c.bf16 %v351_v11, %v350_v10  ;;  %6374 = vmatprep.subr.bf16.mxu0 %v6373_v9  ;;  %6384 = vmatprep.subr.bf16.mxu1 %v6921_v0  ;;  %v528_v17 = vld [vmem:[#allocation7 + $0x40] sm:$0xff]  ;;  %v529_v18 = vld [vmem:[#allocation7 + $0x48] sm:$0xff]  ;;  %v530_v19 = vld [vmem:[#allocation7 + $0x50] sm:$0xff]  ;;  %vm4368_vm7 = vcmask 27648   ;;  %vm4387_vm8 = vcmask 31744  }
  0x6a   : > { %s344_s26 = scalar_lea.vmem %s7688_s0, %s5517_s20  ;;  %6376 = vmatpush3.bf16.msra.mxu0 %v6373_v9  ;;  %v6388_v20 = vpack.c.bf16 %v529_v18, %v528_v17  ;;  %v531_v21 = vld [vmem:[#allocation7 + $0x58] sm:$0xff]  ;;  %v5522_v22 = vld [vmem:[%s7693_s5 + $0x1] ss:$0 sm:$0xff]  ;;  %v5518_v25 = vld [vmem:[%s7693_s5] ss:$0 sm:$0xff]  ;;  %s338_s13 = sand.u32 1, %s6906_s28  }
  0x6b   : > { %6378 = vmatprep.subr.bf16.mxu0 %v6377_v13  ;;  %v7139_v15 = vld [vmem:[%s344_s26] sm:$0xff]  ;;  %v6391_v23 = vpack.c.bf16 %v531_v21, %v530_v19  ;;  %v1015_v11 = vld [vmem:[#allocation7 + $0x68] sm:$0xff]  ;;  %v1017_v14 = vld [vmem:[#allocation7 + $0x78] sm:$0xff]  ;;  %s5516_s21 = sshll.u32 %s338_s13, 2  ;;  %s5670_s22 = sshll.u32 %s6993_s9, 6 }
  0x6c   : > { %6386 = vmatpush3.bf16.msra.mxu1 %v6385_v12  ;;  %v5525_v37 = vld [vmem:[%s7693_s5 + $0x2] ss:$0 sm:$0xff]  ;;  %v1016_v12 = vld [vmem:[#allocation7 + $0x70] sm:$0xff]  ;;  %vm7234_vm4 = vmpackc.low %vm625_vm2, %vm625_vm2  ;;  %s340_s29 = scalar_lea.vmem [#allocation8], %s5516_s21  ;;  %s7645_s24 = scalar_lea.hbm %s7696_s8, %s5670_s22 }
  0x6d   : > { %v1014_v10 = vld [vmem:[#allocation7 + $0x60] sm:$0xff]  ;;  %v1114_v21 = vld [vmem:[#allocation7 + $0x90] sm:$0xff]  ;;  %s5416_s17 = sshll.u32 %s340_s29, 4  ;;  %s5403_s18 = scalar_lea.sflag [#allocation4], %s338_s13  ;;  %s7647_s17 = int_to_ptr.vmem [resolvable:$true] %s5416_s17 }
  0x6e   : > { %6380 = vmatpush3.bf16.msra.mxu0 %v6377_v13  ;;  %v6393_v13 = vpack.c.bf16 %v1015_v11, %v1014_v10  ;;  %v1112_v19 = vld [vmem:[#allocation7 + $0x80] sm:$0xff]  ;;  %p7720_p7 = scmp.ne.s32.totalorder %s7707_s15, 0  ;;  %s6926_s9 = smov [#allocation8]  }
  0x6f   : > { %5918 = vmatmul.mubr.msk.f32.vlgmr.msra.gmra.mrb[0].mxu1 %vm359_vm1, %v7139_v15  ;;  %6387 = vmatprep.subr.bf16.mxu0 %v6921_v0  ;;  %s6848_s26 = sshll.u32 %s6926_s9, 4  ;;  %s6849_s26 = int_to_ptr.vmem [resolvable:$false] %s6848_s26 }
  0x70   : > { %s6850_s10 = scalar_lea.vmem %s6849_s26, 128  ;;  %p6851_p13 = scmp.lt.s32.totalorder %s7647_s17, %s6849_s26 }
  0x71   : > { %5907 = vmatmul.mubr.msk.f32.vlgmr.msra.gmra.mrb[0].mxu0 %vm359_vm1, %v347_v16  ;;  %v6397_v16 = vpack.c.bf16 %v1017_v14, %v1016_v12 }
  0x72   : > { %5928 = vmatprep.mubr.msk.f32.mxu0 %vm6922_vm0, %v6923_v1  ;;  %6389 = vmatpush3.bf16.msra.mxu0 %v6388_v20  ;;  %v1113_v20 = vld [vmem:[#allocation7 + $0x88] sm:$0xff] }
  0x73   : > { %6390 = vmatprep.subr.bf16.mxu0 %v6921_v0 }
  0x76   : > { %6392 = vmatpush3.bf16.msra.mxu0 %v6391_v23  ;;  %v1115_v23 = vld [vmem:[#allocation7 + $0x98] sm:$0xff] }
  0x79   : > { %5929 = vmatmul.mubr.msk.f32.vlgmr.msra.gmra.mrb[2].mxu0 %vm359_vm1, %v7139_v15 }
 0x142   : > { %v523_v24 = vpop.f32.mrb[0].mxu1 }
 0x143   : > { %v524_v26 = vadd.f32 %v5522_v22, %v523_v24  ;;  %v5919_v27 = vpop.f32.mrb[1].mxu1  ;;  %v6402_v22 = vpack.c.bf16 %v1113_v20, %v1112_v19  ;;  %v6405_v24 = vpack.c.bf16 %v1115_v23, %v1114_v21  ;;  %v5542_v23 = vld [vmem:[%s7693_s5 + $0x4] ss:$0 sm:$0xff] }
 0x144   : > { %v5908_v28 = vpop.f32.mrb[0].mxu0 }
 0x145   : > { %v7154_v29 = vadd.f32 %v5908_v28, %v5518_v25  ;;  %v432_v30 = vpop.f32.mrb[1].mxu0  ;;  %619 = vrot.lane.b32.xlu0 %v524_v26, %s6924_s12  ;;  %5931 = vmatprep.subr.msk.mxu1 %vm625_vm2, %v524_v26 }
 0x146   : > { %v7158_v31 = vadd.f32 %v5518_v25, %v432_v30  ;;  %5932 = vmatpush3.xpose.msk.msra.mxu1 %vm625_vm2, %v524_v26 }
 0x147   : > { %614 = vrot.lane.b32.xlu1 %v7154_v29, %s6924_s12 }
 0x148   : > { %5933 = vmatprep.mubr.msk.f32.mxu1 %vm625_vm2, %v7158_v31 }
 0x149   : > { %612 = vrot.lane.b32.xlu0 %v7158_v31, %s6924_s12  ;;  %5934 = vmatmul.mubr.msk.f32.vlgmr.msra.gmra.mrb[2].mxu1 %vm625_vm2, %v7154_v29 }
 0x14c   : > { %v606_v38 = vpop.f32.mrb[2].mxu0 }
 0x14d   : > { %v607_v39 = vadd.f32 %v5525_v37, %v606_v38  ;;  %v5930_v40 = vpop.f32.mrb[3].mxu0 }
 0x14f   : > { %5941 = vmatprep.subr.mxu0 %v607_v39 }
 0x150   : > { %5942 = vmatpush3.msra.mxu0 %v607_v39 }
 0x151   : > { %6394 = vmatprep.subr.bf16.mxu0 %v6393_v13 }
 0x1b7   : > { %v620_v32 = vpop.permute.xlu0 %619 }
 0x1b8   : > { %5936 = vmatprep.subr.msk.mxu1 %vm625_vm2, %v620_v32 }
 0x1b9   : > { %5937 = vmatpush3.xpose.msk.msra.mxu1 %vm625_vm2, %v620_v32  ;;  %v7175_v34 = vpop.permute.xlu1 %614 }
 0x1bb   : > { %v7173_v33 = vpop.permute.xlu0 %612 }
 0x1bc   : > { %5938 = vmatprep.mubr.msk.f32.mxu1 %vm625_vm2, %v7173_v33 }
 0x1bd   : > { %5939 = vmatmul.mubr.msk.f32.vlgmr.msra.gmra.mrb[4].mxu1 %vm625_vm2, %v7175_v34 }
 0x21c   : > { %v5935_v35 = vpop.f32.mrb[2].mxu1 }
 0x21d   : > { %v698_v36 = vpop.f32.mrb[3].mxu1  ;;  %v789_v48 = vmul.f32 0.17677669, %v5935_v35 }
 0x21e   : > { %v788_v46 = vmul.f32 0.17677669, %v698_v36 }
 0x21f   : > { %v796_v50 = vsel %vm792_vm3, %v789_v48, -inf }
 0x220   : > { %v793_v49 = vsel %vm792_vm3, %v788_v46, -inf }
 0x290   : > { %v5940_v41 = vpop.f32.mrb[4].mxu1 }
 0x291   : > { %v791_v42 = vmul.f32 0.17677669, %v5940_v41  ;;  %v779_v43 = vpop.f32.mrb[5].mxu1 }
 0x292   : > { %v790_v44 = vmul.f32 0.17677669, %v779_v43 }
 0x293   : > { %v802_v45 = vsel %vm792_vm3, %v791_v42, -inf }
 0x294   : > { %803 = vmax.xlane.f32.xlu0 %v802_v45  ;;  %v799_v47 = vsel %vm792_vm3, %v790_v44, -inf }
 0x295   : > { %800 = vmax.xlane.f32.xlu1 %v799_v47 }
 0x299   : > { %794 = vmax.xlane.f32.xlu1 %v793_v49  ;;  %v1196_v49 = vld [vmem:[#allocation7 + $0xa8] sm:$0xff] }
 0x29d   : > { %797 = vmax.xlane.f32.xlu1 %v796_v50  ;;  %v1289_v50 = vld [vmem:[#allocation7 + $0xc0] sm:$0xff] }
 0x2aa   : > { %622 = vrot.lane.b32.xlu0 %v607_v39, %s6924_s12 }
 0x321   : > { %v804_v51 = vpop.xlane.xlu0 %803 }
 0x322   : > { %v808_v52 = vsub.f32 %v791_v42, %v804_v51  ;;  %v801_v53 = vpop.xlane.xlu1 %800 }
 0x323   : > { %v807_v54 = vsub.f32 %v790_v44, %v801_v53 }
 0x324   : > { %v815_v55 = vmul.f32 1.442695, %v808_v52  ;;  %v1290_v52 = vld [vmem:[#allocation7 + $0xc8] sm:$0xff] }
 0x325   : > { %v813_v56 = vmul.f32 1.442695, %v807_v54  ;;  %v623_v57 = vpop.permute.xlu0 %622  ;;  %v6415_v53 = vpack.c.bf16 %v1290_v52, %v1289_v50  ;;  %v1291_v54 = vld [vmem:[#allocation7 + $0xd0] sm:$0xff] }
 0x326   : > { %v795_v58 = vpop.xlane.xlu1 %794  ;;  %5946 = vmatprep.subr.mxu1 %v623_v57 }
 0x327   : > { %6688 = vpow2.f32 %v813_v56  ;;  %v805_v59 = vsub.f32 %v788_v46, %v795_v58  ;;  %5947 = vmatpush3.msra.mxu1 %v623_v57  ;;  %v1292_v56 = vld [vmem:[#allocation7 + $0xd8] sm:$0xff] }
 0x328   : > { %6690 = vpow2.f32 %v815_v55  ;;  %6401 = vmatprep.subr.bf16.mxu1 %v6921_v0  ;;  %v6419_v57 = vpack.c.bf16 %v1292_v56, %v1291_v54 }
 0x329   : > { %v809_v60 = vmul.f32 1.442695, %v805_v59 }
 0x32a   : > { %v798_v61 = vpop.xlane.xlu1 %797 }
 0x32b   : > { %6692 = vpow2.f32 %v809_v60  ;;  %v806_v62 = vsub.f32 %v789_v48, %v798_v61  ;;  %v1195_v48 = vld [vmem:[#allocation7 + $0xa0] sm:$0xff] }
 0x32c   : > { %v6407_v51 = vpack.c.bf16 %v1196_v49, %v1195_v48  ;;  %v5538_v60 = vld [vmem:[%s7693_s5 + $0x3] ss:$0 sm:$0xff] }
 0x32d   : > { %v811_v63 = vmul.f32 1.442695, %v806_v62 }
 0x32f   : > { %6694 = vpow2.f32 %v811_v63 }
 0x331   : > { %v6689_v2 = vpop.eup %6688 }
 0x332   : > { %v6691_v3 = vpop.eup %6690  ;;  %5948 = vmatprep.mubr.msk.f32.mxu1 %vm792_vm3, %v6689_v2  ;;  %v823_v4 = vsel %vm792_vm3, %v6689_v2, 0.0 }
 0x333   : > { %5949 = vmatmul.mubr.msk.f32.vlgmr.msra.gmra.mrb[6].mxu1 %vm792_vm3, %v6691_v3  ;;  %824 = vadd.xlane.f32.xlu1 %v823_v4  ;;  %v826_v6 = vsel %vm792_vm3, %v6691_v3, 0.0 }
 0x334   : > { %5970 = vmatprep.mubr.msk.f32.mxu1 %vm6922_vm0, %v6923_v1  ;;  %6403 = vmatpush3.bf16.msra.mxu1 %v6402_v22 }
 0x335   : > { %v6693_v5 = vpop.eup %6692  ;;  %6404 = vmatprep.subr.bf16.mxu1 %v6921_v0 }
 0x336   : > { %5943 = vmatprep.mubr.msk.f32.mxu0 %vm792_vm3, %v6693_v5  ;;  %v817_v8 = vsel %vm792_vm3, %v6693_v5, 0.0 }
 0x337   : > { %827 = vadd.xlane.f32.xlu1 %v826_v6 }
 0x338   : > { %6406 = vmatpush3.bf16.msra.mxu1 %v6405_v24 }
 0x339   : > { %v6695_v7 = vpop.eup %6694  ;;  %6416 = vmatprep.subr.bf16.mxu1 %v6415_v53 }
 0x33a   : > { %5944 = vmatmul.mubr.msk.f32.vlgmr.msra.gmra.mrb[4].mxu0 %vm792_vm3, %v6695_v7  ;;  %v820_v9 = vsel %vm792_vm3, %v6695_v7, 0.0  ;;  %v5545_v7 = vld [vmem:[%s7693_s5 + $0x5] ss:$0 sm:$0xff] }
 0x33b   : > { %818 = vadd.xlane.f32.xlu1 %v817_v8  ;;  %6396 = vmatpush3.bf16.msra.mxu0 %v6393_v13  ;;  %v5549_v8 = vld [vmem:[%s7693_s5 + $0x6] ss:$0 sm:$0xff] }
 0x33c   : > { %6398 = vmatprep.subr.bf16.mxu0 %v6397_v16  ;;  %5971 = vmatmul.mubr.msk.f32.vlgmr.msra.gmra.mrb[8].mxu1 %vm359_vm1, %v7139_v15 }
 0x33d   : > { %6418 = vmatpush3.bf16.msra.mxu1 %v6415_v53  ;;  %v1724_v53 = vld [vmem:[#allocation7 + $0xe0] sm:$0xff] }
 0x33e   : > { %6420 = vmatprep.subr.bf16.mxu1 %v6419_v57 }
 0x33f   : > { %821 = vadd.xlane.f32.xlu1 %v820_v9  ;;  %6400 = vmatpush3.bf16.msra.mxu0 %v6397_v16 }
 0x340   : > { %6408 = vmatprep.subr.bf16.mxu0 %v6407_v51 }
 0x341   : > { %6422 = vmatpush3.bf16.msra.mxu1 %v6419_v57 }
 0x342   : > { %6427 = vmatprep.subr.bf16.mxu1 %v6921_v0 }
 0x3c0   : > { %v825_v17 = vpop.xlane.xlu1 %824 }
 0x3c4   : > { %v828_v18 = vpop.xlane.xlu1 %827 }
 0x3c5   : > { %6696 = vrcp.f32 %v828_v18 }
 0x3c6   : > { %6698 = vrcp.f32 %v825_v17 }
 0x3c8   : > { %v819_v39 = vpop.xlane.xlu1 %818 }
 0x3c9   : > { %6700 = vrcp.f32 %v819_v39 }
 0x3cc   : > { %v822_v40 = vpop.xlane.xlu1 %821 }
 0x3cd   : > { %6702 = vrcp.f32 %v822_v40 }
 0x3cf   : > { %v6697_v25 = vpop.eup %6696 }
 0x3d0   : > { %v6699_v27 = vpop.eup %6698 }
 0x3d3   : > { %v6701_v41 = vpop.eup %6700 }
 0x3d7   : > { %v6703_v42 = vpop.eup %6702 }
 0x406   : > { %v5950_v26 = vpop.f32.mrb[6].mxu1 }
 0x407   : > { %v998_v28 = vmul.f32 %v6697_v25, %v5950_v26  ;;  %v982_v30 = vpop.f32.mrb[7].mxu1 }
 0x408   : > { %v997_v32 = vmul.f32 %v6699_v27, %v982_v30 }
 0x409   : > { %v1002_v35 = vadd.f32 %v998_v28, %v7175_v34 }
 0x40a   : > { %v1001_v36 = vadd.f32 %v997_v32, %v7173_v33 }
 0x40b   : > { %1007 = vrot.lane.b32.xlu1 %v1002_v35, %s6925_s23 }
 0x40c   : > { %1005 = vrot.lane.b32.xlu0 %v1001_v36, %s6925_s23 }
 0x40d   : > { %v5945_v37 = vpop.f32.mrb[4].mxu0 }
 0x40e   : > { %v901_v38 = vpop.f32.mrb[5].mxu0  ;;  %v996_v34 = vmul.f32 %v6703_v42, %v5945_v37 }
 0x40f   : > { %v995_v43 = vmul.f32 %v6701_v41, %v901_v38  ;;  %v1190_v58 = vpop.f32.mrb[8].mxu1 }
 0x410   : > { %v1000_v45 = vadd.f32 %v996_v34, %v7154_v29  ;;  %v1198_v29 = vld [vmem:[#allocation7 + $0xb8] sm:$0xff]  ;;  %v5972_v59 = vpop.f32.mrb[9].mxu1  ;;  %v7245_v24 = vadd.f32 %v5542_v23, %v1190_v58 }
 0x411   : > { %v999_v33 = vadd.f32 %v995_v43, %v7158_v31  ;;  %v1197_v31 = vld [vmem:[#allocation7 + $0xb0] sm:$0xff]  ;;  %v1812_v23 = vld [vmem:[#allocation5 + $0x8] sm:$0xff] }
 0x412   : > { %v6411_v55 = vpack.c.bf16 %v1198_v29, %v1197_v31  ;;  %v1725_v31 = vld [vmem:[#allocation7 + $0xe8] sm:$0xff]  ;;  %v1726_v29 = vld [vmem:[#allocation7 + $0xf0] sm:$0xff] }
 0x413   : > { %v6438_v54 = vpack.c.bf16 %v1725_v31, %v1724_v53 }
 0x47d   : > { %v1008_v44 = vpop.permute.xlu1 %1007 }
 0x47e   : > { %v1006_v46 = vpop.permute.xlu0 %1005  ;;  %v1012_v47 = vsel %vm625_vm2, %v1000_v45, %v1008_v44 }
 0x47f   : > { %v1011_v15 = vsel %vm625_vm2, %v999_v33, %v1006_v46 }
 0x480   : > { %5959 = vmatprep.mubr.msk.f32.mxu0 %vm359_vm1, %v1011_v15 }
 0x481   : > { %5960 = vmatmul.mubr.msk.f32.vlgmr.msra.gmra.mrb[6].mxu0 %vm359_vm1, %v1012_v47 }
 0x482   : > { %6410 = vmatpush3.bf16.msra.mxu0 %v6407_v51 }
 0x483   : > { %6412 = vmatprep.subr.bf16.mxu0 %v6411_v55 }
 0x486   : > { %6414 = vmatpush3.bf16.msra.mxu0 %v6411_v55  ;;  %v1727_v55 = vld [vmem:[#allocation7 + $0xf8] sm:$0xff] }
 0x487   : > { %6423 = vmatprep.subr.bf16.mxu0 %v6921_v0  ;;  %v6441_v56 = vpack.c.bf16 %v1727_v55, %v1726_v29 }
 0x554   : > { %v5961_v61 = vpop.f32.mrb[6].mxu0 }
 0x555   : > { %v1104_v62 = vadd.f32 %v5961_v61, %v5538_v60  ;;  %v1098_v63 = vpop.f32.mrb[7].mxu0  ;;  %v1815_v61 = vld [vmem:[#allocation7 + $0x108] sm:$0xff] }
 0x556   : > { %v1099_v2 = vadd.f32 %v5538_v60, %v1098_v63  ;;  %v1814_v60 = vld [vmem:[#allocation7 + $0x100] sm:$0xff] }
 0x557   : > { %v1108_v3 = vmax.f32 %v1104_v62, 0.0  ;;  %v1816_v62 = vld [vmem:[#allocation7 + $0x110] sm:$0xff]  ;;  %v6443_v63 = vpack.c.bf16 %v1815_v61, %v1814_v60 }
 0x558   : > { %v1107_v4 = vmax.f32 %v1099_v2, 0.0  ;;  %v1817_v2 = vld [vmem:[#allocation7 + $0x118] sm:$0xff] }
 0x559   : > { %v1110_v6 = vadd.f32 %v1108_v3, %v1012_v47  ;;  %v1811_v3 = vld [vmem:[#allocation5] sm:$0xff] }
 0x55a   : > { %v1109_v5 = vadd.f32 %v1107_v4, %v1011_v15  ;;  %v6447_v4 = vpack.c.bf16 %v1817_v2, %v1816_v62 }
 0x55c   : > { %5981 = vmatprep.mubr.msk.f32.mxu0 %vm359_vm1, %v1109_v5  ;;  %5992 = vmatprep.mubr.msk.f32.mxu1 %vm359_vm1, %v1109_v5 }
 0x55d   : > { %5982 = vmatmul.mubr.msk.f32.vlgmr.msra.gmra.mrb[8].mxu0 %vm359_vm1, %v1110_v6  ;;  %5993 = vmatmul.mubr.msk.f32.vlgmr.msra.gmra.mrb[10].mxu1 %vm359_vm1, %v1110_v6 }
 0x55e   : > { %5999 = vmatprep.mubr.msk.f32.mxu0 %vm6922_vm0, %v6923_v1  ;;  %6006 = vmatprep.mubr.msk.f32.mxu1 %vm6922_vm0, %v6923_v1 }
 0x630   : > { %v5983_v9 = vpop.f32.mrb[8].mxu0  ;;  %v5994_v10 = vpop.f32.mrb[10].mxu1 }
 0x631   : > { %v1285_v11 = vadd.f32 %v5983_v9, %v5545_v7  ;;  %v1373_v12 = vadd.f32 %v5994_v10, %v5549_v8  ;;  %v1279_v13 = vpop.f32.mrb[9].mxu0  ;;  %v1367_v14 = vpop.f32.mrb[11].mxu1 }
 0x632   : > { %v1280_v16 = vadd.f32 %v5545_v7, %v1279_v13  ;;  %v1368_v17 = vadd.f32 %v5549_v8, %v1367_v14 }
 0x634   : > { %v6668_v18 = vpack.i.bf16 %v1285_v11, %v1280_v16  ;;  %v6424_v19 = vpack.c.bf16 %v1285_v11, %v1280_v16  ;;  %v6673_v20 = vpack.i.bf16 %v1373_v12, %v1368_v17  ;;  %v6432_v21 = vpack.c.bf16 %v1373_v12, %v1368_v17  ;;  %v1908_v17 = vld [vmem:[#allocation7 + $0x120] sm:$0xff] }
 0x636   : > { %6674 = vrot.lane.b32.xlu1 %v6673_v20, %s6924_s12  ;;  %6669 = vrot.lane.b32.xlu0 %v6668_v18, %s6924_s12  ;;  %v1909_v18 = vld [vmem:[#allocation7 + $0x128] sm:$0xff] }
 0x637   : > { %6426 = vmatpush3.bf16.xpose.msk.msra.mxu0 %vm7234_vm4, %v6424_v19  ;;  %v1994_v19 = vld [vmem:[#allocation7 + $0x140] sm:$0xff]  ;;  %v6452_v20 = vpack.c.bf16 %v1909_v18, %v1908_v17  ;;  %v2577_v17 = vld [vmem:[#allocation7 + $0x188] sm:$0xff] }
 0x638   : > { %6431 = vmatprep.subr.bf16.mxu0 %v6921_v0 }
 0x63a   : > { %1377 = vrot.lane.b32.xlu0 %v7245_v24, %s6924_s12 }
 0x63e   : > { %6000 = vmatmul.mubr.msk.f32.vlgmr.msra.gmra.mrb[10].mxu0 %vm625_vm2, %v7245_v24 }
 0x63f   : > { %6433 = vmatpush3.bf16.msra.mxu0 %v6432_v21  ;;  %6013 = vmatprep.mubr.msk.f32.mxu0 %vm6922_vm0, %v6923_v1  ;;  %v1995_v21 = vld [vmem:[#allocation7 + $0x148] sm:$0xff] }
 0x640   : > { %6437 = vmatprep.subr.bf16.mxu0 %v6921_v0 }
 0x6a8   : > { %v6670_v25 = vpop.permute.xlu0 %6669  ;;  %v6675_v30 = vpop.permute.xlu1 %6674 }
 0x6a9   : > { %v6672_v26 = vunpack.i.h.bf16 %v6670_v25  ;;  %v6671_v27 = vunpack.i.l.bf16 %v6670_v25  ;;  %v6677_v32 = vunpack.i.h.bf16 %v6675_v30  ;;  %v6676_v35 = vunpack.i.l.bf16 %v6675_v30  ;;  %v1997_v30 = vld [vmem:[#allocation7 + $0x158] sm:$0xff] }
 0x6aa   : > { %v6458_v25 = vpack.c.bf16 %v1995_v21, %v1994_v19  ;;  %v2579_v21 = vld [vmem:[#allocation7 + $0x198] sm:$0xff] }
 0x6ab   : > { %v6428_v28 = vpack.c.bf16 %v6672_v26, %v6671_v27  ;;  %v6435_v37 = vpack.c.bf16 %v6677_v32, %v6676_v35  ;;  %v1911_v26 = vld [vmem:[#allocation7 + $0x138] sm:$0xff]  ;;  %v1996_v27 = vld [vmem:[#allocation7 + $0x150] sm:$0xff]  ;;  %v5561_v35 = vld [vmem:[%s7693_s5 + $0x7] ss:$0 sm:$0xff] }
 0x6ac   : > { %v7258_v36 = vpop.permute.xlu0 %1377  ;;  %v6461_v32 = vpack.c.bf16 %v1997_v30, %v1996_v27 }
 0x6ad   : > { %6430 = vmatpush3.bf16.xpose.msk.msra.mxu1 %vm7234_vm4, %v6428_v28 }
 0x6ae   : > { %6434 = vmatprep.subr.bf16.mxu1 %v6921_v0 }
 0x6b4   : > { %6007 = vmatmul.mubr.msk.f32.vlgmr.msra.gmra.mrb[12].mxu1 %vm625_vm2, %v7258_v36 }
 0x6b5   : > { %6436 = vmatpush3.bf16.msra.mxu1 %v6435_v37  ;;  %6020 = vmatprep.mubr.msk.f32.mxu1 %vm6922_vm0, %v6923_v1 }
 0x6b6   : > { %6444 = vmatprep.subr.bf16.mxu1 %v6443_v63 }
 0x711   : > { %v1466_v38 = vpop.f32.mrb[10].mxu0 }
 0x712   : > { %v1546_v39 = vmul.f32 0.17677669, %v1466_v38  ;;  %v6001_v40 = vpop.f32.mrb[11].mxu0 }
 0x714   : > { %v1548_v41 = vsel %vm625_vm2, %v1546_v39, -inf }
 0x715   : > { %1549 = vmax.xlane.f32.xlu1 %v1548_v41  ;;  %v5564_v41 = vld [vmem:[%s7693_s5 + $0x8] ss:$0 sm:$0xff] }
 0x787   : > { %v1542_v42 = vpop.f32.mrb[12].mxu1 }
 0x788   : > { %v1547_v43 = vmul.f32 0.17677669, %v1542_v42  ;;  %v6008_v34 = vpop.f32.mrb[13].mxu1 }
 0x78a   : > { %v1551_v33 = vsel %vm625_vm2, %v1547_v43, -inf }
 0x78b   : > { %1552 = vmax.xlane.f32.xlu0 %v1551_v33 }
 0x7a2   : > { %v1550_v44 = vpop.xlane.xlu1 %1549 }
 0x7a3   : > { %v1554_v45 = vsub.f32 %v1546_v39, %v1550_v44 }
 0x7a5   : > { %v1556_v46 = vmul.f32 1.442695, %v1554_v45  ;;  %v5568_v45 = vld [vmem:[%s7693_s5 + $0x9] ss:$0 sm:$0xff] }
 0x7a7   : > { %6704 = vpow2.f32 %v1556_v46 }
 0x7b1   : > { %v6705_v15 = vpop.eup %6704 }
 0x7b2   : > { %6014 = vmatmul.mubr.msk.f32.vlgmr.msra.gmra.mrb[12].mxu0 %vm625_vm2, %v6705_v15  ;;  %v1560_v52 = vsel %vm625_vm2, %v6705_v15, 0.0  ;;  %v5571_v15 = vld [vmem:[%s7693_s5 + $0xa] ss:$0 sm:$0xff] }
 0x7b3   : > { %6031 = vmatprep.mubr.msk.f32.mxu0 %vm6922_vm0, %v6923_v1  ;;  %6439 = vmatpush3.bf16.msra.mxu0 %v6438_v54 }
 0x7b4   : > { %6440 = vmatprep.subr.bf16.mxu0 %v6921_v0 }
 0x7b7   : > { %6442 = vmatpush3.bf16.msra.mxu0 %v6441_v56 }
 0x7b8   : > { %6451 = vmatprep.subr.bf16.mxu0 %v6921_v0 }
 0x818   : > { %v1553_v47 = vpop.xlane.xlu0 %1552 }
 0x819   : > { %v1555_v48 = vsub.f32 %v1547_v43, %v1553_v47 }
 0x81b   : > { %v1558_v49 = vmul.f32 1.442695, %v1555_v48 }
 0x81d   : > { %6706 = vpow2.f32 %v1558_v49 }
 0x827   : > { %v6707_v50 = vpop.eup %6706 }
 0x828   : > { %6021 = vmatmul.mubr.msk.f32.vlgmr.msra.gmra.mrb[14].mxu1 %vm625_vm2, %v6707_v50  ;;  %v1563_v51 = vsel %vm625_vm2, %v6707_v50, 0.0 }
 0x829   : > { %1564 = vadd.xlane.f32.xlu0 %v1563_v51  ;;  %6042 = vmatprep.mubr.msk.f32.mxu1 %vm359_vm1, %v1811_v3 }
 0x82a   : > { %6446 = vmatpush3.bf16.msra.mxu1 %v6443_v63 }
 0x82b   : > { %6448 = vmatprep.subr.bf16.mxu1 %v6447_v4 }
 0x82d   : > { %1561 = vadd.xlane.f32.xlu0 %v1560_v52 }
 0x82e   : > { %6450 = vmatpush3.bf16.msra.mxu1 %v6447_v4 }
 0x82f   : > { %6457 = vmatprep.subr.bf16.mxu1 %v6921_v0 }
 0x831   : > { %6043 = vmatmul.mubr.msk.f32.vlgmr.msra.gmra.mrb[16].mxu1 %vm359_vm1, %v1812_v23 }
 0x832   : > { %6459 = vmatpush3.bf16.msra.mxu1 %v6458_v25  ;;  %6064 = vmatprep.mubr.msk.f32.mxu1 %vm6922_vm0, %v6923_v1 }
 0x833   : > { %6460 = vmatprep.subr.bf16.mxu1 %v6921_v0 }
 0x836   : > { %6462 = vmatpush3.bf16.msra.mxu1 %v6461_v32 }
 0x885   : > { %v1635_v57 = vpop.f32.mrb[12].mxu0 }
 0x886   : > { %v6015_v58 = vpop.f32.mrb[13].mxu0 }
 0x8b6   : > { %v1565_v59 = vpop.xlane.xlu0 %1564 }
 0x8b7   : > { %6708 = vrcp.f32 %v1565_v59 }
 0x8ba   : > { %v1562_v10 = vpop.xlane.xlu0 %1561 }
 0x8bb   : > { %6710 = vrcp.f32 %v1562_v10 }
 0x8c1   : > { %v6709_v5 = vpop.eup %6708 }
 0x8c5   : > { %v6711_v11 = vpop.eup %6710 }
 0x8c6   : > { %v1714_v12 = vmul.f32 %v6711_v11, %v1635_v57 }
 0x8c8   : > { %v1716_v13 = vadd.f32 %v1714_v12, %v7245_v24  ;;  %v1910_v24 = vld [vmem:[#allocation7 + $0x130] sm:$0xff] }
 0x8c9   : > { %v6455_v28 = vpack.c.bf16 %v1911_v26, %v1910_v24 }
 0x8fb   : > { %v1708_v6 = vpop.f32.mrb[14].mxu1 }
 0x8fc   : > { %v1715_v7 = vmul.f32 %v6709_v5, %v1708_v6  ;;  %v6022_v8 = vpop.f32.mrb[15].mxu1 }
 0x8fe   : > { %v1717_v9 = vadd.f32 %v1715_v7, %v7258_v36 }
 0x900   : > { %1719 = vrot.lane.b32.xlu0 %v1717_v9, %s6925_s23 }
 0x904   : > { %v6044_v42 = vpop.f32.mrb[16].mxu1 }
 0x905   : > { %v1898_v43 = vpop.f32.mrb[17].mxu1  ;;  %v7302_v33 = vadd.f32 %v6044_v42, %v5564_v41 }
 0x906   : > { %v7300_v34 = vadd.f32 %v5564_v41, %v1898_v43 }
 0x908   : > { %2078 = vrot.lane.b32.xlu0 %v7300_v34, %s6924_s12 }
 0x90c   : > { %2080 = vrot.lane.b32.xlu0 %v7302_v33, %s6924_s12 }
 0x972   : > { %v1720_v14 = vpop.permute.xlu0 %1719 }
 0x973   : > { %v1722_v16 = vsel %vm625_vm2, %v1716_v13, %v1720_v14 }
 0x974   : > { %6032 = vmatmul.mubr.msk.f32.vlgmr.msra.gmra.mrb[14].mxu0 %vm359_vm1, %v1722_v16 }
 0x975   : > { %6053 = vmatprep.mubr.msk.f32.mxu0 %vm6922_vm0, %v6923_v1  ;;  %6453 = vmatpush3.bf16.msra.mxu0 %v6452_v20  ;;  %v2578_v20 = vld [vmem:[#allocation7 + $0x190] sm:$0xff] }
 0x976   : > { %6454 = vmatprep.subr.bf16.mxu0 %v6921_v0  ;;  %v6475_v24 = vpack.c.bf16 %v2579_v21, %v2578_v20 }
 0x979   : > { %6456 = vmatpush3.bf16.msra.mxu0 %v6455_v28 }
 0x97a   : > { %v7310_v44 = vpop.permute.xlu0 %2078 }
 0x97e   : > { %v7327_v53 = vpop.permute.xlu0 %2080 }
 0xa47   : > { %v1805_v36 = vpop.f32.mrb[14].mxu0 }
 0xa48   : > { %v1806_v37 = vadd.f32 %v5561_v35, %v1805_v36  ;;  %v6033_v38 = vpop.f32.mrb[15].mxu0  ;;  %v2478_v35 = vld [vmem:[#allocation7 + $0x160] sm:$0xff]  ;;  %v2479_v36 = vld [vmem:[#allocation7 + $0x168] sm:$0xff] }
 0xa49   : > { %v6463_v38 = vpack.c.bf16 %v2479_v36, %v2478_v35 }
 0xa4a   : > { %v1809_v39 = vmax.f32 %v1806_v37, 0.0  ;;  %v2480_v37 = vld [vmem:[#allocation7 + $0x170] sm:$0xff] }
 0xa4c   : > { %v7291_v40 = vadd.f32 %v1809_v39, %v1722_v16  ;;  %v2576_v16 = vld [vmem:[#allocation7 + $0x180] sm:$0xff]  ;;  %v2481_v39 = vld [vmem:[#allocation7 + $0x178] sm:$0xff] }
 0xa4d   : > { %v6472_v18 = vpack.c.bf16 %v2577_v17, %v2576_v16  ;;  %v6467_v41 = vpack.c.bf16 %v2481_v39, %v2480_v37 }
 0xa4e   : > { %6054 = vmatmul.mubr.msk.f32.vlgmr.msra.gmra.mrb[16].mxu0 %vm359_vm1, %v7291_v40  ;;  %6065 = vmatmul.mubr.msk.f32.vlgmr.msra.gmra.mrb[18].mxu1 %vm359_vm1, %v7291_v40 }
 0xa4f   : > { %6069 = vmatprep.mubr.msk.f32.mxu0 %vm625_vm2, %v7300_v34  ;;  %6074 = vmatprep.mubr.msk.f32.mxu1 %vm625_vm2, %v7310_v44 }
 0xb21   : > { %v1989_v46 = vpop.f32.mrb[16].mxu0  ;;  %v2072_v47 = vpop.f32.mrb[18].mxu1 }
 0xb22   : > { %v1990_v48 = vadd.f32 %v5568_v45, %v1989_v46  ;;  %v6055_v49 = vpop.f32.mrb[17].mxu0  ;;  %v6066_v50 = vpop.f32.mrb[19].mxu1  ;;  %v2073_v51 = vadd.f32 %v5571_v15, %v2072_v47 }
 0xb24   : > { %2085 = vrot.lane.b32.xlu1 %v1990_v48, %s6924_s12  ;;  %6067 = vmatprep.subr.msk.mxu0 %vm625_vm2, %v1990_v48 }
 0xb25   : > { %6068 = vmatpush3.xpose.msk.msra.mxu0 %vm625_vm2, %v1990_v48 }
 0xb26   : > { %6077 = vmatprep.subr.mxu0 %v2073_v51 }
 0xb28   : > { %6070 = vmatmul.mubr.msk.f32.vlgmr.msra.gmra.mrb[18].mxu0 %vm625_vm2, %v7302_v33 }
 0xb29   : > { %6078 = vmatpush3.msra.mxu0 %v2073_v51 }
 0xb2a   : > { %6464 = vmatprep.subr.bf16.mxu0 %v6463_v38 }
 0xb96   : > { %v2086_v52 = vpop.permute.xlu1 %2085 }
 0xb97   : > { %6072 = vmatprep.subr.msk.mxu1 %vm625_vm2, %v2086_v52 }
 0xb98   : > { %6073 = vmatpush3.xpose.msk.msra.mxu1 %vm625_vm2, %v2086_v52 }
 0xb9b   : > { %6075 = vmatmul.mubr.msk.f32.vlgmr.msra.gmra.mrb[20].mxu1 %vm625_vm2, %v7327_v53 }
 0xbfb   : > { %v6071_v31 = vpop.f32.mrb[18].mxu0 }
 0xbfc   : > { %v2163_v29 = vpop.f32.mrb[19].mxu0  ;;  %v2254_v61 = vmul.f32 0.17677669, %v6071_v31 }
 0xbfd   : > { %v2253_v59 = vmul.f32 0.17677669, %v2163_v29 }
 0xbfe   : > { %v2260_v63 = vsel %vm792_vm3, %v2254_v61, -inf }
 0xbff   : > { %v2257_v62 = vsel %vm792_vm3, %v2253_v59, -inf }
 0xc6e   : > { %v6076_v54 = vpop.f32.mrb[20].mxu1 }
 0xc6f   : > { %v2256_v55 = vmul.f32 0.17677669, %v6076_v54  ;;  %v2244_v56 = vpop.f32.mrb[21].mxu1 }
 0xc70   : > { %v2255_v57 = vmul.f32 0.17677669, %v2244_v56 }
 0xc71   : > { %v2266_v58 = vsel %vm792_vm3, %v2256_v55, -inf }
 0xc72   : > { %2267 = vmax.xlane.f32.xlu0 %v2266_v58  ;;  %v2263_v60 = vsel %vm792_vm3, %v2255_v57, -inf }
 0xc73   : > { %2264 = vmax.xlane.f32.xlu1 %v2263_v60 }
 0xc77   : > { %2258 = vmax.xlane.f32.xlu1 %v2257_v62 }
 0xc7b   : > { %2261 = vmax.xlane.f32.xlu1 %v2260_v63 }
 0xc88   : > { %2088 = vrot.lane.b32.xlu0 %v2073_v51, %s6924_s12 }
 0xcff   : > { %v2268_v2 = vpop.xlane.xlu0 %2267 }
 0xd00   : > { %v2272_v3 = vsub.f32 %v2256_v55, %v2268_v2  ;;  %v2265_v4 = vpop.xlane.xlu1 %2264  ;;  %v2659_v2 = vld [vmem:[#allocation7 + $0x1a0] sm:$0xff] }
 0xd01   : > { %v2271_v5 = vsub.f32 %v2255_v57, %v2265_v4  ;;  %v2753_v4 = vld [vmem:[#allocation7 + $0x1c0] sm:$0xff] }
 0xd02   : > { %v2279_v6 = vmul.f32 1.442695, %v2272_v3  ;;  %v2660_v3 = vld [vmem:[#allocation7 + $0x1a8] sm:$0xff] }
 0xd03   : > { %v2277_v7 = vmul.f32 1.442695, %v2271_v5  ;;  %v2089_v8 = vpop.permute.xlu0 %2088  ;;  %v6477_v5 = vpack.c.bf16 %v2660_v3, %v2659_v2 }
 0xd04   : > { %6082 = vmatprep.subr.mxu1 %v2089_v8  ;;  %v2259_v9 = vpop.xlane.xlu1 %2258 }
 0xd05   : > { %6712 = vpow2.f32 %v2277_v7  ;;  %v2269_v10 = vsub.f32 %v2253_v59, %v2259_v9  ;;  %6083 = vmatpush3.msra.mxu1 %v2089_v8  ;;  %v2755_v8 = vld [vmem:[#allocation7 + $0x1d0] sm:$0xff] }
 0xd06   : > { %6714 = vpow2.f32 %v2279_v6  ;;  %6471 = vmatprep.subr.bf16.mxu1 %v6921_v0  ;;  %v2754_v6 = vld [vmem:[#allocation7 + $0x1c8] sm:$0xff] }
 0xd07   : > { %v2273_v11 = vmul.f32 1.442695, %v2269_v10  ;;  %v6485_v7 = vpack.c.bf16 %v2754_v6, %v2753_v4  ;;  %v2756_v10 = vld [vmem:[#allocation7 + $0x1d8] sm:$0xff]  ;;  %v3188_v4 = vld [vmem:[#allocation7 + $0x1e0] sm:$0xff]  ;;  %v3190_v6 = vld [vmem:[#allocation7 + $0x1f0] sm:$0xff] }
 0xd08   : > { %v2262_v12 = vpop.xlane.xlu1 %2261 }
 0xd09   : > { %6716 = vpow2.f32 %v2273_v11  ;;  %v2270_v13 = vsub.f32 %v2254_v61, %v2262_v12  ;;  %v6489_v11 = vpack.c.bf16 %v2756_v10, %v2755_v8  ;;  %v5584_v12 = vld [vmem:[%s7693_s5 + $0xb] ss:$0 sm:$0xff] }
 0xd0b   : > { %v2275_v14 = vmul.f32 1.442695, %v2270_v13 }
 0xd0d   : > { %6718 = vpow2.f32 %v2275_v14 }
 0xd0f   : > { %v6713_v19 = vpop.eup %6712 }
 0xd10   : > { %v6715_v23 = vpop.eup %6714  ;;  %6084 = vmatprep.mubr.msk.f32.mxu1 %vm792_vm3, %v6713_v19  ;;  %v2287_v25 = vsel %vm792_vm3, %v6713_v19, 0.0 }
 0xd11   : > { %6085 = vmatmul.mubr.msk.f32.vlgmr.msra.gmra.mrb[22].mxu1 %vm792_vm3, %v6715_v23  ;;  %2288 = vadd.xlane.f32.xlu1 %v2287_v25  ;;  %v2290_v27 = vsel %vm792_vm3, %v6715_v23, 0.0  ;;  %v5591_v23 = vld [vmem:[%s7693_s5 + $0xd] ss:$0 sm:$0xff]  ;;  %v5595_v25 = vld [vmem:[%s7693_s5 + $0xe] ss:$0 sm:$0xff] }
 0xd12   : > { %6473 = vmatpush3.bf16.msra.mxu1 %v6472_v18  ;;  %6106 = vmatprep.mubr.msk.f32.mxu1 %vm6922_vm0, %v6923_v1 }
 0xd13   : > { %v6717_v26 = vpop.eup %6716  ;;  %6474 = vmatprep.subr.bf16.mxu1 %v6921_v0 }
 0xd14   : > { %6079 = vmatprep.mubr.msk.f32.mxu0 %vm792_vm3, %v6717_v26  ;;  %v2281_v30 = vsel %vm792_vm3, %v6717_v26, 0.0 }
 0xd15   : > { %2291 = vadd.xlane.f32.xlu1 %v2290_v27 }
 0xd16   : > { %6476 = vmatpush3.bf16.msra.mxu1 %v6475_v24 }
 0xd17   : > { %v6719_v28 = vpop.eup %6718  ;;  %6486 = vmatprep.subr.bf16.mxu1 %v6485_v7 }
 0xd18   : > { %6080 = vmatmul.mubr.msk.f32.vlgmr.msra.gmra.mrb[20].mxu0 %vm792_vm3, %v6719_v28  ;;  %v2284_v32 = vsel %vm792_vm3, %v6719_v28, 0.0 }
 0xd19   : > { %6107 = vmatmul.mubr.msk.f32.vlgmr.msra.gmra.mrb[24].mxu1 %vm359_vm1, %v7291_v40  ;;  %2282 = vadd.xlane.f32.xlu1 %v2281_v30 }
 0xd1a   : > { %6466 = vmatpush3.bf16.msra.mxu0 %v6463_v38  ;;  %6488 = vmatpush3.bf16.msra.mxu1 %v6485_v7 }
 0xd1b   : > { %6468 = vmatprep.subr.bf16.mxu0 %v6467_v41  ;;  %6490 = vmatprep.subr.bf16.mxu1 %v6489_v11 }
 0xd1d   : > { %2285 = vadd.xlane.f32.xlu1 %v2284_v32 }
 0xd1e   : > { %6470 = vmatpush3.bf16.msra.mxu0 %v6467_v41  ;;  %6492 = vmatpush3.bf16.msra.mxu1 %v6489_v11  ;;  %v3277_v11 = vld [vmem:[#allocation7 + $0x200] sm:$0xff] }
 0xd1f   : > { %6478 = vmatprep.subr.bf16.mxu0 %v6477_v5  ;;  %6497 = vmatprep.subr.bf16.mxu1 %v6921_v0 }
 0xd9e   : > { %v2289_v42 = vpop.xlane.xlu1 %2288 }
 0xda2   : > { %v2292_v43 = vpop.xlane.xlu1 %2291 }
 0xda3   : > { %6720 = vrcp.f32 %v2292_v43 }
 0xda4   : > { %6722 = vrcp.f32 %v2289_v42  ;;  %v5588_v42 = vld [vmem:[%s7693_s5 + $0xc] ss:$0 sm:$0xff] }
 0xda6   : > { %v2283_v54 = vpop.xlane.xlu1 %2282 }
 0xda7   : > { %6724 = vrcp.f32 %v2283_v54 }
 0xdaa   : > { %v2286_v55 = vpop.xlane.xlu1 %2285 }
 0xdab   : > { %6726 = vrcp.f32 %v2286_v55 }
 0xdad   : > { %v6721_v45 = vpop.eup %6720 }
 0xdae   : > { %v6723_v46 = vpop.eup %6722 }
 0xdb1   : > { %v6725_v56 = vpop.eup %6724 }
 0xdb5   : > { %v6727_v57 = vpop.eup %6726 }
 0xde4   : > { %v6086_v40 = vpop.f32.mrb[22].mxu1 }
 0xde5   : > { %v2462_v15 = vmul.f32 %v6721_v45, %v6086_v40  ;;  %v2446_v47 = vpop.f32.mrb[23].mxu1 }
 0xde6   : > { %v2461_v48 = vmul.f32 %v6723_v46, %v2446_v47 }
 0xde7   : > { %v2466_v49 = vadd.f32 %v2462_v15, %v7327_v53 }
 0xde8   : > { %v2465_v50 = vadd.f32 %v2461_v48, %v7310_v44 }
 0xde9   : > { %2471 = vrot.lane.b32.xlu1 %v2466_v49, %s6925_s23 }
 0xdea   : > { %2469 = vrot.lane.b32.xlu0 %v2465_v50, %s6925_s23 }
 0xdeb   : > { %v6081_v51 = vpop.f32.mrb[20].mxu0 }
 0xdec   : > { %v7354_v52 = vpop.f32.mrb[24].mxu1  ;;  %v2365_v31 = vpop.f32.mrb[21].mxu0  ;;  %v2460_v59 = vmul.f32 %v6727_v57, %v6081_v51 }
 0xded   : > { %v6108_v29 = vpop.f32.mrb[25].mxu1  ;;  %v2459_v58 = vmul.f32 %v6725_v56, %v2365_v31  ;;  %v7389_v43 = vadd.f32 %v5588_v42, %v7354_v52  ;;  %v3365_v42 = vld [vmem:[#allocation7 + $0x230] sm:$0xff] }
 0xdee   : > { %v2464_v60 = vadd.f32 %v2460_v59, %v7302_v33  ;;  %v2662_v33 = vld [vmem:[#allocation7 + $0x1b8] sm:$0xff] }
 0xdef   : > { %v2463_v53 = vadd.f32 %v2459_v58, %v7300_v34  ;;  %v2661_v34 = vld [vmem:[#allocation7 + $0x1b0] sm:$0xff] }
 0xdf0   : > { %v6481_v9 = vpack.c.bf16 %v2662_v33, %v2661_v34  ;;  %v3191_v34 = vld [vmem:[#allocation7 + $0x1f8] sm:$0xff] }
 0xdf1   : > { %v6511_v33 = vpack.c.bf16 %v3191_v34, %v3190_v6 }
 0xe5b   : > { %v2472_v44 = vpop.permute.xlu1 %2471 }
 0xe5c   : > { %v2470_v61 = vpop.permute.xlu0 %2469  ;;  %v2476_v63 = vsel %vm625_vm2, %v2464_v60, %v2472_v44 }
 0xe5d   : > { %v2475_v62 = vsel %vm625_vm2, %v2463_v53, %v2470_v61 }
 0xe5e   : > { %6095 = vmatprep.mubr.msk.f32.mxu0 %vm359_vm1, %v2475_v62 }
 0xe5f   : > { %6096 = vmatmul.mubr.msk.f32.vlgmr.msra.gmra.mrb[22].mxu0 %vm359_vm1, %v2476_v63 }
 0xe60   : > { %6480 = vmatpush3.bf16.msra.mxu0 %v6477_v5  ;;  %v3189_v5 = vld [vmem:[#allocation7 + $0x1e8] sm:$0xff] }
 0xe61   : > { %6482 = vmatprep.subr.bf16.mxu0 %v6481_v9  ;;  %v6508_v7 = vpack.c.bf16 %v3189_v5, %v3188_v4 }
 0xe64   : > { %6484 = vmatpush3.bf16.msra.mxu0 %v6481_v9 }
 0xe65   : > { %6493 = vmatprep.subr.bf16.mxu0 %v6921_v0 }
 0xf32   : > { %v6097_v13 = vpop.f32.mrb[22].mxu0 }
 0xf33   : > { %v2568_v14 = vadd.f32 %v6097_v13, %v5584_v12  ;;  %v2562_v16 = vpop.f32.mrb[23].mxu0  ;;  %v3279_v13 = vld [vmem:[#allocation7 + $0x210] sm:$0xff] }
 0xf34   : > { %v2563_v17 = vadd.f32 %v5584_v12, %v2562_v16  ;;  %v3278_v12 = vld [vmem:[#allocation7 + $0x208] sm:$0xff]  ;;  %v3280_v16 = vld [vmem:[#allocation7 + $0x218] sm:$0xff] }
 0xf35   : > { %v2572_v18 = vmax.f32 %v2568_v14, 0.0  ;;  %v6514_v14 = vpack.c.bf16 %v3278_v12, %v3277_v11 }
 0xf36   : > { %v2571_v19 = vmax.f32 %v2563_v17, 0.0  ;;  %v6517_v17 = vpack.c.bf16 %v3280_v16, %v3279_v13 }
 0xf37   : > { %v2574_v21 = vadd.f32 %v2572_v18, %v2476_v63 }
 0xf38   : > { %v2573_v20 = vadd.f32 %v2571_v19, %v2475_v62 }
 0xf3a   : > { %6117 = vmatprep.mubr.msk.f32.mxu0 %vm359_vm1, %v2573_v20  ;;  %6128 = vmatprep.mubr.msk.f32.mxu1 %vm359_vm1, %v2573_v20 }
 0xf3b   : > { %6118 = vmatmul.mubr.msk.f32.vlgmr.msra.gmra.mrb[24].mxu0 %vm359_vm1, %v2574_v21  ;;  %6129 = vmatmul.mubr.msk.f32.vlgmr.msra.gmra.mrb[26].mxu1 %vm359_vm1, %v2574_v21 }
 0xf3c   : > { %6135 = vmatprep.mubr.msk.f32.mxu0 %vm6922_vm0, %v6923_v1  ;;  %6142 = vmatprep.mubr.msk.f32.mxu1 %vm6922_vm0, %v6923_v1 }
0x100e   : > { %v6119_v24 = vpop.f32.mrb[24].mxu0  ;;  %v6130_v26 = vpop.f32.mrb[26].mxu1 }
0x100f   : > { %v2749_v27 = vadd.f32 %v6119_v24, %v5591_v23  ;;  %v2837_v28 = vadd.f32 %v6130_v26, %v5595_v25  ;;  %v2743_v30 = vpop.f32.mrb[25].mxu0  ;;  %v2831_v32 = vpop.f32.mrb[27].mxu1 }
0x1010   : > { %v2744_v35 = vadd.f32 %v5591_v23, %v2743_v30  ;;  %v2832_v36 = vadd.f32 %v5595_v25, %v2831_v32  ;;  %v3363_v32 = vld [vmem:[#allocation7 + $0x220] sm:$0xff] }
0x1012   : > { %v6678_v37 = vpack.i.bf16 %v2749_v27, %v2744_v35  ;;  %v6494_v38 = vpack.c.bf16 %v2749_v27, %v2744_v35  ;;  %v6683_v39 = vpack.i.bf16 %v2837_v28, %v2832_v36  ;;  %v6502_v41 = vpack.c.bf16 %v2837_v28, %v2832_v36  ;;  %v3364_v35 = vld [vmem:[#allocation7 + $0x228] sm:$0xff]  ;;  %v3449_v36 = vld [vmem:[#allocation7 + $0x240] sm:$0xff] }
0x1014   : > { %6684 = vrot.lane.b32.xlu1 %v6683_v39, %s6924_s12  ;;  %6679 = vrot.lane.b32.xlu0 %v6678_v37, %s6924_s12  ;;  %v6520_v37 = vpack.c.bf16 %v3364_v35, %v3363_v32  ;;  %v3275_v39 = vld [vmem:[%s7691_s3] sm:$0xf]  ;;  %v3958_v32 = vld [vmem:[#allocation7 + $0x288] sm:$0xff] }
0x1015   : > { %6496 = vmatpush3.bf16.xpose.msk.msra.mxu0 %vm7234_vm4, %v6494_v38  ;;  %v3450_v38 = vld [vmem:[#allocation7 + $0x248] sm:$0xff] }
0x1016   : > { %6501 = vmatprep.subr.bf16.mxu0 %v6921_v0 }
0x1018   : > { %2841 = vrot.lane.b32.xlu0 %v7389_v43, %s6924_s12 }
0x101c   : > { %6136 = vmatmul.mubr.msk.f32.vlgmr.msra.gmra.mrb[26].mxu0 %vm625_vm2, %v7389_v43 }
0x101d   : > { %6503 = vmatpush3.bf16.msra.mxu0 %v6502_v41  ;;  %6149 = vmatprep.mubr.msk.f32.mxu0 %vm6922_vm0, %v6923_v1  ;;  %v6526_v41 = vpack.c.bf16 %v3450_v38, %v3449_v36 }
0x101e   : > { %6507 = vmatprep.subr.bf16.mxu0 %v6921_v0 }
0x1086   : > { %v6680_v45 = vpop.permute.xlu0 %6679  ;;  %v6685_v47 = vpop.permute.xlu1 %6684 }
0x1087   : > { %v6682_v40 = vunpack.i.h.bf16 %v6680_v45  ;;  %v6681_v46 = vunpack.i.l.bf16 %v6680_v45  ;;  %v6687_v48 = vunpack.i.h.bf16 %v6685_v47  ;;  %v6686_v49 = vunpack.i.l.bf16 %v6685_v47  ;;  %v3451_v45 = vld [vmem:[#allocation7 + $0x250] sm:$0xff]  ;;  %v5607_v47 = vld [vmem:[%s7693_s5 + $0xf] ss:$0 sm:$0xff] }
0x1089   : > { %v6498_v15 = vpack.c.bf16 %v6682_v40, %v6681_v46  ;;  %v6505_v50 = vpack.c.bf16 %v6687_v48, %v6686_v49  ;;  %v3452_v46 = vld [vmem:[#allocation7 + $0x258] sm:$0xff] }
0x108a   : > { %v2842_v51 = vpop.permute.xlu0 %2841 }
0x108b   : > { %6500 = vmatpush3.bf16.xpose.msk.msra.mxu1 %vm7234_vm4, %v6498_v15  ;;  %v6529_v15 = vpack.c.bf16 %v3452_v46, %v3451_v45 }
0x108c   : > { %6504 = vmatprep.subr.bf16.mxu1 %v6921_v0 }
0x1092   : > { %6143 = vmatmul.mubr.msk.f32.vlgmr.msra.gmra.mrb[28].mxu1 %vm625_vm2, %v2842_v51 }
0x1093   : > { %6506 = vmatpush3.bf16.msra.mxu1 %v6505_v50  ;;  %6156 = vmatprep.mubr.msk.f32.mxu1 %vm6922_vm0, %v6923_v1 }
0x1094   : > { %6513 = vmatprep.subr.bf16.mxu1 %v6921_v0 }
0x10ef   : > { %v2930_v52 = vpop.f32.mrb[26].mxu0 }
0x10f0   : > { %v3010_v31 = vmul.f32 0.17677669, %v2930_v52  ;;  %v6137_v29 = vpop.f32.mrb[27].mxu0 }
0x10f2   : > { %v3012_v22 = vsel %vm625_vm2, %v3010_v31, -inf }
0x10f3   : > { %3013 = vmax.xlane.f32.xlu1 %v3012_v22 }
0x1165   : > { %v3006_v54 = vpop.f32.mrb[28].mxu1 }
0x1166   : > { %v3011_v55 = vmul.f32 0.17677669, %v3006_v54  ;;  %v6144_v56 = vpop.f32.mrb[29].mxu1 }
0x1168   : > { %v3015_v57 = vsel %vm625_vm2, %v3011_v55, -inf }
0x1169   : > { %3016 = vmax.xlane.f32.xlu0 %v3015_v57 }
0x1180   : > { %v3014_v58 = vpop.xlane.xlu1 %3013 }
0x1181   : > { %v3018_v59 = vsub.f32 %v3010_v31, %v3014_v58  ;;  %v5610_v31 = vld [vmem:[%s7693_s5 + $0x10] ss:$0 sm:$0xff] }
0x1183   : > { %v3020_v53 = vmul.f32 1.442695, %v3018_v59 }
0x1185   : > { %6728 = vpow2.f32 %v3020_v53 }
0x118f   : > { %v6729_v44 = vpop.eup %6728 }
0x1190   : > { %6150 = vmatmul.mubr.msk.f32.vlgmr.msra.gmra.mrb[28].mxu0 %vm625_vm2, %v6729_v44  ;;  %v3024_v3 = vsel %vm625_vm2, %v6729_v44, 0.0  ;;  %v5616_v44 = vld [vmem:[%s7693_s5 + $0x12] ss:$0 sm:$0xff] }
0x1191   : > { %6167 = vmatprep.mubr.msk.f32.mxu0 %vm6922_vm0, %v6923_v1  ;;  %6509 = vmatpush3.bf16.msra.mxu0 %v6508_v7 }
0x1192   : > { %6510 = vmatprep.subr.bf16.mxu0 %v6921_v0 }
0x1195   : > { %6512 = vmatpush3.bf16.msra.mxu0 %v6511_v33 }
0x1196   : > { %6519 = vmatprep.subr.bf16.mxu0 %v6921_v0 }
0x11f6   : > { %v3017_v60 = vpop.xlane.xlu0 %3016 }
0x11f7   : > { %v3019_v61 = vsub.f32 %v3011_v55, %v3017_v60  ;;  %v5613_v55 = vld [vmem:[%s7693_s5 + $0x11] ss:$0 sm:$0xff] }
0x11f9   : > { %v3022_v62 = vmul.f32 1.442695, %v3019_v61 }
0x11fb   : > { %6730 = vpow2.f32 %v3022_v62 }
0x1205   : > { %v6731_v63 = vpop.eup %6730 }
0x1206   : > { %6157 = vmatmul.mubr.msk.f32.vlgmr.msra.gmra.mrb[30].mxu1 %vm625_vm2, %v6731_v63  ;;  %v3027_v2 = vsel %vm625_vm2, %v6731_v63, 0.0 }
0x1207   : > { %3028 = vadd.xlane.f32.xlu0 %v3027_v2  ;;  %6178 = vmatprep.mubr.msk.f32.mxu1 %vm6922_vm0, %v6923_v1 }
0x1208   : > { %6515 = vmatpush3.bf16.msra.mxu1 %v6514_v14 }
0x1209   : > { %6516 = vmatprep.subr.bf16.mxu1 %v6921_v0 }
0x120b   : > { %3025 = vadd.xlane.f32.xlu0 %v3024_v3 }
0x120c   : > { %6518 = vmatpush3.bf16.msra.mxu1 %v6517_v17 }
0x120d   : > { %6525 = vmatprep.subr.bf16.mxu1 %v6921_v0 }
0x120f   : > { %6179 = vmatmul.mubr.msk.f32.vlgmr.msra.gmra.mrb[32].mxu1 %vm359_vm1, %v3275_v39 }
0x1210   : > { %6527 = vmatpush3.bf16.msra.mxu1 %v6526_v41  ;;  %6200 = vmatprep.mubr.msk.f32.mxu1 %vm6922_vm0, %v6923_v1 }
0x1211   : > { %6528 = vmatprep.subr.bf16.mxu1 %v6921_v0 }
0x1214   : > { %6530 = vmatpush3.bf16.msra.mxu1 %v6529_v15 }
0x1215   : > { %6208 = vmatprep.subr.mxu1 %v6923_v1 }
0x1263   : > { %v3099_v8 = vpop.f32.mrb[28].mxu0 }
0x1264   : > { %v6151_v9 = vpop.f32.mrb[29].mxu0 }
0x1294   : > { %v3029_v10 = vpop.xlane.xlu0 %3028 }
0x1295   : > { %6732 = vrcp.f32 %v3029_v10 }
0x1298   : > { %v3026_v25 = vpop.xlane.xlu0 %3025 }
0x1299   : > { %6734 = vrcp.f32 %v3026_v25  ;;  %v3872_v25 = vld [vmem:[#allocation7 + $0x278] sm:$0xff] }
0x129f   : > { %v6733_v18 = vpop.eup %6732 }
0x12a3   : > { %v6735_v24 = vpop.eup %6734 }
0x12a4   : > { %v3178_v26 = vmul.f32 %v6735_v24, %v3099_v8 }
0x12a6   : > { %v3180_v27 = vadd.f32 %v3178_v26, %v7389_v43  ;;  %v3366_v43 = vld [vmem:[#allocation7 + $0x238] sm:$0xff] }
0x12a7   : > { %v6523_v40 = vpack.c.bf16 %v3366_v43, %v3365_v42 }
0x12d9   : > { %v3172_v19 = vpop.f32.mrb[30].mxu1 }
0x12da   : > { %v3179_v20 = vmul.f32 %v6733_v18, %v3172_v19  ;;  %v6158_v21 = vpop.f32.mrb[31].mxu1  ;;  %v3869_v19 = vld [vmem:[#allocation7 + $0x260] sm:$0xff] }
0x12db   : > { %v3871_v21 = vld [vmem:[#allocation7 + $0x270] sm:$0xff] }
0x12dc   : > { %v3181_v23 = vadd.f32 %v3179_v20, %v2842_v51  ;;  %v3870_v20 = vld [vmem:[#allocation7 + $0x268] sm:$0xff]  ;;  %v6535_v24 = vpack.c.bf16 %v3872_v25, %v3871_v21 }
0x12de   : > { %3183 = vrot.lane.b32.xlu0 %v3181_v23, %s6925_s23  ;;  %v6532_v23 = vpack.c.bf16 %v3870_v20, %v3869_v19 }
0x12e2   : > { %v3358_v29 = vpop.f32.mrb[32].mxu1 }
0x12e3   : > { %v7448_v22 = vadd.f32 %v5610_v31, %v3358_v29  ;;  %v6180_v54 = vpop.f32.mrb[33].mxu1  ;;  %v4045_v31 = vld [vmem:[#allocation7 + $0x2b0] sm:$0xff]  ;;  %v4046_v29 = vld [vmem:[#allocation7 + $0x2b8] sm:$0xff] }
0x12e4   : > { %v5625_v54 = vld [vmem:[%s7693_s5 + $0x13] ss:$0 sm:$0xff] }
0x12e5   : > { %3532 = vrot.lane.b32.xlu0 %v7448_v22, %s6924_s12 }
0x1350   : > { %v3184_v28 = vpop.permute.xlu0 %3183 }
0x1351   : > { %v3186_v30 = vsel %vm625_vm2, %v3180_v27, %v3184_v28 }
0x1352   : > { %6168 = vmatmul.mubr.msk.f32.vlgmr.msra.gmra.mrb[30].mxu0 %vm359_vm1, %v3186_v30 }
0x1353   : > { %6189 = vmatprep.mubr.msk.f32.mxu0 %vm6922_vm0, %v6923_v1  ;;  %6521 = vmatpush3.bf16.msra.mxu0 %v6520_v37 }
0x1354   : > { %6522 = vmatprep.subr.bf16.mxu0 %v6921_v0 }
0x1357   : > { %6524 = vmatpush3.bf16.msra.mxu0 %v6523_v40  ;;  %v3533_v62 = vpop.permute.xlu0 %3532 }
0x1358   : > { %6203 = vmatprep.subr.mxu0 %v6923_v1 }
0x1425   : > { %v3269_v48 = vpop.f32.mrb[30].mxu0 }
0x1426   : > { %v3270_v49 = vadd.f32 %v5607_v47, %v3269_v48  ;;  %v6169_v50 = vpop.f32.mrb[31].mxu0  ;;  %v4043_v47 = vld [vmem:[#allocation7 + $0x2a0] sm:$0xff]  ;;  %v4044_v48 = vld [vmem:[#allocation7 + $0x2a8] sm:$0xff] }
0x1427   : > { %v3959_v50 = vld [vmem:[#allocation7 + $0x290] sm:$0xff] }
0x1428   : > { %v3273_v51 = vmax.f32 %v3270_v49, 0.0  ;;  %v6544_v49 = vpack.c.bf16 %v4044_v48, %v4043_v47  ;;  %v4639_v48 = vld [vmem:[#allocation7 + $0x300] sm:$0xff] }
0x142a   : > { %v3274_v52 = vadd.f32 %v3273_v51, %v3186_v30  ;;  %v3957_v30 = vld [vmem:[#allocation7 + $0x280] sm:$0xff]  ;;  %v3960_v51 = vld [vmem:[#allocation7 + $0x298] sm:$0xff] }
0x142b   : > { %v6538_v35 = vpack.c.bf16 %v3958_v32, %v3957_v30 }
0x142c   : > { %6190 = vmatmul.mubr.msk.f32.vlgmr.msra.gmra.mrb[32].mxu0 %vm359_vm1, %v3274_v52  ;;  %6201 = vmatmul.mubr.msk.f32.vlgmr.msra.gmra.mrb[34].mxu1 %vm359_vm1, %v3274_v52  ;;  %v6541_v52 = vpack.c.bf16 %v3960_v51, %v3959_v50 }
0x142d   : > { %6205 = vmatprep.mubr.msk.f32.mxu0 %vm6922_vm0, %v6923_v1  ;;  %6210 = vmatprep.mubr.msk.f32.mxu1 %vm6922_vm0, %v6923_v1 }
0x14ff   : > { %v3444_v56 = vpop.f32.mrb[32].mxu0  ;;  %v3527_v57 = vpop.f32.mrb[34].mxu1 }
0x1500   : > { %v3445_v58 = vadd.f32 %v5613_v55, %v3444_v56  ;;  %v6191_v59 = vpop.f32.mrb[33].mxu0  ;;  %v6202_v53 = vpop.f32.mrb[35].mxu1  ;;  %v3528_v60 = vadd.f32 %v5616_v44, %v3527_v57 }
0x1501   : > { %v4127_v59 = vld [vmem:[#allocation7 + $0x2c8] sm:$0xff] }
0x1502   : > { %3536 = vrot.lane.b32.xlu1 %v3445_v58, %s6924_s12  ;;  %6204 = vmatpush3.xpose.msk.msra.mxu0 %vm625_vm2, %v3445_v58  ;;  %v4126_v58 = vld [vmem:[#allocation7 + $0x2c0] sm:$0xff] }
0x1503   : > { %6213 = vmatprep.subr.mxu0 %v6923_v1  ;;  %v6550_v44 = vpack.c.bf16 %v4127_v59, %v4126_v58 }
0x1505   : > { %6206 = vmatmul.mubr.msk.f32.vlgmr.msra.gmra.mrb[34].mxu0 %vm625_vm2, %v7448_v22 }
0x1506   : > { %3539 = vrot.lane.b32.xlu1 %v3528_v60, %s6924_s12  ;;  %6214 = vmatpush3.msra.mxu0 %v3528_v60 }
0x1507   : > { %6215 = vmatprep.mubr.msk.f32.mxu0 %vm6922_vm0, %v6923_v1  ;;  %6531 = vmatprep.subr.bf16.mxu0 %v6921_v0 }
0x1574   : > { %v3537_v61 = vpop.permute.xlu1 %3536 }
0x1575   : > { %6209 = vmatpush3.xpose.msk.msra.mxu1 %vm625_vm2, %v3537_v61  ;;  %v4128_v61 = vld [vmem:[#allocation7 + $0x2d0] sm:$0xff] }
0x1576   : > { %6218 = vmatprep.subr.mxu1 %v6923_v1 }
0x1578   : > { %6211 = vmatmul.mubr.msk.f32.vlgmr.msra.gmra.mrb[36].mxu1 %vm625_vm2, %v3533_v62  ;;  %v3540_v63 = vpop.permute.xlu1 %3539 }
0x1579   : > { %6219 = vmatpush3.msra.mxu1 %v3540_v63  ;;  %6220 = vmatprep.mubr.msk.f32.mxu1 %vm6922_vm0, %v6923_v1 }
0x157a   : > { %6537 = vmatprep.subr.bf16.mxu1 %v6921_v0 }
0x15d8   : > { %v3612_v2 = vpop.f32.mrb[34].mxu0 }
0x15d9   : > { %v3690_v3 = vmul.f32 0.17677669, %v3612_v2  ;;  %v6207_v4 = vpop.f32.mrb[35].mxu0  ;;  %v5631_v2 = vld [vmem:[%s7693_s5 + $0x15] ss:$0 sm:$0xff] }
0x15db   : > { %v3693_v5 = vsel %vm3692_vm5, %v3690_v3, -inf }
0x15dc   : > { %3694 = vmax.xlane.f32.xlu1 %v3693_v5  ;;  %v5628_v5 = vld [vmem:[%s7693_s5 + $0x14] ss:$0 sm:$0xff] }
0x164b   : > { %v3686_v6 = vpop.f32.mrb[36].mxu1 }
0x164c   : > { %v3691_v7 = vmul.f32 0.17677669, %v3686_v6  ;;  %v6212_v34 = vpop.f32.mrb[37].mxu1 }
0x164e   : > { %v3696_v33 = vsel %vm3692_vm5, %v3691_v7, -inf }
0x164f   : > { %3697 = vmax.xlane.f32.xlu0 %v3696_v33 }
0x1669   : > { %v3695_v8 = vpop.xlane.xlu1 %3694 }
0x166a   : > { %v3699_v9 = vsub.f32 %v3690_v3, %v3695_v8  ;;  %v5634_v8 = vld [vmem:[%s7693_s5 + $0x16] ss:$0 sm:$0xff] }
0x166c   : > { %v3701_v10 = vmul.f32 1.442695, %v3699_v9 }
0x166e   : > { %6736 = vpow2.f32 %v3701_v10 }
0x1678   : > { %v6737_v11 = vpop.eup %6736 }
0x1679   : > { %6216 = vmatmul.mubr.msk.f32.vlgmr.msra.gmra.mrb[36].mxu0 %vm792_vm3, %v6737_v11  ;;  %v3705_v18 = vsel %vm3692_vm5, %v6737_v11, 0.0 }
0x167a   : > { %6231 = vmatprep.mubr.msk.f32.mxu0 %vm6922_vm0, %v6923_v1  ;;  %6533 = vmatpush3.bf16.msra.mxu0 %v6532_v23 }
0x167b   : > { %6534 = vmatprep.subr.bf16.mxu0 %v6921_v0 }
0x167e   : > { %6536 = vmatpush3.bf16.msra.mxu0 %v6535_v24 }
0x167f   : > { %6543 = vmatprep.subr.bf16.mxu0 %v6921_v0 }
0x16dc   : > { %v3698_v12 = vpop.xlane.xlu0 %3697 }
0x16dd   : > { %v3700_v13 = vsub.f32 %v3691_v7, %v3698_v12 }
0x16df   : > { %v3703_v14 = vmul.f32 1.442695, %v3700_v13 }
0x16e1   : > { %6738 = vpow2.f32 %v3703_v14 }
0x16eb   : > { %v6739_v16 = vpop.eup %6738 }
0x16ec   : > { %6221 = vmatmul.mubr.msk.f32.vlgmr.msra.gmra.mrb[38].mxu1 %vm792_vm3, %v6739_v16  ;;  %v3708_v17 = vsel %vm3692_vm5, %v6739_v16, 0.0 }
0x16ed   : > { %3709 = vadd.xlane.f32.xlu0 %v3708_v17  ;;  %6242 = vmatprep.mubr.msk.f32.mxu1 %vm6922_vm0, %v6923_v1 }
0x16ee   : > { %6539 = vmatpush3.bf16.msra.mxu1 %v6538_v35 }
0x16ef   : > { %6540 = vmatprep.subr.bf16.mxu1 %v6921_v0 }
0x16f1   : > { %3706 = vadd.xlane.f32.xlu0 %v3705_v18 }
0x16f2   : > { %6542 = vmatpush3.bf16.msra.mxu1 %v6541_v52 }
0x16f3   : > { %6549 = vmatprep.subr.bf16.mxu1 %v6921_v0 }
0x174c   : > { %v3780_v26 = vpop.f32.mrb[36].mxu0 }
0x174d   : > { %v6217_v27 = vpop.f32.mrb[37].mxu0 }
0x177a   : > { %v3710_v28 = vpop.xlane.xlu0 %3709 }
0x177b   : > { %6740 = vrcp.f32 %v3710_v28 }
0x177e   : > { %v3707_v42 = vpop.xlane.xlu0 %3706 }
0x177f   : > { %6742 = vrcp.f32 %v3707_v42  ;;  %v4553_v42 = vld [vmem:[#allocation7 + $0x2f0] sm:$0xff] }
0x1785   : > { %v6741_v36 = vpop.eup %6740 }
0x1789   : > { %v6743_v43 = vpop.eup %6742 }
0x178a   : > { %v3859_v45 = vmul.f32 %v6743_v43, %v3780_v26 }
0x178c   : > { %v3861_v40 = vadd.f32 %v3859_v45, %v7448_v22  ;;  %v6547_v22 = vpack.c.bf16 %v4046_v29, %v4045_v31  ;;  %v4554_v45 = vld [vmem:[#allocation7 + $0x2f8] sm:$0xff] }
0x17bf   : > { %v3853_v37 = vpop.f32.mrb[38].mxu1 }
0x17c0   : > { %v3860_v38 = vmul.f32 %v6741_v36, %v3853_v37  ;;  %v6222_v39 = vpop.f32.mrb[39].mxu1 }
0x17c1   : > { %v4551_v39 = vld [vmem:[#allocation7 + $0x2e0] sm:$0xff] }
0x17c2   : > { %v3862_v41 = vadd.f32 %v3860_v38, %v3533_v62  ;;  %v4129_v62 = vld [vmem:[#allocation7 + $0x2d8] sm:$0xff] }
0x17c3   : > { %v6553_v63 = vpack.c.bf16 %v4129_v62, %v4128_v61  ;;  %v4641_v61 = vld [vmem:[#allocation7 + $0x310] sm:$0xff]  ;;  %v4642_v62 = vld [vmem:[#allocation7 + $0x318] sm:$0xff] }
0x17c4   : > { %3864 = vrot.lane.b32.xlu0 %v3862_v41, %s6925_s23  ;;  %v4552_v41 = vld [vmem:[#allocation7 + $0x2e8] sm:$0xff] }
0x17c5   : > { %v6556_v43 = vpack.c.bf16 %v4552_v41, %v4551_v39 }
0x1836   : > { %v3865_v46 = vpop.permute.xlu0 %3864 }
0x1837   : > { %v3867_v15 = vsel %vm625_vm2, %v3861_v40, %v3865_v46  ;;  %v6559_v40 = vpack.c.bf16 %v4554_v45, %v4553_v42 }
0x1838   : > { %6232 = vmatmul.mubr.msk.f32.vlgmr.msra.gmra.mrb[38].mxu0 %vm359_vm1, %v3867_v15 }
0x1839   : > { %6253 = vmatprep.mubr.msk.f32.mxu0 %vm6922_vm0, %v6923_v1  ;;  %6545 = vmatpush3.bf16.msra.mxu0 %v6544_v49  ;;  %v4640_v49 = vld [vmem:[#allocation7 + $0x308] sm:$0xff] }
0x183a   : > { %6546 = vmatprep.subr.bf16.mxu0 %v6921_v0  ;;  %v6562_v50 = vpack.c.bf16 %v4640_v49, %v4639_v48 }
0x183d   : > { %6548 = vmatpush3.bf16.msra.mxu0 %v6547_v22 }
0x183e   : > { %6267 = vmatprep.subr.mxu0 %v6923_v1 }
0x190b   : > { %v3950_v55 = vpop.f32.mrb[38].mxu0 }
0x190c   : > { %v3951_v56 = vadd.f32 %v5625_v54, %v3950_v55  ;;  %v6233_v57 = vpop.f32.mrb[39].mxu0 }
0x190e   : > { %v3954_v53 = vmax.f32 %v3951_v56, 0.0 }
0x1910   : > { %v3955_v60 = vadd.f32 %v3954_v53, %v3867_v15  ;;  %v4725_v53 = vld [vmem:[#allocation7 + $0x320] sm:$0xff] }
0x1912   : > { %6243 = vmatmul.mubr.msk.f32.vlgmr.msra.gmra.mrb[40].mxu1 %vm359_vm1, %v3955_v60  ;;  %6254 = vmatmul.mubr.msk.f32.vlgmr.msra.gmra.mrb[40].mxu0 %vm359_vm1, %v3955_v60 }
0x1913   : > { %6551 = vmatpush3.bf16.msra.mxu1 %v6550_v44  ;;  %6264 = vmatprep.mubr.msk.f32.mxu1 %vm6922_vm0, %v6923_v1  ;;  %v4726_v44 = vld [vmem:[#allocation7 + $0x328] sm:$0xff] }
0x1914   : > { %6552 = vmatprep.subr.bf16.mxu1 %v6921_v0  ;;  %6269 = vmatprep.mubr.msk.f32.mxu0 %vm6922_vm0, %v6923_v1 }
0x1917   : > { %6554 = vmatpush3.bf16.msra.mxu1 %v6553_v63  ;;  %v6565_v63 = vpack.c.bf16 %v4642_v62, %v4641_v61 }
0x1918   : > { %6272 = vmatprep.subr.mxu1 %v6923_v1 }
0x191a   : > { %6265 = vmatmul.mubr.msk.f32.vlgmr.msra.gmra.mrb[42].mxu1 %vm359_vm1, %v3955_v60  ;;  %v6568_v60 = vpack.c.bf16 %v4726_v44, %v4725_v53 }
0x191b   : > { %6274 = vmatprep.mubr.msk.f32.mxu1 %vm6922_vm0, %v6923_v1 }
0x19e5   : > { %v4038_v3 = vpop.f32.mrb[40].mxu1  ;;  %v4121_v4 = vpop.f32.mrb[40].mxu0 }
0x19e6   : > { %v4122_v6 = vadd.f32 %v5631_v2, %v4121_v4  ;;  %v6244_v7 = vpop.f32.mrb[41].mxu1  ;;  %v6255_v34 = vpop.f32.mrb[41].mxu0  ;;  %v7517_v33 = vadd.f32 %v5628_v5, %v4038_v3  ;;  %v4727_v2 = vld [vmem:[#allocation7 + $0x330] sm:$0xff]  ;;  %v4728_v3 = vld [vmem:[#allocation7 + $0x338] sm:$0xff] }
0x19e7   : > { %v6571_v4 = vpack.c.bf16 %v4728_v3, %v4727_v2  ;;  %v5645_v5 = vld [vmem:[%s7693_s5 + $0x17] ss:$0 sm:$0xff] }
0x19e8   : > { %4213 = vrot.lane.b32.xlu1 %v4122_v6, %s6924_s12  ;;  %6268 = vmatpush3.xpose.msk.msra.mxu0 %vm625_vm2, %v4122_v6 }
0x19e9   : > { %6277 = vmatprep.subr.mxu0 %v6923_v1 }
0x19eb   : > { %6270 = vmatmul.mubr.msk.f32.vlgmr.msra.gmra.mrb[42].mxu0 %vm625_vm2, %v7517_v33 }
0x19ec   : > { %4209 = vrot.lane.b32.xlu1 %v7517_v33, %s6924_s12  ;;  %6279 = vmatprep.mubr.msk.f32.mxu0 %vm6922_vm0, %v6923_v1 }
0x19ed   : > { %v4204_v9 = vpop.f32.mrb[42].mxu1 }
0x19ee   : > { %v4205_v10 = vadd.f32 %v5634_v8, %v4204_v9  ;;  %v6266_v11 = vpop.f32.mrb[43].mxu1  ;;  %v4809_v8 = vld [vmem:[#allocation7 + $0x348] sm:$0xff] }
0x19f0   : > { %6278 = vmatpush3.msk.msra.mxu0 %vm4391_vm6, %v4205_v10  ;;  %4216 = vrot.lane.b32.xlu1 %v4205_v10, %s6924_s12 }
0x19f1   : > { %6555 = vmatprep.subr.bf16.mxu0 %v6921_v0 }
0x1a5a   : > { %v4214_v12 = vpop.permute.xlu1 %4213 }
0x1a5b   : > { %6273 = vmatpush3.xpose.msk.msra.mxu1 %vm625_vm2, %v4214_v12  ;;  %v4810_v12 = vld [vmem:[#allocation7 + $0x350] sm:$0xff] }
0x1a5c   : > { %6282 = vmatprep.subr.mxu1 %v6923_v1 }
0x1a5e   : > { %v4210_v13 = vpop.permute.xlu1 %4209 }
0x1a5f   : > { %6275 = vmatmul.mubr.msk.f32.vlgmr.msra.gmra.mrb[44].mxu1 %vm625_vm2, %v4210_v13 }
0x1a60   : > { %6284 = vmatprep.mubr.msk.f32.mxu1 %vm6922_vm0, %v6923_v1 }
0x1a62   : > { %v4217_v14 = vpop.permute.xlu1 %4216 }
0x1a63   : > { %6283 = vmatpush3.msk.msra.mxu1 %vm4391_vm6, %v4217_v14 }
0x1a64   : > { %6561 = vmatprep.subr.bf16.mxu1 %v6921_v0 }
0x1abe   : > { %v4288_v16 = vpop.f32.mrb[42].mxu0 }
0x1abf   : > { %v4366_v17 = vmul.f32 0.17677669, %v4288_v16  ;;  %v6271_v18 = vpop.f32.mrb[43].mxu0  ;;  %v5651_v16 = vld [vmem:[%s7693_s5 + $0x19] ss:$0 sm:$0xff] }
0x1ac1   : > { %v4369_v19 = vsel %vm4368_vm7, %v4366_v17, -inf }
0x1ac2   : > { %4370 = vmax.xlane.f32.xlu1 %v4369_v19  ;;  %v5648_v19 = vld [vmem:[%s7693_s5 + $0x18] ss:$0 sm:$0xff] }
0x1b32   : > { %v4362_v20 = vpop.f32.mrb[44].mxu1 }
0x1b33   : > { %v4367_v21 = vmul.f32 0.17677669, %v4362_v20  ;;  %v6276_v23 = vpop.f32.mrb[45].mxu1 }
0x1b35   : > { %v4372_v25 = vsel %vm4368_vm7, %v4367_v21, -inf }
0x1b36   : > { %4373 = vmax.xlane.f32.xlu0 %v4372_v25 }
0x1b4f   : > { %v4371_v24 = vpop.xlane.xlu1 %4370 }
0x1b50   : > { %v4375_v26 = vsub.f32 %v4366_v17, %v4371_v24  ;;  %v5654_v24 = vld [vmem:[%s7693_s5 + $0x1a] ss:$0 sm:$0xff] }
0x1b52   : > { %v4377_v27 = vmul.f32 1.442695, %v4375_v26 }
0x1b54   : > { %6744 = vpow2.f32 %v4377_v27 }
0x1b5e   : > { %v6745_v28 = vpop.eup %6744 }
0x1b5f   : > { %6280 = vmatmul.mubr.msk.f32.vlgmr.msra.gmra.mrb[44].mxu0 %vm4387_vm8, %v6745_v28  ;;  %v4381_v38 = vsel %vm4368_vm7, %v6745_v28, 0.0 }
0x1b60   : > { %6295 = vmatprep.mubr.msk.f32.mxu0 %vm6922_vm0, %v6923_v1  ;;  %6557 = vmatpush3.bf16.msra.mxu0 %v6556_v43 }
0x1b61   : > { %6558 = vmatprep.subr.bf16.mxu0 %v6921_v0 }
0x1b64   : > { %6560 = vmatpush3.bf16.msra.mxu0 %v6559_v40 }
0x1b65   : > { %6567 = vmatprep.subr.bf16.mxu0 %v6921_v0 }
0x1bc3   : > { %v4374_v30 = vpop.xlane.xlu0 %4373 }
0x1bc4   : > { %v4376_v32 = vsub.f32 %v4367_v21, %v4374_v30 }
0x1bc6   : > { %v4379_v35 = vmul.f32 1.442695, %v4376_v32 }
0x1bc8   : > { %6746 = vpow2.f32 %v4379_v35 }
0x1bd2   : > { %v6747_v36 = vpop.eup %6746 }
0x1bd3   : > { %6285 = vmatmul.mubr.msk.f32.vlgmr.msra.gmra.mrb[46].mxu1 %vm4387_vm8, %v6747_v36  ;;  %v4384_v37 = vsel %vm4368_vm7, %v6747_v36, 0.0 }
0x1bd4   : > { %4385 = vadd.xlane.f32.xlu0 %v4384_v37  ;;  %6306 = vmatprep.mubr.msk.f32.mxu1 %vm6922_vm0, %v6923_v1 }
0x1bd5   : > { %6563 = vmatpush3.bf16.msra.mxu1 %v6562_v50 }
0x1bd6   : > { %6564 = vmatprep.subr.bf16.mxu1 %v6921_v0 }
0x1bd8   : > { %4382 = vadd.xlane.f32.xlu0 %v4381_v38 }
0x1bd9   : > { %6566 = vmatpush3.bf16.msra.mxu1 %v6565_v63 }
0x1bda   : > { %6573 = vmatprep.subr.bf16.mxu1 %v6921_v0 }
0x1c32   : > { %v4460_v46 = vpop.f32.mrb[44].mxu0 }
0x1c33   : > { %v6281_v15 = vpop.f32.mrb[45].mxu0 }
0x1c61   : > { %v4386_v47 = vpop.xlane.xlu0 %4385 }
0x1c62   : > { %6748 = vrcp.f32 %v4386_v47 }
0x1c65   : > { %v4383_v54 = vpop.xlane.xlu0 %4382 }
0x1c66   : > { %6750 = vrcp.f32 %v4383_v54  ;;  %v5232_v54 = vld [vmem:[#allocation7 + $0x370] sm:$0xff] }
0x1c6c   : > { %v6749_v51 = vpop.eup %6748 }
0x1c70   : > { %v6751_v55 = vpop.eup %6750 }
0x1c71   : > { %v4541_v56 = vmul.f32 %v6751_v55, %v4460_v46 }
0x1c73   : > { %v4543_v57 = vadd.f32 %v4541_v56, %v7517_v33  ;;  %v4808_v33 = vld [vmem:[#allocation7 + $0x340] sm:$0xff]  ;;  %v5233_v56 = vld [vmem:[#allocation7 + $0x378] sm:$0xff] }
0x1c74   : > { %v6574_v10 = vpack.c.bf16 %v4809_v8, %v4808_v33  ;;  %v5319_v8 = vld [vmem:[%s7694_s6 + $0x10] sm:$0xff] }
0x1ca6   : > { %v4535_v52 = vpop.f32.mrb[46].mxu1 }
0x1ca7   : > { %v4542_v31 = vmul.f32 %v6749_v51, %v4535_v52  ;;  %v6286_v29 = vpop.f32.mrb[47].mxu1 }
0x1ca8   : > { %v5230_v29 = vld [vmem:[#allocation7 + $0x360] sm:$0xff] }
0x1ca9   : > { %v4544_v22 = vadd.f32 %v4542_v31, %v4210_v13  ;;  %v4811_v13 = vld [vmem:[#allocation7 + $0x358] sm:$0xff] }
0x1caa   : > { %v6577_v14 = vpack.c.bf16 %v4811_v13, %v4810_v12 }
0x1cab   : > { %4546 = vrot.lane.b32.xlu0 %v4544_v22, %s6925_s23  ;;  %v5231_v22 = vld [vmem:[#allocation7 + $0x368] sm:$0xff] }
0x1cac   : > { %v6580_v55 = vpack.c.bf16 %v5231_v22, %v5230_v29 }
0x1d1d   : > { %v4547_v58 = vpop.permute.xlu0 %4546 }
0x1d1e   : > { %v4549_v59 = vsel %vm625_vm2, %v4543_v57, %v4547_v58  ;;  %v6583_v57 = vpack.c.bf16 %v5233_v56, %v5232_v54 }
0x1d1f   : > { %6296 = vmatmul.mubr.msk.f32.vlgmr.msra.gmra.mrb[46].mxu0 %vm359_vm1, %v4549_v59 }
0x1d20   : > { %6317 = vmatprep.mubr.msk.f32.mxu0 %vm6922_vm0, %v6923_v1  ;;  %6569 = vmatpush3.bf16.msra.mxu0 %v6568_v60 }
0x1d21   : > { %6570 = vmatprep.subr.bf16.mxu0 %v6921_v0 }
0x1d24   : > { %6572 = vmatpush3.bf16.msra.mxu0 %v6571_v4 }
0x1d25   : > { %6331 = vmatprep.subr.mxu0 %v6923_v1 }
0x1df2   : > { %v4632_v6 = vpop.f32.mrb[46].mxu0 }
0x1df3   : > { %v4633_v7 = vadd.f32 %v5645_v5, %v4632_v6  ;;  %v6297_v34 = vpop.f32.mrb[47].mxu0 }
0x1df4   : > { %v5318_v34 = vld [vmem:[%s7694_s6 + $0x8] sm:$0xff] }
0x1df5   : > { %v4636_v9 = vmax.f32 %v4633_v7, 0.0  ;;  %v5317_v7 = vld [vmem:[%s7694_s6] sm:$0xff] }
0x1df6   : > { %v6586_v33 = vpack.c.bf16 %v5318_v34, %v5317_v7 }
0x1df7   : > { %v4637_v11 = vadd.f32 %v4636_v9, %v4549_v59  ;;  %v5320_v9 = vld [vmem:[%s7694_s6 + $0x18] sm:$0xff] }
0x1df9   : > { %6307 = vmatmul.mubr.msk.f32.vlgmr.msra.gmra.mrb[48].mxu1 %vm359_vm1, %v4637_v11  ;;  %6318 = vmatmul.mubr.msk.f32.vlgmr.msra.gmra.mrb[48].mxu0 %vm359_vm1, %v4637_v11 }
0x1dfa   : > { %6575 = vmatpush3.bf16.msra.mxu1 %v6574_v10  ;;  %6328 = vmatprep.mubr.msk.f32.mxu1 %vm6922_vm0, %v6923_v1  ;;  %v6589_v10 = vpack.c.bf16 %v5320_v9, %v5319_v8 }
0x1dfb   : > { %6576 = vmatprep.subr.bf16.mxu1 %v6921_v0  ;;  %6333 = vmatprep.mubr.msk.f32.mxu0 %vm6922_vm0, %v6923_v1 }
0x1dfe   : > { %6578 = vmatpush3.bf16.msra.mxu1 %v6577_v14 }
0x1dff   : > { %6336 = vmatprep.subr.mxu1 %v6923_v1 }
0x1e01   : > { %6329 = vmatmul.mubr.msk.f32.vlgmr.msra.gmra.mrb[50].mxu1 %vm359_vm1, %v4637_v11  ;;  %v5665_v11 = vld [vmem:[%s7693_s5 + $0x1b] ss:$0 sm:$0xff] }
0x1e02   : > { %6338 = vmatprep.mubr.msk.f32.mxu1 %vm6922_vm0, %v6923_v1 }
0x1ecc   : > { %v4720_v17 = vpop.f32.mrb[48].mxu1  ;;  %v4803_v18 = vpop.f32.mrb[48].mxu0 }
0x1ecd   : > { %v4804_v20 = vadd.f32 %v5651_v16, %v4803_v18  ;;  %v6308_v21 = vpop.f32.mrb[49].mxu1  ;;  %v6319_v23 = vpop.f32.mrb[49].mxu0  ;;  %v7583_v25 = vadd.f32 %v5648_v19, %v4720_v17 }
0x1ecf   : > { %4895 = vrot.lane.b32.xlu1 %v4804_v20, %s6924_s12  ;;  %6332 = vmatpush3.xpose.msk.msra.mxu0 %vm625_vm2, %v4804_v20 }
0x1ed0   : > { %6341 = vmatprep.subr.mxu0 %v6923_v1 }
0x1ed2   : > { %6334 = vmatmul.mubr.msk.f32.vlgmr.msra.gmra.mrb[50].mxu0 %vm625_vm2, %v7583_v25 }
0x1ed3   : > { %4891 = vrot.lane.b32.xlu1 %v7583_v25, %s6924_s12  ;;  %6343 = vmatprep.mubr.msk.f32.mxu0 %vm6922_vm0, %v6923_v1 }
0x1ed4   : > { %v4886_v26 = vpop.f32.mrb[50].mxu1 }
0x1ed5   : > { %v4887_v27 = vadd.f32 %v5654_v24, %v4886_v26  ;;  %v6330_v28 = vpop.f32.mrb[51].mxu1 }
0x1ed7   : > { %6342 = vmatpush3.msk.msra.mxu0 %vm4391_vm6, %v4887_v27  ;;  %4898 = vrot.lane.b32.xlu1 %v4887_v27, %s6924_s12 }
0x1ed8   : > { %6579 = vmatprep.subr.bf16.mxu0 %v6921_v0 }
0x1f41   : > { %v4896_v30 = vpop.permute.xlu1 %4895 }
0x1f42   : > { %6337 = vmatpush3.xpose.msk.msra.mxu1 %vm625_vm2, %v4896_v30 }
0x1f43   : > { %6346 = vmatprep.subr.mxu1 %v6923_v1 }
0x1f45   : > { %v4892_v32 = vpop.permute.xlu1 %4891 }
0x1f46   : > { %6339 = vmatmul.mubr.msk.f32.vlgmr.msra.gmra.mrb[52].mxu1 %vm625_vm2, %v4892_v32 }
0x1f47   : > { %6348 = vmatprep.mubr.msk.f32.mxu1 %vm6922_vm0, %v6923_v1 }
0x1f49   : > { %v4899_v35 = vpop.permute.xlu1 %4898 }
0x1f4a   : > { %6347 = vmatpush3.msk.msra.mxu1 %vm4391_vm6, %v4899_v35 }
0x1f4b   : > { %6585 = vmatprep.subr.bf16.mxu1 %v6921_v0 }
0x1fa5   : > { %v4970_v36 = vpop.f32.mrb[50].mxu0 }
0x1fa6   : > { %v5048_v37 = vmul.f32 0.17677669, %v4970_v36  ;;  %v6335_v38 = vpop.f32.mrb[51].mxu0 }
0x1fa8   : > { %v5050_v39 = vsel %vm4368_vm7, %v5048_v37, -inf }
0x1fa9   : > { %5051 = vmax.xlane.f32.xlu1 %v5050_v39 }
0x2019   : > { %v5044_v41 = vpop.f32.mrb[52].mxu1 }
0x201a   : > { %v5049_v42 = vmul.f32 0.17677669, %v5044_v41  ;;  %v6340_v43 = vpop.f32.mrb[53].mxu1 }
0x201c   : > { %v5053_v45 = vsel %vm4368_vm7, %v5049_v42, -inf }
0x201d   : > { %5054 = vmax.xlane.f32.xlu0 %v5053_v45 }
0x2036   : > { %v5052_v40 = vpop.xlane.xlu1 %5051 }
0x2037   : > { %v5056_v46 = vsub.f32 %v5048_v37, %v5052_v40 }
0x2039   : > { %v5058_v15 = vmul.f32 1.442695, %v5056_v46 }
0x203b   : > { %6752 = vpow2.f32 %v5058_v15 }
0x2045   : > { %v6753_v47 = vpop.eup %6752 }
0x2046   : > { %6344 = vmatmul.mubr.msk.f32.vlgmr.msra.gmra.mrb[52].mxu0 %vm4387_vm8, %v6753_v47  ;;  %v5062_v31 = vsel %vm4368_vm7, %v6753_v47, 0.0 }
0x2047   : > { %6359 = vmatprep.mubr.msk.f32.mxu0 %vm6922_vm0, %v6923_v1  ;;  %6581 = vmatpush3.bf16.msra.mxu0 %v6580_v55 }
0x2048   : > { %6582 = vmatprep.subr.bf16.mxu0 %v6921_v0 }
0x204b   : > { %6584 = vmatpush3.bf16.msra.mxu0 %v6583_v57 }
0x20aa   : > { %v5055_v48 = vpop.xlane.xlu0 %5054 }
0x20ab   : > { %v5057_v49 = vsub.f32 %v5049_v42, %v5055_v48 }
0x20ad   : > { %v5060_v50 = vmul.f32 1.442695, %v5057_v49 }
0x20af   : > { %6754 = vpow2.f32 %v5060_v50 }
0x20b9   : > { %v6755_v51 = vpop.eup %6754 }
0x20ba   : > { %6349 = vmatmul.mubr.msk.f32.vlgmr.msra.gmra.mrb[54].mxu1 %vm4387_vm8, %v6755_v51  ;;  %v5065_v52 = vsel %vm4368_vm7, %v6755_v51, 0.0 }
0x20bb   : > { %5066 = vadd.xlane.f32.xlu0 %v5065_v52  ;;  %6370 = vmatprep.mubr.msk.f32.mxu1 %vm6922_vm0, %v6923_v1 }
0x20bc   : > { %6587 = vmatpush3.bf16.msra.mxu1 %v6586_v33 }
0x20bd   : > { %6588 = vmatprep.subr.bf16.mxu1 %v6921_v0  ;;  %v5667_v0 = vld [vmem:[%s7695_s7] ss:$0 sm:$0xff] }
0x20bf   : > { %5063 = vadd.xlane.f32.xlu0 %v5062_v31 }
0x20c0   : > { %6590 = vmatpush3.bf16.msra.mxu1 %v6589_v10 }
0x2119   : > { %v5139_v58 = vpop.f32.mrb[52].mxu0 }
0x211a   : > { %v6345_v59 = vpop.f32.mrb[53].mxu0 }
0x2148   : > { %v5067_v53 = vpop.xlane.xlu0 %5066 }
0x2149   : > { %6756 = vrcp.f32 %v5067_v53 }
0x214c   : > { %v5064_v63 = vpop.xlane.xlu0 %5063 }
0x214d   : > { %6758 = vrcp.f32 %v5064_v63 }
0x2153   : > { %v6757_v44 = vpop.eup %6756 }
0x2157   : > { %v6759_v2 = vpop.eup %6758 }
0x2158   : > { %v5220_v3 = vmul.f32 %v6759_v2, %v5139_v58 }
0x215a   : > { %v5222_v4 = vadd.f32 %v5220_v3, %v7583_v25 }
0x218d   : > { %v5214_v60 = vpop.f32.mrb[54].mxu1 }
0x218e   : > { %v5221_v1 = vmul.f32 %v6757_v44, %v5214_v60  ;;  %v6350_v61 = vpop.f32.mrb[55].mxu1 }
0x2190   : > { %v5223_v62 = vadd.f32 %v5221_v1, %v4892_v32 }
0x2192   : > { %5225 = vrot.lane.b32.xlu0 %v5223_v62, %s6925_s23  ;;  %s6844_s23 = scalar_lea.vmem %s7647_s17, 64 }
0x2193   : > { %p6845_p12 = scmp.ne.s32.totalorder %s7647_s17, %s6844_s23  ;;  %p6852_p1 = scmp.lt.s32.totalorder %s6850_s10, %s6844_s23 }
0x2195   : > { %p6846_p8 = pnand %p6845_p12, %p7720_p7  ;;  %p6853_p6 = por %p6852_p1, %p6851_p13 }
0x2197   : > { %p6847_p11 = pneg %p6846_p8 }
0x2199   : > { %p6854_p9 = pnand %p6853_p6, %p6847_p11 }
0x2204   : > { %v5226_v5 = vpop.permute.xlu0 %5225 }
0x2205   : > { %v5228_v6 = vsel %vm625_vm2, %v5222_v4, %v5226_v5 }
0x2206   : > { %6360 = vmatmul.mubr.msk.f32.vlgmr.msra.gmra.mrb[54].mxu0 %vm359_vm1, %v5228_v6 }
0x22d9   : > { %v5311_v12 = vpop.f32.mrb[54].mxu0 }
0x22da   : > { %v5312_v13 = vadd.f32 %v5665_v11, %v5311_v12  ;;  %v6361_v14 = vpop.f32.mrb[55].mxu0 }
0x22dc   : > { %v5315_v16 = vmax.f32 %v5312_v13, 0.0 }
0x22de   : > { %v5316_v17 = vadd.f32 %v5315_v16, %v5228_v6 }
0x22e0   : > { %6371 = vmatmul.mubr.msk.f32.vlgmr.msra.gmra.mrb[56].mxu1 %vm359_vm1, %v5316_v17 }
0x23b3   : > { %v5397_v18 = vpop.f32.mrb[56].mxu1 }
0x23b4   : > { %v5398_v19 = vadd.f32 %v5667_v0, %v5397_v18  ;;  %v6372_v20 = vpop.f32.mrb[57].mxu1 }
0x23b6   : > { %5401 = vst.msk [vmem:[%s340_s29] sm:$0xf] %vm3692_vm5, %v5398_v19 }
0x23b7   : > { %6857 = shalt.err (!%p6854_p9)
}
0x23b8   : > { %s6858_s11 = scalar_lea.hbm %s7645_s24, 64  ;;  %s6862_s13 = scalar_lea.hbm %s7696_s8, 128 }
0x23b9   : > { %p6859_p2 = scmp.ne.s32.totalorder %s7645_s24, %s6858_s11  ;;  %p6863_p5 = scmp.lt.u32.totalorder %s7645_s24, %s7696_s8 }
0x23ba   : > { %p6864_p10 = scmp.lt.u32.totalorder %s6862_s13, %s6858_s11  ;;  %p6866_p12 = scmp.lt.u32.totalorder %s6858_s11, %s7645_s24 }
0x23bb   : > { %p6860_p0 = pnand %p6859_p2, %p7720_p7 }
0x23bc   : > { %p6865_p4 = por %p6864_p10, %p6863_p5 }
0x23bd   : > { %p6861_p3 = pneg %p6860_p0 }
0x23be   : > { %p6867_p8 = por %p6866_p12, %p6865_p4 }
0x23c0   : > { %p6868_p11 = pnand %p6867_p8, %p6861_p3 }
0x23c2   : > { %6871 = shalt.err (!%p6868_p11)
}
0x23c3   : > { %6603 = dma.vmem_to_hbm [thread:$0]  (%p7720_p7), %s7647_s17, 64, %s7645_s24, %s5403_s18  }
0x23c4 PF: > { %s7721_s19 = sld [smem:[#allocation15_spill]]  ;;  %p6625_p13 = scmp.ge.s32.totalorder %s6914_s30, 2 }
0x23c5   : > { %s5428_s22 = sand.u32 1, %s6902_s27  }
0x23c6   : > { %s5429_s29 = scalar_lea.sflag [#allocation4], %s5428_s22 }
0x23ca   : > { %p7722_p1 = scmp.ne.s32.totalorder %s7721_s19, 0 }
0x23cc   : > { %p6616_p6 = pnand %p6625_p13, %p7722_p1 }
0x23ce   : > { %6897 = dma.done.wait (!%p6616_p6), %s5429_s29, 64  }
0x23cf   : > { %6899 = vsyncadd (!%p6616_p6), %s5429_s29, 4294967232  ;;  %s7723_s30 = sld [smem:[#allocation13_spill]]  ;;  %s7724_s12 = sld [smem:[#allocation12_spill]] }
0x23d0   : > { %s7725_s29 = sld [smem:[#allocation14_spill]]  ;;  %s7726_s27 = smov %s6906_s28 }
0x23d5   : > { %p20_p9 = scmp.ge.s32.totalorder %s7723_s30, 4   ;;  %s7727_s28 = smov %s7724_s12 }
0x23d7   :  { %22 = sbr.rel (!%p20_p9) target bundleno = 5 (0x5), region = 154 }
0x23de   :  { %5434 = vsyncpa [#allocation3], 1 }
0x23df   :  { %5436 = vsyncpa [#allocation3 + $0x1], 1 }
0x23e0   :  { %5437 = vsyncpa [#allocation6], 1 }
0x23e1   :  { %5438 = vsyncpa [#allocation4], 1 }
0x23e2   :  { %5440 = vsyncpa [#allocation4 + $0x1], 1 }

</bundles_post_ra>
